<compile_context>
chip_gen: v5e
topology: v5e:2x2
jax: 0.10.0
libtpu: 0.0.40
codegen_flags: <defaults>
</compile_context>

<pallas_src>
import functools

import jax
import jax.numpy as jnp
from jax.experimental import pallas as pl
from jax.experimental.pallas import tpu as pltpu

LN_EPS = 1e-5          # PyTorch nn.LayerNorm default eps
FORGET_BIAS = 1.0      # STRPMCell._forget_bias


# ---------------------------------------------------------------------------
# Pallas kernels
# ---------------------------------------------------------------------------
def _fused_conv_ln_kernel(p_ref, w_ref, b_ref, g_ref, bt_ref, o_ref):
    """One (conv, batch) grid step: Y = W @ P + b, LayerNorm over all (C,HW)."""
    y = jnp.dot(w_ref[...], p_ref[...], preferred_element_type=jnp.float32)
    y = y + b_ref[...]                                   # (Cn, HW)
    n = y.shape[0] * y.shape[1]
    s = jnp.sum(y)                                       # single-pass statistics
    ss = jnp.sum(y * y)
    mean = s / n
    var = ss / n - mean * mean                           # biased var (torch LN)
    yn = (y - mean) * jax.lax.rsqrt(var + LN_EPS)
    o_ref[...] = yn * g_ref[...] + bt_ref[...]


def _gates_cm_kernel(xt_ref, xs_ref, hc_ref, mc_ref, ca_ref, ma_ref,
                     c_ref, m_ref):
    """Fused i/f/g gates for the temporal (c) and spatial (m) memories."""
    s1 = xt_ref[...] + hc_ref[...]
    c_ref[...] = (jax.nn.sigmoid(s1) * jnp.tanh(s1)
                  + jax.nn.sigmoid(s1 + FORGET_BIAS) * ca_ref[...])
    s2 = xs_ref[...] + mc_ref[...]
    m_ref[...] = (jax.nn.sigmoid(s2) * jnp.tanh(s2)
                  + jax.nn.sigmoid(s2 + FORGET_BIAS) * ma_ref[...])


def _tail_kernel(cond_ref, mp_ref, wc_ref, bc_ref, g_ref, bt_ref,
                 ox_ref, hc_ref, t_ref, s_ref,
                 wst_ref, wss_ref, wso_ref, bs_ref,
                 out_ref, onew_ref):
    """conv_o(+LN) & conv_last as one matmul, then o/h gates, conv_sto,
    and the data-dependent residual blend — all in one kernel per sample."""
    cn = g_ref.shape[0]
    y = jnp.dot(wc_ref[...], mp_ref[...], preferred_element_type=jnp.float32)
    y = y + bc_ref[...]                                  # (2Cn, HW)
    conv_o_pre = y[:cn]                                  # conv_o pre-LN
    conv_last = y[cn:]                                   # conv_last output

    n = conv_o_pre.shape[0] * conv_o_pre.shape[1]
    mean = jnp.sum(conv_o_pre) / n
    var = jnp.sum(conv_o_pre * conv_o_pre) / n - mean * mean
    ln = ((conv_o_pre - mean) * jax.lax.rsqrt(var + LN_EPS)
          * g_ref[...] + bt_ref[...])

    o_new = jax.nn.sigmoid(ox_ref[...] + hc_ref[...] + ln)
    h_new = o_new * jnp.tanh(conv_last)

    sto = (jnp.dot(wst_ref[...], t_ref[...], preferred_element_type=jnp.float32)
           + jnp.dot(wss_ref[...], s_ref[...], preferred_element_type=jnp.float32)
           + jnp.dot(wso_ref[...], o_new, preferred_element_type=jnp.float32)
           + bs_ref[...])

    c = cond_ref[0, 0]                                   # 1.0 iff mean(t-s)==0
    out_ref[...] = h_new + c * t_ref[...] + (1.0 - c) * sto
    onew_ref[...] = o_new


# ---------------------------------------------------------------------------
# Pallas wrappers
# ---------------------------------------------------------------------------
def fused_conv_ln(patches, w, b, gamma, beta):
    """patches: (G,B,K,HW) bf16; w: (G,Cn,K) bf16; b: (G,Cn,1);
    gamma/beta: (G,Cn,HW) f32.  -> (G,B,Cn,HW) f32."""
    G, B, K, HW = patches.shape
    Cn = w.shape[1]
    return pl.pallas_call(
        _fused_conv_ln_kernel,
        out_shape=jax.ShapeDtypeStruct((G, B, Cn, HW), jnp.float32),
        grid=(G, B),
        in_specs=[
            pl.BlockSpec((None, None, K, HW), lambda g, i: (g, i, 0, 0)),
            pl.BlockSpec((None, Cn, K), lambda g, i: (g, 0, 0)),
            pl.BlockSpec((None, Cn, 1), lambda g, i: (g, 0, 0)),
            pl.BlockSpec((None, Cn, HW), lambda g, i: (g, 0, 0)),
            pl.BlockSpec((None, Cn, HW), lambda g, i: (g, 0, 0)),
        ],
        out_specs=pl.BlockSpec((None, None, Cn, HW), lambda g, i: (g, i, 0, 0)),
        compiler_params=pltpu.CompilerParams(
            dimension_semantics=("parallel", "parallel")),
    )(patches, w, b, gamma, beta)


def _num_row_blocks(rows):
    for nb in (4, 2, 1):
        if rows % nb == 0 and (rows // nb) % 8 == 0:
            return nb
    return 1


def gates_cm(x_t, x_s, h_c, m_c, c_am, m_am):
    """All inputs (R, HW) f32 with lane-dense HW; pipelined over row blocks."""
    R, L = x_t.shape
    nb = _num_row_blocks(R)
    br = R // nb
    spec = pl.BlockSpec((br, L), lambda i: (i, 0))
    return pl.pallas_call(
        _gates_cm_kernel,
        out_shape=(jax.ShapeDtypeStruct((R, L), jnp.float32),
                   jax.ShapeDtypeStruct((R, L), jnp.float32)),
        grid=(nb,),
        in_specs=[spec] * 6,
        out_specs=(spec, spec),
        compiler_params=pltpu.CompilerParams(dimension_semantics=("parallel",)),
    )(x_t, x_s, h_c, m_c, c_am, m_am)


def tail_fused(cond, mem_patches, wc, bc, gamma_o, beta_o,
               o_x, h_c, t_f, s_f, wst, wss, wso, bs):
    B, K3, HW = mem_patches.shape
    Cn = gamma_o.shape[0]
    Cin = t_f.shape[1]

    def wspec(shape):
        nd = len(shape)
        return pl.BlockSpec(shape, lambda b, nd=nd: (0,) * nd)

    def bspec(c):
        return pl.BlockSpec((None, c, HW), lambda b: (b, 0, 0))

    return pl.pallas_call(
        _tail_kernel,
        out_shape=(jax.ShapeDtypeStruct((B, Cn, HW), jnp.float32),
                   jax.ShapeDtypeStruct((B, Cn, HW), jnp.float32)),
        grid=(B,),
        in_specs=[
            pl.BlockSpec((1, 1), lambda b: (0, 0),
                         memory_space=pltpu.MemorySpace.SMEM),   # cond scalar
            pl.BlockSpec((None, K3, HW), lambda b: (b, 0, 0)),   # mem patches (bf16)
            wspec((2 * Cn, K3)),                                 # combined conv_o|conv_last W
            wspec((2 * Cn, 1)),                                  # combined bias
            wspec((Cn, HW)),                                     # gamma (conv_o LN)
            wspec((Cn, HW)),                                     # beta
            bspec(Cn),                                           # o_x
            bspec(Cn),                                           # h_c
            bspec(Cin),                                          # t_t
            bspec(Cin),                                          # s_t
            wspec((Cn, Cin)),                                    # conv_sto W (t part)
            wspec((Cn, Cin)),                                    # conv_sto W (s part)
            wspec((Cn, Cn)),                                     # conv_sto W (o part)
            wspec((Cn, 1)),                                      # conv_sto bias
        ],
        out_specs=(bspec(Cn), bspec(Cn)),
        compiler_params=pltpu.CompilerParams(dimension_semantics=("parallel",)),
    )(cond, mem_patches, wc, bc, gamma_o, beta_o,
      o_x, h_c, t_f, s_f, wst, wss, wso, bs)


# ---------------------------------------------------------------------------
# Glue: CHW im2col, parameter init/prep, full forward
# ---------------------------------------------------------------------------
def im2col_chw(x, H, W, kh, kw):
    """x: (B, C, H*W) -> (B, C*kh*kw, H*W); 'same' padding, stride 1.
    Row ordering (c*kh*kw + ky*kw + kx) matches torch weight.reshape(Co, Ci*kh*kw)."""
    # TODO(synk): patch extraction stays in XLA (pad+stack); an in-kernel
    # shifted-slice version would need costly sublane/lane relayouts.
    B, C, _ = x.shape
    ph, pw = kh // 2, kw // 2
    xi = x.reshape(B, C, H, W)
    xp = jnp.pad(xi, ((0, 0), (0, 0), (ph, ph), (pw, pw)))
    taps = [xp[:, :, ky:ky + H, kx:kx + W]
            for ky in range(kh) for kx in range(kw)]
    p = jnp.stack(taps, axis=2)                          # (B, C, kh*kw, H, W)
    return p.reshape(B, C * kh * kw, H * W)


def init_params(key, in_channel, num_hidden, height, width, filter_size, tau):
    kh, kw = filter_size
    taps = kh * kw
    hw = height * width
    Cn = num_hidden
    conv_cin = {
        "en_t": in_channel, "en_s": in_channel, "en_o": in_channel,
        "conv_h": Cn, "conv_m": Cn, "conv_o": 2 * Cn,
        "att_c": Cn * tau, "att_m": Cn * tau,
    }
    params = {}
    keys = jax.random.split(key, len(conv_cin) + 2)
    for i, (name, cin) in enumerate(conv_cin.items()):
        kw_, kb_ = jax.random.split(keys[i])
        k_in = cin * taps
        params[name] = {
            "w": jax.random.normal(kw_, (Cn, k_in), jnp.float32) / k_in ** 0.5,
            "b": jax.random.normal(kb_, (Cn,), jnp.float32) * 0.01,
            "gamma": jnp.ones((Cn, hw), jnp.float32),    # LayerNorm([C,H,W]) init
            "beta": jnp.zeros((Cn, hw), jnp.float32),
        }
    for j, (name, k_in) in enumerate(
            [("conv_last", 2 * Cn), ("conv_sto", 2 * in_channel + Cn)]):
        kw_, kb_ = jax.random.split(keys[len(conv_cin) + j])
        params[name] = {
            "w": jax.random.normal(kw_, (Cn, k_in), jnp.float32) / k_in ** 0.5,
            "b": jax.random.normal(kb_, (Cn,), jnp.float32) * 0.01,
        }
    return params


def prepare_params(raw, in_channel, num_hidden, filter_size):
    """One-time packing: stack same-K conv groups, fold conv_last into conv_o,
    split conv_sto, cast matmul weights to bf16."""
    kh, kw = filter_size
    taps = kh * kw
    Cn = num_hidden
    center = (kh // 2) * kw + (kw // 2)

    g1_names = ("en_t", "en_s", "en_o", "conv_h", "conv_m")
    K1 = max(raw[n]["w"].shape[1] for n in g1_names)

    def pad_w(w):
        return w if w.shape[1] == K1 else jnp.pad(w, ((0, 0), (0, K1 - w.shape[1])))

    prep = {
        "g1_w": jnp.stack([pad_w(raw[n]["w"]) for n in g1_names]).astype(jnp.bfloat16),
        "g1_b": jnp.stack([raw[n]["b"] for n in g1_names])[..., None],
        "g1_g": jnp.stack([raw[n]["gamma"] for n in g1_names]),
        "g1_bt": jnp.stack([raw[n]["beta"] for n in g1_names]),
        "g2_w": jnp.stack([raw[n]["w"] for n in ("att_c", "att_m")]).astype(jnp.bfloat16),
        "g2_b": jnp.stack([raw[n]["b"] for n in ("att_c", "att_m")])[..., None],
        "g2_g": jnp.stack([raw[n]["gamma"] for n in ("att_c", "att_m")]),
        "g2_bt": jnp.stack([raw[n]["beta"] for n in ("att_c", "att_m")]),
    }

    # conv_o (kxk) + conv_last (1x1, embedded at the centre tap) -> one matmul.
    w_o = raw["conv_o"]["w"]                              # (Cn, 2Cn*taps)
    w_last = raw["conv_last"]["w"]                        # (Cn, 2Cn)
    w_last_emb = jnp.zeros((Cn, 2 * Cn, taps), jnp.float32)
    w_last_emb = w_last_emb.at[:, :, center].set(w_last).reshape(Cn, 2 * Cn * taps)
    prep["wc"] = jnp.concatenate([w_o, w_last_emb], axis=0).astype(jnp.bfloat16)
    prep["bc"] = jnp.concatenate([raw["conv_o"]["b"], raw["conv_last"]["b"]])[:, None]
    prep["gamma_o"] = raw["conv_o"]["gamma"]
    prep["beta_o"] = raw["conv_o"]["beta"]

    w_sto = raw["conv_sto"]["w"]                          # (Cn, 2*Cin + Cn)
    cin = in_channel
    prep["w_sto_t"] = w_sto[:, :cin]
    prep["w_sto_s"] = w_sto[:, cin:2 * cin]
    prep["w_sto_o"] = w_sto[:, 2 * cin:]
    prep["b_sto"] = raw["conv_sto"]["b"][:, None]
    return prep


def strpm_forward(prep, cfg, t_t, s_t, o_t, h_t, c_t, m_t, c_att, m_att):
    """Mirrors STRPMCell.forward.  All PyTorch-facing tensors are NCHW.
    (c_t is accepted but unused, matching the reference.)"""
    kh, kw = cfg["filter_size"]
    H, W, Cn = cfg["height"], cfg["width"], cfg["num_hidden"]
    HW = H * W
    B, Cin = t_t.shape[0], t_t.shape[1]
    assert Cin == Cn, "residual path (h_new + t_t) requires in_channel == num_hidden"

    flat = lambda x: x.reshape(x.shape[0], x.shape[1], HW)
    t_f, s_f, o_f, h_f, m_f = map(flat, (t_t, s_t, o_t, h_t, m_t))
    c_att_f = jnp.concatenate([flat(a) for a in c_att], axis=1)
    m_att_f = jnp.concatenate([flat(a) for a in m_att], axis=1)

    patch = lambda x: im2col_chw(x.astype(jnp.bfloat16), H, W, kh, kw)
    K1 = prep["g1_w"].shape[-1]

    def pad_k(p):
        return p if p.shape[1] == K1 else jnp.pad(
            p, ((0, 0), (0, K1 - p.shape[1]), (0, 0)))

    g1_p = jnp.stack([pad_k(patch(x)) for x in (t_f, s_f, o_f, h_f, m_f)])
    g2_p = jnp.stack([patch(c_att_f), patch(m_att_f)])

    g1 = fused_conv_ln(g1_p, prep["g1_w"], prep["g1_b"], prep["g1_g"], prep["g1_bt"])
    g2 = fused_conv_ln(g2_p, prep["g2_w"], prep["g2_b"], prep["g2_g"], prep["g2_bt"])
    x_t, x_s, o_x, h_c, m_c = g1[0], g1[1], g1[2], g1[3], g1[4]     # (B, Cn, HW)
    c_am, m_am = g2[0], g2[1]

    R = B * Cn
    fl = lambda x: x.reshape(R, HW)
    c_new_f, m_new_f = gates_cm(fl(x_t), fl(x_s), fl(h_c), fl(m_c),
                                fl(c_am), fl(m_am))
    c_new = c_new_f.reshape(B, Cn, HW)
    m_new = m_new_f.reshape(B, Cn, HW)

    mem = jnp.concatenate([c_new, m_new], axis=1)                   # (B, 2Cn, HW)
    mem_p = im2col_chw(mem.astype(jnp.bfloat16), H, W, kh, kw)      # (B, 2Cn*kh*kw, HW)

    # Data-dependent PyTorch branch: both branches computed, blended in-kernel.
    cond = (jnp.mean(t_t - s_t) == 0.0).astype(jnp.float32).reshape(1, 1)

    output_f, o_new_f = tail_fused(cond, mem_p, prep["wc"], prep["bc"],
                                   prep["gamma_o"], prep["beta_o"],
                                   o_x, h_c, t_f, s_f,
                                   prep["w_sto_t"], prep["w_sto_s"],
                                   prep["w_sto_o"], prep["b_sto"])

    to4 = lambda x: x.reshape(B, Cn, H, W)
    return to4(output_f), to4(o_new_f), to4(c_new), to4(m_new)


# ---------------------------------------------------------------------------
if __name__ == "__main__":
    # STRPMCell requires in_channel == num_hidden for the residual / conv_sto path.
    B, C, H, W = 2, 32, 16, 16
    filter_size = (3, 3)
    tau = 2

    key = jax.random.PRNGKey(0)
    keys = jax.random.split(key, 6 + 2 * tau)
    t_t = jax.random.normal(keys[0], (B, C, H, W), jnp.float32)
    s_t = jax.random.normal(keys[1], (B, C, H, W), jnp.float32)
    o_t = jax.random.normal(keys[2], (B, C, H, W), jnp.float32)
    h_t = jax.random.normal(keys[3], (B, C, H, W), jnp.float32)
    c_t = jax.random.normal(keys[4], (B, C, H, W), jnp.float32)   # unused (matches ref)
    m_t = jax.random.normal(keys[5], (B, C, H, W), jnp.float32)
    c_att = tuple(jax.random.normal(keys[6 + i], (B, C, H, W), jnp.float32)
                  for i in range(tau))
    m_att = tuple(jax.random.normal(keys[6 + tau + i], (B, C, H, W), jnp.float32)
                  for i in range(tau))

    raw = init_params(jax.random.PRNGKey(42), in_channel=C, num_hidden=C,
                      height=H, width=W, filter_size=filter_size, tau=tau)
    prep = prepare_params(raw, in_channel=C, num_hidden=C, filter_size=filter_size)
    cfg = dict(filter_size=filter_size, num_hidden=C, height=H, width=W)

    fwd = jax.jit(functools.partial(strpm_forward, prep, cfg))
    output, o_new, c_new, m_new = fwd(t_t, s_t, o_t, h_t, c_t, m_t, c_att, m_att)
    jax.block_until_ready((output, o_new, c_new, m_new))

    assert output.shape == (B, C, H, W)
    assert o_new.shape == (B, C, H, W)
    assert c_new.shape == (B, C, H, W)
    assert m_new.shape == (B, C, H, W)
    assert all(bool(jnp.isfinite(x).all()) for x in (output, o_new, c_new, m_new))
    print("KERNEL_OK")
</pallas_src>

<mosaic_0001>
module attributes {stable_mosaic.version = 11 : i64} {
  func.func @_fused_conv_ln_kernel(%arg0: i32, %arg1: i32, %arg2: memref<1x1x288x256xbf16, #tpu.memory_space<vmem>>, %arg3: memref<1x32x288xbf16, #tpu.memory_space<vmem>>, %arg4: memref<1x32x1xf32, #tpu.memory_space<vmem>>, %arg5: memref<1x32x256xf32, #tpu.memory_space<vmem>>, %arg6: memref<1x32x256xf32, #tpu.memory_space<vmem>>, %arg7: memref<1x1x32x256xf32, #tpu.memory_space<vmem>>) attributes {dimension_semantics = [#tpu.dimension_semantics<parallel>, #tpu.dimension_semantics<parallel>], iteration_bounds = array<i64: 5, 2>, scalar_prefetch = 0 : i64, scratch_operands = 0 : i64, tpu.core_type = #tpu.core_type<tc>, window_params = [{transform_indices = @transform_0, window_bounds = array<i64: 1, 1, 288, 256>}, {transform_indices = @transform_1, window_bounds = array<i64: 1, 32, 288>}, {transform_indices = @transform_2, window_bounds = array<i64: 1, 32, 1>}, {transform_indices = @transform_3, window_bounds = array<i64: 1, 32, 256>}, {transform_indices = @transform_4, window_bounds = array<i64: 1, 32, 256>}, {transform_indices = @transform_5, window_bounds = array<i64: 1, 1, 32, 256>}]} {
    %c0 = arith.constant 0 : index
    %c0_0 = arith.constant 0 : index
    %c0_1 = arith.constant 0 : index
    %0 = vector.load %arg3[%c0, %c0_0, %c0_1] : memref<1x32x288xbf16, #tpu.memory_space<vmem>>, vector<1x32x288xbf16>
    %1 = vector.shape_cast %0 : vector<1x32x288xbf16> to vector<32x288xbf16>
    %c0_2 = arith.constant 0 : index
    %c0_3 = arith.constant 0 : index
    %c0_4 = arith.constant 0 : index
    %c0_5 = arith.constant 0 : index
    %2 = vector.load %arg2[%c0_2, %c0_3, %c0_4, %c0_5] : memref<1x1x288x256xbf16, #tpu.memory_space<vmem>>, vector<1x1x288x256xbf16>
    %3 = vector.shape_cast %2 : vector<1x1x288x256xbf16> to vector<288x256xbf16>
    %cst = arith.constant dense<0.000000e+00> : vector<32x256xf32>
    %4 = tpu.matmul %1, %3, %cst {dimension_numbers = #tpu.dot_dimension_numbers<[1], [0], [0], [1], [0, 0, 1, 1], [], []>} : vector<32x288xbf16>, vector<288x256xbf16>, vector<32x256xf32> -> vector<32x256xf32>
    %c0_6 = arith.constant 0 : index
    %c0_7 = arith.constant 0 : index
    %c0_8 = arith.constant 0 : index
    %5 = vector.load %arg4[%c0_6, %c0_7, %c0_8] : memref<1x32x1xf32, #tpu.memory_space<vmem>>, vector<1x32x1xf32>
    %6 = vector.shape_cast %5 : vector<1x32x1xf32> to vector<32x1xf32>
    %7 = vector.broadcast %6 : vector<32x1xf32> to vector<32x256xf32>
    %8 = arith.addf %4, %7 : vector<32x256xf32>
    %9 = vector.shape_cast %8 : vector<32x256xf32> to vector<1x32x256xf32>
    %cst_9 = arith.constant dense<0.000000e+00> : vector<1xf32>
    %10 = vector.multi_reduction <add>, %9, %cst_9 [1, 2] : vector<1x32x256xf32> to vector<1xf32>
    %11 = vector.shape_cast %10 : vector<1xf32> to vector<1x1x1xf32>
    %12 = vector.extract %11[0, 0, 0] : f32 from vector<1x1x1xf32>
    %13 = arith.mulf %8, %8 : vector<32x256xf32>
    %14 = vector.shape_cast %13 : vector<32x256xf32> to vector<1x32x256xf32>
    %cst_10 = arith.constant dense<0.000000e+00> : vector<1xf32>
    %15 = vector.multi_reduction <add>, %14, %cst_10 [1, 2] : vector<1x32x256xf32> to vector<1xf32>
    %16 = vector.shape_cast %15 : vector<1xf32> to vector<1x1x1xf32>
    %17 = vector.extract %16[0, 0, 0] : f32 from vector<1x1x1xf32>
    %cst_11 = arith.constant 8.192000e+03 : f32
    %18 = arith.divf %12, %cst_11 : f32
    %cst_12 = arith.constant 8.192000e+03 : f32
    %19 = arith.divf %17, %cst_12 : f32
    %20 = arith.mulf %18, %18 : f32
    %21 = arith.subf %19, %20 : f32
    %22 = vector.broadcast %18 : f32 to vector<32x256xf32>
    %23 = arith.subf %8, %22 : vector<32x256xf32>
    %cst_13 = arith.constant 9.99999974E-6 : f32
    %24 = arith.addf %21, %cst_13 : f32
    %25 = math.rsqrt %24 : f32
    %26 = vector.broadcast %25 : f32 to vector<32x256xf32>
    %27 = arith.mulf %23, %26 : vector<32x256xf32>
    %c0_14 = arith.constant 0 : index
    %c0_15 = arith.constant 0 : index
    %c0_16 = arith.constant 0 : index
    %28 = vector.load %arg5[%c0_14, %c0_15, %c0_16] : memref<1x32x256xf32, #tpu.memory_space<vmem>>, vector<1x32x256xf32>
    %29 = vector.shape_cast %28 : vector<1x32x256xf32> to vector<32x256xf32>
    %30 = arith.mulf %27, %29 : vector<32x256xf32>
    %c0_17 = arith.constant 0 : index
    %c0_18 = arith.constant 0 : index
    %c0_19 = arith.constant 0 : index
    %31 = vector.load %arg6[%c0_17, %c0_18, %c0_19] : memref<1x32x256xf32, #tpu.memory_space<vmem>>, vector<1x32x256xf32>
    %32 = vector.shape_cast %31 : vector<1x32x256xf32> to vector<32x256xf32>
    %33 = arith.addf %30, %32 : vector<32x256xf32>
    %c0_20 = arith.constant 0 : index
    %c0_21 = arith.constant 0 : index
    %c0_22 = arith.constant 0 : index
    %c0_23 = arith.constant 0 : index
    %34 = vector.load %arg7[%c0_20, %c0_21, %c0_22, %c0_23] : memref<1x1x32x256xf32, #tpu.memory_space<vmem>>, vector<1x1x32x256xf32>
    %35 = vector.shape_cast %34 : vector<1x1x32x256xf32> to vector<32x256xf32>
    %36 = vector.shape_cast %33 : vector<32x256xf32> to vector<1x1x32x256xf32>
    tpu.vector_store %arg7[%c0_20, %c0_21, %c0_22, %c0_23], %36 {strides = array<i32>} : memref<1x1x32x256xf32, #tpu.memory_space<vmem>>, vector<1x1x32x256xf32>,
    return
  }
  func.func @transform_0(%arg0: i32, %arg1: i32) -> (i32, i32, i32, i32) {
    %c0_i32 = arith.constant 0 : i32
    %c0_i32_0 = arith.constant 0 : i32
    %c0_i32_1 = arith.constant 0 : i32
    return %arg0, %arg1, %c0_i32, %c0_i32_0 : i32, i32, i32, i32
  }
  func.func @transform_1(%arg0: i32, %arg1: i32) -> (i32, i32, i32) {
    %c0_i32 = arith.constant 0 : i32
    %c0_i32_0 = arith.constant 0 : i32
    %c0_i32_1 = arith.constant 0 : i32
    return %arg0, %c0_i32, %c0_i32_0 : i32, i32, i32
  }
  func.func @transform_2(%arg0: i32, %arg1: i32) -> (i32, i32, i32) {
    %c0_i32 = arith.constant 0 : i32
    %c0_i32_0 = arith.constant 0 : i32
    %c0_i32_1 = arith.constant 0 : i32
    return %arg0, %c0_i32, %c0_i32_0 : i32, i32, i32
  }
  func.func @transform_3(%arg0: i32, %arg1: i32) -> (i32, i32, i32) {
    %c0_i32 = arith.constant 0 : i32
    %c0_i32_0 = arith.constant 0 : i32
    %c0_i32_1 = arith.constant 0 : i32
    return %arg0, %c0_i32, %c0_i32_0 : i32, i32, i32
  }
  func.func @transform_4(%arg0: i32, %arg1: i32) -> (i32, i32, i32) {
    %c0_i32 = arith.constant 0 : i32
    %c0_i32_0 = arith.constant 0 : i32
    %c0_i32_1 = arith.constant 0 : i32
    return %arg0, %c0_i32, %c0_i32_0 : i32, i32, i32
  }
  func.func @transform_5(%arg0: i32, %arg1: i32) -> (i32, i32, i32, i32) {
    %c0_i32 = arith.constant 0 : i32
    %c0_i32_0 = arith.constant 0 : i32
    %c0_i32_1 = arith.constant 0 : i32
    return %arg0, %arg1, %c0_i32, %c0_i32_0 : i32, i32, i32, i32
  }
}

module attributes {stable_mosaic.version = 11 : i64} {
  func.func @_fused_conv_ln_kernel(%arg0: i32, %arg1: i32, %arg2: memref<1x1x576x256xbf16, #tpu.memory_space<vmem>>, %arg3: memref<1x32x576xbf16, #tpu.memory_space<vmem>>, %arg4: memref<1x32x1xf32, #tpu.memory_space<vmem>>, %arg5: memref<1x32x256xf32, #tpu.memory_space<vmem>>, %arg6: memref<1x32x256xf32, #tpu.memory_space<vmem>>, %arg7: memref<1x1x32x256xf32, #tpu.memory_space<vmem>>) attributes {dimension_semantics = [#tpu.dimension_semantics<parallel>, #tpu.dimension_semantics<parallel>], iteration_bounds = array<i64: 2, 2>, scalar_prefetch = 0 : i64, scratch_operands = 0 : i64, tpu.core_type = #tpu.core_type<tc>, window_params = [{transform_indices = @transform_0, window_bounds = array<i64: 1, 1, 576, 256>}, {transform_indices = @transform_1, window_bounds = array<i64: 1, 32, 576>}, {transform_indices = @transform_2, window_bounds = array<i64: 1, 32, 1>}, {transform_indices = @transform_3, window_bounds = array<i64: 1, 32, 256>}, {transform_indices = @transform_4, window_bounds = array<i64: 1, 32, 256>}, {transform_indices = @transform_5, window_bounds = array<i64: 1, 1, 32, 256>}]} {
    %c0 = arith.constant 0 : index
    %c0_0 = arith.constant 0 : index
    %c0_1 = arith.constant 0 : index
    %0 = vector.load %arg3[%c0, %c0_0, %c0_1] : memref<1x32x576xbf16, #tpu.memory_space<vmem>>, vector<1x32x576xbf16>
    %1 = vector.shape_cast %0 : vector<1x32x576xbf16> to vector<32x576xbf16>
    %c0_2 = arith.constant 0 : index
    %c0_3 = arith.constant 0 : index
    %c0_4 = arith.constant 0 : index
    %c0_5 = arith.constant 0 : index
    %2 = vector.load %arg2[%c0_2, %c0_3, %c0_4, %c0_5] : memref<1x1x576x256xbf16, #tpu.memory_space<vmem>>, vector<1x1x576x256xbf16>
    %3 = vector.shape_cast %2 : vector<1x1x576x256xbf16> to vector<576x256xbf16>
    %cst = arith.constant dense<0.000000e+00> : vector<32x256xf32>
    %4 = tpu.matmul %1, %3, %cst {dimension_numbers = #tpu.dot_dimension_numbers<[1], [0], [0], [1], [0, 0, 1, 1], [], []>} : vector<32x576xbf16>, vector<576x256xbf16>, vector<32x256xf32> -> vector<32x256xf32>
    %c0_6 = arith.constant 0 : index
    %c0_7 = arith.constant 0 : index
    %c0_8 = arith.constant 0 : index
    %5 = vector.load %arg4[%c0_6, %c0_7, %c0_8] : memref<1x32x1xf32, #tpu.memory_space<vmem>>, vector<1x32x1xf32>
    %6 = vector.shape_cast %5 : vector<1x32x1xf32> to vector<32x1xf32>
    %7 = vector.broadcast %6 : vector<32x1xf32> to vector<32x256xf32>
    %8 = arith.addf %4, %7 : vector<32x256xf32>
    %9 = vector.shape_cast %8 : vector<32x256xf32> to vector<1x32x256xf32>
    %cst_9 = arith.constant dense<0.000000e+00> : vector<1xf32>
    %10 = vector.multi_reduction <add>, %9, %cst_9 [1, 2] : vector<1x32x256xf32> to vector<1xf32>
    %11 = vector.shape_cast %10 : vector<1xf32> to vector<1x1x1xf32>
    %12 = vector.extract %11[0, 0, 0] : f32 from vector<1x1x1xf32>
    %13 = arith.mulf %8, %8 : vector<32x256xf32>
    %14 = vector.shape_cast %13 : vector<32x256xf32> to vector<1x32x256xf32>
    %cst_10 = arith.constant dense<0.000000e+00> : vector<1xf32>
    %15 = vector.multi_reduction <add>, %14, %cst_10 [1, 2] : vector<1x32x256xf32> to vector<1xf32>
    %16 = vector.shape_cast %15 : vector<1xf32> to vector<1x1x1xf32>
    %17 = vector.extract %16[0, 0, 0] : f32 from vector<1x1x1xf32>
    %cst_11 = arith.constant 8.192000e+03 : f32
    %18 = arith.divf %12, %cst_11 : f32
    %cst_12 = arith.constant 8.192000e+03 : f32
    %19 = arith.divf %17, %cst_12 : f32
    %20 = arith.mulf %18, %18 : f32
    %21 = arith.subf %19, %20 : f32
    %22 = vector.broadcast %18 : f32 to vector<32x256xf32>
    %23 = arith.subf %8, %22 : vector<32x256xf32>
    %cst_13 = arith.constant 9.99999974E-6 : f32
    %24 = arith.addf %21, %cst_13 : f32
    %25 = math.rsqrt %24 : f32
    %26 = vector.broadcast %25 : f32 to vector<32x256xf32>
    %27 = arith.mulf %23, %26 : vector<32x256xf32>
    %c0_14 = arith.constant 0 : index
    %c0_15 = arith.constant 0 : index
    %c0_16 = arith.constant 0 : index
    %28 = vector.load %arg5[%c0_14, %c0_15, %c0_16] : memref<1x32x256xf32, #tpu.memory_space<vmem>>, vector<1x32x256xf32>
    %29 = vector.shape_cast %28 : vector<1x32x256xf32> to vector<32x256xf32>
    %30 = arith.mulf %27, %29 : vector<32x256xf32>
    %c0_17 = arith.constant 0 : index
    %c0_18 = arith.constant 0 : index
    %c0_19 = arith.constant 0 : index
    %31 = vector.load %arg6[%c0_17, %c0_18, %c0_19] : memref<1x32x256xf32, #tpu.memory_space<vmem>>, vector<1x32x256xf32>
    %32 = vector.shape_cast %31 : vector<1x32x256xf32> to vector<32x256xf32>
    %33 = arith.addf %30, %32 : vector<32x256xf32>
    %c0_20 = arith.constant 0 : index
    %c0_21 = arith.constant 0 : index
    %c0_22 = arith.constant 0 : index
    %c0_23 = arith.constant 0 : index
    %34 = vector.load %arg7[%c0_20, %c0_21, %c0_22, %c0_23] : memref<1x1x32x256xf32, #tpu.memory_space<vmem>>, vector<1x1x32x256xf32>
    %35 = vector.shape_cast %34 : vector<1x1x32x256xf32> to vector<32x256xf32>
    %36 = vector.shape_cast %33 : vector<32x256xf32> to vector<1x1x32x256xf32>
    tpu.vector_store %arg7[%c0_20, %c0_21, %c0_22, %c0_23], %36 {strides = array<i32>} : memref<1x1x32x256xf32, #tpu.memory_space<vmem>>, vector<1x1x32x256xf32>,
    return
  }
  func.func @transform_0(%arg0: i32, %arg1: i32) -> (i32, i32, i32, i32) {
    %c0_i32 = arith.constant 0 : i32
    %c0_i32_0 = arith.constant 0 : i32
    %c0_i32_1 = arith.constant 0 : i32
    return %arg0, %arg1, %c0_i32, %c0_i32_0 : i32, i32, i32, i32
  }
  func.func @transform_1(%arg0: i32, %arg1: i32) -> (i32, i32, i32) {
    %c0_i32 = arith.constant 0 : i32
    %c0_i32_0 = arith.constant 0 : i32
    %c0_i32_1 = arith.constant 0 : i32
    return %arg0, %c0_i32, %c0_i32_0 : i32, i32, i32
  }
  func.func @transform_2(%arg0: i32, %arg1: i32) -> (i32, i32, i32) {
    %c0_i32 = arith.constant 0 : i32
    %c0_i32_0 = arith.constant 0 : i32
    %c0_i32_1 = arith.constant 0 : i32
    return %arg0, %c0_i32, %c0_i32_0 : i32, i32, i32
  }
  func.func @transform_3(%arg0: i32, %arg1: i32) -> (i32, i32, i32) {
    %c0_i32 = arith.constant 0 : i32
    %c0_i32_0 = arith.constant 0 : i32
    %c0_i32_1 = arith.constant 0 : i32
    return %arg0, %c0_i32, %c0_i32_0 : i32, i32, i32
  }
  func.func @transform_4(%arg0: i32, %arg1: i32) -> (i32, i32, i32) {
    %c0_i32 = arith.constant 0 : i32
    %c0_i32_0 = arith.constant 0 : i32
    %c0_i32_1 = arith.constant 0 : i32
    return %arg0, %c0_i32, %c0_i32_0 : i32, i32, i32
  }
  func.func @transform_5(%arg0: i32, %arg1: i32) -> (i32, i32, i32, i32) {
    %c0_i32 = arith.constant 0 : i32
    %c0_i32_0 = arith.constant 0 : i32
    %c0_i32_1 = arith.constant 0 : i32
    return %arg0, %arg1, %c0_i32, %c0_i32_0 : i32, i32, i32, i32
  }
}

module attributes {stable_mosaic.version = 11 : i64} {
  func.func @_gates_cm_kernel(%arg0: i32, %arg1: memref<16x256xf32, #tpu.memory_space<vmem>>, %arg2: memref<16x256xf32, #tpu.memory_space<vmem>>, %arg3: memref<16x256xf32, #tpu.memory_space<vmem>>, %arg4: memref<16x256xf32, #tpu.memory_space<vmem>>, %arg5: memref<16x256xf32, #tpu.memory_space<vmem>>, %arg6: memref<16x256xf32, #tpu.memory_space<vmem>>, %arg7: memref<16x256xf32, #tpu.memory_space<vmem>>, %arg8: memref<16x256xf32, #tpu.memory_space<vmem>>) attributes {dimension_semantics = [#tpu.dimension_semantics<parallel>], iteration_bounds = array<i64: 4>, scalar_prefetch = 0 : i64, scratch_operands = 0 : i64, tpu.core_type = #tpu.core_type<tc>, window_params = [{transform_indices = @transform_0, window_bounds = array<i64: 16, 256>}, {transform_indices = @transform_1, window_bounds = array<i64: 16, 256>}, {transform_indices = @transform_2, window_bounds = array<i64: 16, 256>}, {transform_indices = @transform_3, window_bounds = array<i64: 16, 256>}, {transform_indices = @transform_4, window_bounds = array<i64: 16, 256>}, {transform_indices = @transform_5, window_bounds = array<i64: 16, 256>}, {transform_indices = @transform_6, window_bounds = array<i64: 16, 256>}, {transform_indices = @transform_7, window_bounds = array<i64: 16, 256>}]} {
    %c0 = arith.constant 0 : index
    %c0_0 = arith.constant 0 : index
    %0 = vector.load %arg1[%c0, %c0_0] : memref<16x256xf32, #tpu.memory_space<vmem>>, vector<16x256xf32>
    %c0_1 = arith.constant 0 : index
    %c0_2 = arith.constant 0 : index
    %1 = vector.load %arg3[%c0_1, %c0_2] : memref<16x256xf32, #tpu.memory_space<vmem>>, vector<16x256xf32>
    %2 = arith.addf %0, %1 : vector<16x256xf32>
    %3 = arith.negf %2 : vector<16x256xf32>
    %4 = math.exp %3 : vector<16x256xf32>
    %cst = arith.constant 1.000000e+00 : f32
    %5 = vector.broadcast %cst : f32 to vector<16x256xf32>
    %6 = arith.addf %5, %4 : vector<16x256xf32>
    %7 = arith.divf %5, %6 : vector<16x256xf32>
    %8 = math.tanh %2 : vector<16x256xf32>
    %9 = arith.mulf %7, %8 : vector<16x256xf32>
    %cst_3 = arith.constant 1.000000e+00 : f32
    %10 = vector.broadcast %cst_3 : f32 to vector<16x256xf32>
    %11 = arith.addf %2, %10 : vector<16x256xf32>
    %12 = arith.negf %11 : vector<16x256xf32>
    %13 = math.exp %12 : vector<16x256xf32>
    %cst_4 = arith.constant 1.000000e+00 : f32
    %14 = vector.broadcast %cst_4 : f32 to vector<16x256xf32>
    %15 = arith.addf %14, %13 : vector<16x256xf32>
    %16 = arith.divf %14, %15 : vector<16x256xf32>
    %c0_5 = arith.constant 0 : index
    %c0_6 = arith.constant 0 : index
    %17 = vector.load %arg5[%c0_5, %c0_6] : memref<16x256xf32, #tpu.memory_space<vmem>>, vector<16x256xf32>
    %18 = arith.mulf %16, %17 : vector<16x256xf32>
    %19 = arith.addf %9, %18 : vector<16x256xf32>
    %c0_7 = arith.constant 0 : index
    %c0_8 = arith.constant 0 : index
    %20 = vector.load %arg7[%c0_7, %c0_8] : memref<16x256xf32, #tpu.memory_space<vmem>>, vector<16x256xf32>
    tpu.vector_store %arg7[%c0_7, %c0_8], %19 {strides = array<i32>} : memref<16x256xf32, #tpu.memory_space<vmem>>, vector<16x256xf32>,
    %c0_9 = arith.constant 0 : index
    %c0_10 = arith.constant 0 : index
    %21 = vector.load %arg2[%c0_9, %c0_10] : memref<16x256xf32, #tpu.memory_space<vmem>>, vector<16x256xf32>
    %c0_11 = arith.constant 0 : index
    %c0_12 = arith.constant 0 : index
    %22 = vector.load %arg4[%c0_11, %c0_12] : memref<16x256xf32, #tpu.memory_space<vmem>>, vector<16x256xf32>
    %23 = arith.addf %21, %22 : vector<16x256xf32>
    %24 = arith.negf %23 : vector<16x256xf32>
    %25 = math.exp %24 : vector<16x256xf32>
    %cst_13 = arith.constant 1.000000e+00 : f32
    %26 = vector.broadcast %cst_13 : f32 to vector<16x256xf32>
    %27 = arith.addf %26, %25 : vector<16x256xf32>
    %28 = arith.divf %26, %27 : vector<16x256xf32>
    %29 = math.tanh %23 : vector<16x256xf32>
    %30 = arith.mulf %28, %29 : vector<16x256xf32>
    %cst_14 = arith.constant 1.000000e+00 : f32
    %31 = vector.broadcast %cst_14 : f32 to vector<16x256xf32>
    %32 = arith.addf %23, %31 : vector<16x256xf32>
    %33 = arith.negf %32 : vector<16x256xf32>
    %34 = math.exp %33 : vector<16x256xf32>
    %cst_15 = arith.constant 1.000000e+00 : f32
    %35 = vector.broadcast %cst_15 : f32 to vector<16x256xf32>
    %36 = arith.addf %35, %34 : vector<16x256xf32>
    %37 = arith.divf %35, %36 : vector<16x256xf32>
    %c0_16 = arith.constant 0 : index
    %c0_17 = arith.constant 0 : index
    %38 = vector.load %arg6[%c0_16, %c0_17] : memref<16x256xf32, #tpu.memory_space<vmem>>, vector<16x256xf32>
    %39 = arith.mulf %37, %38 : vector<16x256xf32>
    %40 = arith.addf %30, %39 : vector<16x256xf32>
    %c0_18 = arith.constant 0 : index
    %c0_19 = arith.constant 0 : index
    %41 = vector.load %arg8[%c0_18, %c0_19] : memref<16x256xf32, #tpu.memory_space<vmem>>, vector<16x256xf32>
    tpu.vector_store %arg8[%c0_18, %c0_19], %40 {strides = array<i32>} : memref<16x256xf32, #tpu.memory_space<vmem>>, vector<16x256xf32>,
    return
  }
  func.func @transform_0(%arg0: i32) -> (i32, i32) {
    %c0_i32 = arith.constant 0 : i32
    %c0_i32_0 = arith.constant 0 : i32
    return %arg0, %c0_i32 : i32, i32
  }
  func.func @transform_1(%arg0: i32) -> (i32, i32) {
    %c0_i32 = arith.constant 0 : i32
    %c0_i32_0 = arith.constant 0 : i32
    return %arg0, %c0_i32 : i32, i32
  }
  func.func @transform_2(%arg0: i32) -> (i32, i32) {
    %c0_i32 = arith.constant 0 : i32
    %c0_i32_0 = arith.constant 0 : i32
    return %arg0, %c0_i32 : i32, i32
  }
  func.func @transform_3(%arg0: i32) -> (i32, i32) {
    %c0_i32 = arith.constant 0 : i32
    %c0_i32_0 = arith.constant 0 : i32
    return %arg0, %c0_i32 : i32, i32
  }
  func.func @transform_4(%arg0: i32) -> (i32, i32) {
    %c0_i32 = arith.constant 0 : i32
    %c0_i32_0 = arith.constant 0 : i32
    return %arg0, %c0_i32 : i32, i32
  }
  func.func @transform_5(%arg0: i32) -> (i32, i32) {
    %c0_i32 = arith.constant 0 : i32
    %c0_i32_0 = arith.constant 0 : i32
    return %arg0, %c0_i32 : i32, i32
  }
  func.func @transform_6(%arg0: i32) -> (i32, i32) {
    %c0_i32 = arith.constant 0 : i32
    %c0_i32_0 = arith.constant 0 : i32
    return %arg0, %c0_i32 : i32, i32
  }
  func.func @transform_7(%arg0: i32) -> (i32, i32) {
    %c0_i32 = arith.constant 0 : i32
    %c0_i32_0 = arith.constant 0 : i32
    return %arg0, %c0_i32 : i32, i32
  }
}

module attributes {stable_mosaic.version = 11 : i64} {
  func.func @_tail_kernel(%arg0: i32, %arg1: memref<1x1xf32, #tpu.memory_space<smem>>, %arg2: memref<1x576x256xbf16, #tpu.memory_space<vmem>>, %arg3: memref<64x576xbf16, #tpu.memory_space<vmem>>, %arg4: memref<64x1xf32, #tpu.memory_space<vmem>>, %arg5: memref<32x256xf32, #tpu.memory_space<vmem>>, %arg6: memref<32x256xf32, #tpu.memory_space<vmem>>, %arg7: memref<1x32x256xf32, #tpu.memory_space<vmem>>, %arg8: memref<1x32x256xf32, #tpu.memory_space<vmem>>, %arg9: memref<1x32x256xf32, #tpu.memory_space<vmem>>, %arg10: memref<1x32x256xf32, #tpu.memory_space<vmem>>, %arg11: memref<32x32xf32, #tpu.memory_space<vmem>>, %arg12: memref<32x32xf32, #tpu.memory_space<vmem>>, %arg13: memref<32x32xf32, #tpu.memory_space<vmem>>, %arg14: memref<32x1xf32, #tpu.memory_space<vmem>>, %arg15: memref<1x32x256xf32, #tpu.memory_space<vmem>>, %arg16: memref<1x32x256xf32, #tpu.memory_space<vmem>>) attributes {dimension_semantics = [#tpu.dimension_semantics<parallel>], iteration_bounds = array<i64: 2>, scalar_prefetch = 0 : i64, scratch_operands = 0 : i64, tpu.core_type = #tpu.core_type<tc>, window_params = [{transform_indices = @transform_0, window_bounds = array<i64: 1, 1>}, {transform_indices = @transform_1, window_bounds = array<i64: 1, 576, 256>}, {pipeline_mode = #tpu.pipeline_mode<synchronous>, transform_indices = @transform_2, window_bounds = array<i64: 64, 576>}, {pipeline_mode = #tpu.pipeline_mode<synchronous>, transform_indices = @transform_3, window_bounds = array<i64: 64, 1>}, {pipeline_mode = #tpu.pipeline_mode<synchronous>, transform_indices = @transform_4, window_bounds = array<i64: 32, 256>}, {pipeline_mode = #tpu.pipeline_mode<synchronous>, transform_indices = @transform_5, window_bounds = array<i64: 32, 256>}, {transform_indices = @transform_6, window_bounds = array<i64: 1, 32, 256>}, {transform_indices = @transform_7, window_bounds = array<i64: 1, 32, 256>}, {transform_indices = @transform_8, window_bounds = array<i64: 1, 32, 256>}, {transform_indices = @transform_9, window_bounds = array<i64: 1, 32, 256>}, {pipeline_mode = #tpu.pipeline_mode<synchronous>, transform_indices = @transform_10, window_bounds = array<i64: 32, 32>}, {pipeline_mode = #tpu.pipeline_mode<synchronous>, transform_indices = @transform_11, window_bounds = array<i64: 32, 32>}, {pipeline_mode = #tpu.pipeline_mode<synchronous>, transform_indices = @transform_12, window_bounds = array<i64: 32, 32>}, {pipeline_mode = #tpu.pipeline_mode<synchronous>, transform_indices = @transform_13, window_bounds = array<i64: 32, 1>}, {transform_indices = @transform_14, window_bounds = array<i64: 1, 32, 256>}, {transform_indices = @transform_15, window_bounds = array<i64: 1, 32, 256>}]} {
    %c0 = arith.constant 0 : index
    %c0_0 = arith.constant 0 : index
    %0 = vector.load %arg3[%c0, %c0_0] : memref<64x576xbf16, #tpu.memory_space<vmem>>, vector<64x576xbf16>
    %c0_1 = arith.constant 0 : index
    %c0_2 = arith.constant 0 : index
    %c0_3 = arith.constant 0 : index
    %1 = vector.load %arg2[%c0_1, %c0_2, %c0_3] : memref<1x576x256xbf16, #tpu.memory_space<vmem>>, vector<1x576x256xbf16>
    %2 = vector.shape_cast %1 : vector<1x576x256xbf16> to vector<576x256xbf16>
    %cst = arith.constant dense<0.000000e+00> : vector<64x256xf32>
    %3 = tpu.matmul %0, %2, %cst {dimension_numbers = #tpu.dot_dimension_numbers<[1], [0], [0], [1], [0, 0, 1, 1], [], []>} : vector<64x576xbf16>, vector<576x256xbf16>, vector<64x256xf32> -> vector<64x256xf32>
    %c0_4 = arith.constant 0 : index
    %c0_5 = arith.constant 0 : index
    %4 = vector.load %arg4[%c0_4, %c0_5] : memref<64x1xf32, #tpu.memory_space<vmem>>, vector<64x1xf32>
    %5 = vector.broadcast %4 : vector<64x1xf32> to vector<64x256xf32>
    %6 = arith.addf %3, %5 : vector<64x256xf32>
    %7 = vector.extract_strided_slice %6 {offsets = [0, 0], sizes = [32, 256], strides = [1, 1]} : vector<64x256xf32> to vector<32x256xf32>
    %8 = vector.extract_strided_slice %6 {offsets = [32, 0], sizes = [32, 256], strides = [1, 1]} : vector<64x256xf32> to vector<32x256xf32>
    %9 = vector.shape_cast %7 : vector<32x256xf32> to vector<1x32x256xf32>
    %cst_6 = arith.constant dense<0.000000e+00> : vector<1xf32>
    %10 = vector.multi_reduction <add>, %9, %cst_6 [1, 2] : vector<1x32x256xf32> to vector<1xf32>
    %11 = vector.shape_cast %10 : vector<1xf32> to vector<1x1x1xf32>
    %12 = vector.extract %11[0, 0, 0] : f32 from vector<1x1x1xf32>
    %cst_7 = arith.constant 8.192000e+03 : f32
    %13 = arith.divf %12, %cst_7 : f32
    %14 = arith.mulf %7, %7 : vector<32x256xf32>
    %15 = vector.shape_cast %14 : vector<32x256xf32> to vector<1x32x256xf32>
    %cst_8 = arith.constant dense<0.000000e+00> : vector<1xf32>
    %16 = vector.multi_reduction <add>, %15, %cst_8 [1, 2] : vector<1x32x256xf32> to vector<1xf32>
    %17 = vector.shape_cast %16 : vector<1xf32> to vector<1x1x1xf32>
    %18 = vector.extract %17[0, 0, 0] : f32 from vector<1x1x1xf32>
    %cst_9 = arith.constant 8.192000e+03 : f32
    %19 = arith.divf %18, %cst_9 : f32
    %20 = arith.mulf %13, %13 : f32
    %21 = arith.subf %19, %20 : f32
    %22 = vector.broadcast %13 : f32 to vector<32x256xf32>
    %23 = arith.subf %7, %22 : vector<32x256xf32>
    %cst_10 = arith.constant 9.99999974E-6 : f32
    %24 = arith.addf %21, %cst_10 : f32
    %25 = math.rsqrt %24 : f32
    %26 = vector.broadcast %25 : f32 to vector<32x256xf32>
    %27 = arith.mulf %23, %26 : vector<32x256xf32>
    %c0_11 = arith.constant 0 : index
    %c0_12 = arith.constant 0 : index
    %28 = vector.load %arg5[%c0_11, %c0_12] : memref<32x256xf32, #tpu.memory_space<vmem>>, vector<32x256xf32>
    %29 = arith.mulf %27, %28 : vector<32x256xf32>
    %c0_13 = arith.constant 0 : index
    %c0_14 = arith.constant 0 : index
    %30 = vector.load %arg6[%c0_13, %c0_14] : memref<32x256xf32, #tpu.memory_space<vmem>>, vector<32x256xf32>
    %31 = arith.addf %29, %30 : vector<32x256xf32>
    %c0_15 = arith.constant 0 : index
    %c0_16 = arith.constant 0 : index
    %c0_17 = arith.constant 0 : index
    %32 = vector.load %arg7[%c0_15, %c0_16, %c0_17] : memref<1x32x256xf32, #tpu.memory_space<vmem>>, vector<1x32x256xf32>
    %33 = vector.shape_cast %32 : vector<1x32x256xf32> to vector<32x256xf32>
    %c0_18 = arith.constant 0 : index
    %c0_19 = arith.constant 0 : index
    %c0_20 = arith.constant 0 : index
    %34 = vector.load %arg8[%c0_18, %c0_19, %c0_20] : memref<1x32x256xf32, #tpu.memory_space<vmem>>, vector<1x32x256xf32>
    %35 = vector.shape_cast %34 : vector<1x32x256xf32> to vector<32x256xf32>
    %36 = arith.addf %33, %35 : vector<32x256xf32>
    %37 = arith.addf %36, %31 : vector<32x256xf32>
    %38 = arith.negf %37 : vector<32x256xf32>
    %39 = math.exp %38 : vector<32x256xf32>
    %cst_21 = arith.constant 1.000000e+00 : f32
    %40 = vector.broadcast %cst_21 : f32 to vector<32x256xf32>
    %41 = arith.addf %40, %39 : vector<32x256xf32>
    %42 = arith.divf %40, %41 : vector<32x256xf32>
    %43 = math.tanh %8 : vector<32x256xf32>
    %44 = arith.mulf %42, %43 : vector<32x256xf32>
    %c0_22 = arith.constant 0 : index
    %c0_23 = arith.constant 0 : index
    %45 = vector.load %arg11[%c0_22, %c0_23] : memref<32x32xf32, #tpu.memory_space<vmem>>, vector<32x32xf32>
    %c0_24 = arith.constant 0 : index
    %c0_25 = arith.constant 0 : index
    %c0_26 = arith.constant 0 : index
    %46 = vector.load %arg9[%c0_24, %c0_25, %c0_26] : memref<1x32x256xf32, #tpu.memory_space<vmem>>, vector<1x32x256xf32>
    %47 = vector.shape_cast %46 : vector<1x32x256xf32> to vector<32x256xf32>
    %cst_27 = arith.constant dense<0.000000e+00> : vector<32x256xf32>
    %48 = tpu.matmul %45, %47, %cst_27 {dimension_numbers = #tpu.dot_dimension_numbers<[1], [0], [0], [1], [0, 0, 1, 1], [], []>} : vector<32x32xf32>, vector<32x256xf32>, vector<32x256xf32> -> vector<32x256xf32>
    %c0_28 = arith.constant 0 : index
    %c0_29 = arith.constant 0 : index
    %49 = vector.load %arg12[%c0_28, %c0_29] : memref<32x32xf32, #tpu.memory_space<vmem>>, vector<32x32xf32>
    %c0_30 = arith.constant 0 : index
    %c0_31 = arith.constant 0 : index
    %c0_32 = arith.constant 0 : index
    %50 = vector.load %arg10[%c0_30, %c0_31, %c0_32] : memref<1x32x256xf32, #tpu.memory_space<vmem>>, vector<1x32x256xf32>
    %51 = vector.shape_cast %50 : vector<1x32x256xf32> to vector<32x256xf32>
    %cst_33 = arith.constant dense<0.000000e+00> : vector<32x256xf32>
    %52 = tpu.matmul %49, %51, %cst_33 {dimension_numbers = #tpu.dot_dimension_numbers<[1], [0], [0], [1], [0, 0, 1, 1], [], []>} : vector<32x32xf32>, vector<32x256xf32>, vector<32x256xf32> -> vector<32x256xf32>
    %53 = arith.addf %48, %52 : vector<32x256xf32>
    %c0_34 = arith.constant 0 : index
    %c0_35 = arith.constant 0 : index
    %54 = vector.load %arg13[%c0_34, %c0_35] : memref<32x32xf32, #tpu.memory_space<vmem>>, vector<32x32xf32>
    %cst_36 = arith.constant dense<0.000000e+00> : vector<32x256xf32>
    %55 = tpu.matmul %54, %42, %cst_36 {dimension_numbers = #tpu.dot_dimension_numbers<[1], [0], [0], [1], [0, 0, 1, 1], [], []>} : vector<32x32xf32>, vector<32x256xf32>, vector<32x256xf32> -> vector<32x256xf32>
    %56 = arith.addf %53, %55 : vector<32x256xf32>
    %c0_37 = arith.constant 0 : index
    %c0_38 = arith.constant 0 : index
    %57 = vector.load %arg14[%c0_37, %c0_38] : memref<32x1xf32, #tpu.memory_space<vmem>>, vector<32x1xf32>
    %58 = vector.broadcast %57 : vector<32x1xf32> to vector<32x256xf32>
    %59 = arith.addf %56, %58 : vector<32x256xf32>
    %c0_39 = arith.constant 0 : index
    %c0_40 = arith.constant 0 : index
    %60 = memref.load %arg1[%c0_39, %c0_40] : memref<1x1xf32, #tpu.memory_space<smem>>
    %c0_41 = arith.constant 0 : index
    %c0_42 = arith.constant 0 : index
    %c0_43 = arith.constant 0 : index
    %61 = vector.load %arg9[%c0_41, %c0_42, %c0_43] : memref<1x32x256xf32, #tpu.memory_space<vmem>>, vector<1x32x256xf32>
    %62 = vector.shape_cast %61 : vector<1x32x256xf32> to vector<32x256xf32>
    %63 = vector.broadcast %60 : f32 to vector<32x256xf32>
    %64 = arith.mulf %63, %62 : vector<32x256xf32>
    %65 = arith.addf %44, %64 : vector<32x256xf32>
    %cst_44 = arith.constant 1.000000e+00 : f32
    %66 = arith.subf %cst_44, %60 : f32
    %67 = vector.broadcast %66 : f32 to vector<32x256xf32>
    %68 = arith.mulf %67, %59 : vector<32x256xf32>
    %69 = arith.addf %65, %68 : vector<32x256xf32>
    %c0_45 = arith.constant 0 : index
    %c0_46 = arith.constant 0 : index
    %c0_47 = arith.constant 0 : index
    %70 = vector.load %arg15[%c0_45, %c0_46, %c0_47] : memref<1x32x256xf32, #tpu.memory_space<vmem>>, vector<1x32x256xf32>
    %71 = vector.shape_cast %70 : vector<1x32x256xf32> to vector<32x256xf32>
    %72 = vector.shape_cast %69 : vector<32x256xf32> to vector<1x32x256xf32>
    tpu.vector_store %arg15[%c0_45, %c0_46, %c0_47], %72 {strides = array<i32>} : memref<1x32x256xf32, #tpu.memory_space<vmem>>, vector<1x32x256xf32>,
    %c0_48 = arith.constant 0 : index
    %c0_49 = arith.constant 0 : index
    %c0_50 = arith.constant 0 : index
    %73 = vector.load %arg16[%c0_48, %c0_49, %c0_50] : memref<1x32x256xf32, #tpu.memory_space<vmem>>, vector<1x32x256xf32>
    %74 = vector.shape_cast %73 : vector<1x32x256xf32> to vector<32x256xf32>
    %75 = vector.shape_cast %42 : vector<32x256xf32> to vector<1x32x256xf32>
    tpu.vector_store %arg16[%c0_48, %c0_49, %c0_50], %75 {strides = array<i32>} : memref<1x32x256xf32, #tpu.memory_space<vmem>>, vector<1x32x256xf32>,
    return
  }
  func.func @transform_0(%arg0: i32) -> (i32, i32) {
    %c0_i32 = arith.constant 0 : i32
    %c0_i32_0 = arith.constant 0 : i32
    %c0_i32_1 = arith.constant 0 : i32
    return %c0_i32, %c0_i32_0 : i32, i32
  }
  func.func @transform_1(%arg0: i32) -> (i32, i32, i32) {
    %c0_i32 = arith.constant 0 : i32
    %c0_i32_0 = arith.constant 0 : i32
    %c0_i32_1 = arith.constant 0 : i32
    return %arg0, %c0_i32, %c0_i32_0 : i32, i32, i32
  }
  func.func @transform_2(%arg0: i32) -> (i32, i32) {
    %c0_i32 = arith.constant 0 : i32
    %c0_i32_0 = arith.constant 0 : i32
    %c0_i32_1 = arith.constant 0 : i32
    return %c0_i32, %c0_i32_0 : i32, i32
  }
  func.func @transform_3(%arg0: i32) -> (i32, i32) {
    %c0_i32 = arith.constant 0 : i32
    %c0_i32_0 = arith.constant 0 : i32
    %c0_i32_1 = arith.constant 0 : i32
    return %c0_i32, %c0_i32_0 : i32, i32
  }
  func.func @transform_4(%arg0: i32) -> (i32, i32) {
    %c0_i32 = arith.constant 0 : i32
    %c0_i32_0 = arith.constant 0 : i32
    %c0_i32_1 = arith.constant 0 : i32
    return %c0_i32, %c0_i32_0 : i32, i32
  }
  func.func @transform_5(%arg0: i32) -> (i32, i32) {
    %c0_i32 = arith.constant 0 : i32
    %c0_i32_0 = arith.constant 0 : i32
    %c0_i32_1 = arith.constant 0 : i32
    return %c0_i32, %c0_i32_0 : i32, i32
  }
  func.func @transform_6(%arg0: i32) -> (i32, i32, i32) {
    %c0_i32 = arith.constant 0 : i32
    %c0_i32_0 = arith.constant 0 : i32
    %c0_i32_1 = arith.constant 0 : i32
    return %arg0, %c0_i32, %c0_i32_0 : i32, i32, i32
  }
  func.func @transform_7(%arg0: i32) -> (i32, i32, i32) {
    %c0_i32 = arith.constant 0 : i32
    %c0_i32_0 = arith.constant 0 : i32
    %c0_i32_1 = arith.constant 0 : i32
    return %arg0, %c0_i32, %c0_i32_0 : i32, i32, i32
  }
  func.func @transform_8(%arg0: i32) -> (i32, i32, i32) {
    %c0_i32 = arith.constant 0 : i32
    %c0_i32_0 = arith.constant 0 : i32
    %c0_i32_1 = arith.constant 0 : i32
    return %arg0, %c0_i32, %c0_i32_0 : i32, i32, i32
  }
  func.func @transform_9(%arg0: i32) -> (i32, i32, i32) {
    %c0_i32 = arith.constant 0 : i32
    %c0_i32_0 = arith.constant 0 : i32
    %c0_i32_1 = arith.constant 0 : i32
    return %arg0, %c0_i32, %c0_i32_0 : i32, i32, i32
  }
  func.func @transform_10(%arg0: i32) -> (i32, i32) {
    %c0_i32 = arith.constant 0 : i32
    %c0_i32_0 = arith.constant 0 : i32
    %c0_i32_1 = arith.constant 0 : i32
    return %c0_i32, %c0_i32_0 : i32, i32
  }
  func.func @transform_11(%arg0: i32) -> (i32, i32) {
    %c0_i32 = arith.constant 0 : i32
    %c0_i32_0 = arith.constant 0 : i32
    %c0_i32_1 = arith.constant 0 : i32
    return %c0_i32, %c0_i32_0 : i32, i32
  }
  func.func @transform_12(%arg0: i32) -> (i32, i32) {
    %c0_i32 = arith.constant 0 : i32
    %c0_i32_0 = arith.constant 0 : i32
    %c0_i32_1 = arith.constant 0 : i32
    return %c0_i32, %c0_i32_0 : i32, i32
  }
  func.func @transform_13(%arg0: i32) -> (i32, i32) {
    %c0_i32 = arith.constant 0 : i32
    %c0_i32_0 = arith.constant 0 : i32
    %c0_i32_1 = arith.constant 0 : i32
    return %c0_i32, %c0_i32_0 : i32, i32
  }
  func.func @transform_14(%arg0: i32) -> (i32, i32, i32) {
    %c0_i32 = arith.constant 0 : i32
    %c0_i32_0 = arith.constant 0 : i32
    %c0_i32_1 = arith.constant 0 : i32
    return %arg0, %c0_i32, %c0_i32_0 : i32, i32, i32
  }
  func.func @transform_15(%arg0: i32) -> (i32, i32, i32) {
    %c0_i32 = arith.constant 0 : i32
    %c0_i32_0 = arith.constant 0 : i32
    %c0_i32_1 = arith.constant 0 : i32
    return %arg0, %c0_i32, %c0_i32_0 : i32, i32, i32
  }
}

</mosaic_0001>

<bundles_post_ra>
// kernel: strpm_forward.4
= control target key start
LH: loop header
LB: loop body
LE: loop exit
PB: predicated region body
PF: predicated region fallthrough
CT: control target
= control target key end

     0   :  { %s1383_s18 = smov 0   ;;  %s1385_s19 = smov 0   ;;  %s1634_s0 = inlined_call_operand.vmem [shape: bf16[5,2,288,256], index: 0, kind: input, shape index: {}]   ;;  %s1635_s1 = inlined_call_operand.vmem [shape: bf16[5,32,288], index: 1, kind: input, shape index: {}]   ;;  %s1636_s2 = inlined_call_operand.vmem [shape: f32[5,32,1], index: 2, kind: input, shape index: {}]   ;;  %s1637_s3 = inlined_call_operand.vmem [shape: f32[5,32,256], index: 3, kind: input, shape index: {}]   ;;  %s1638_s4 = inlined_call_operand.vmem [shape: f32[5,32,256], index: 4, kind: input, shape index: {}]   ;;  %s1639_s5 = inlined_call_operand.vmem [shape: f32[5,2,32,256], index: 5, kind: output, shape index: {}]  }
   0x1   :  { %s1387_s20 = smov 0   ;;  %s1389_s21 = smov 0  }
   0x2   :  { %s1391_s22 = smov 0  }
   0x3 LB: > { %s24_s23 = sadd.s32 1, %s1341_s20  ;;  %s27_s24 = sadd.s32 1, %s1345_s21  ;;  %s1349_s22 = sphi %s1391_s22, %s15_s22   ;;  %s1345_s21 = sphi %s1389_s21, %s1643_s21   ;;  %s1341_s20 = sphi %s1387_s20, %s1642_s20   ;;  %s1337_s19 = sphi %s1385_s19, %s1641_s19   ;;  %s1333_s18 = sphi %s1383_s18, %s1640_s18  }
   0x4   : > { %p25_p0 = scmp.ge.s32.totalorder %s24_s23, 2  ;;  %p1019_p1 = scmp.ge.s32.totalorder %s1349_s22, 1 }
   0x5   : > { %p247_p2 = scmp.lt.s32.totalorder %s1349_s22, 11 }
   0x6   : > { %s1645_s23 = smov (%p25_p0, %s24_s23), 0  ;;  %s1647_s24 = smov (!%p25_p0, %s27_s24), %s1345_s21 }
   0x7   : > { %p248_p3 = pnand %p1019_p1, %p247_p2  ;;  %p29_p4 = scmp.ge.s32.totalorder %s1647_s24, 5 }
   0x8   : > { %p303_p5 = scmp.lt.s32.totalorder (!%p248_p3), %s1337_s19, 4  ;;  %p305_p6 = scmp.lt.s32.totalorder (!%p248_p3), %s1333_s18, 1 }
   0x9   : > { %s1649_s24 = smov (%p29_p4, %s1647_s24), 0  ;;  %251 = sbr.rel (%p248_p3) target bundleno = 512 (0x200), region = 40 }
   0xe   : > { %s1651_s19 = smov (!%p303_p5, %s1337_s19), 4  ;;  %s1653_s18 = smov (!%p305_p6, %s1333_s18), 1  ;;  %vm620_vm0 = vcmask 261120  }
   0xf   : > { %s1253_s25 = smul.u32 144, %s1651_s19  ;;  %s1205_s11 = sshll.u32 %s1651_s19, 5 }
  0x10   : > { %s1252_s26 = smul.u32 72, %s1653_s18  ;;  %s1503_s14 = scalar_lea.vmem %s1636_s2, %s1205_s11 }
  0x11   : > { %s1254_s27 = smul.u32 48, %s1651_s19  ;;  %s1206_s30 = sshll.u32 %s1651_s19, 6 }
  0x12   : > { %s309_s28 = sadd.s32 %s1253_s25, %s1252_s26  ;;  %s1028_s6 = sshll.u32 %s1653_s18, 3 }
  0x13   : > { %s1020_s29 = sshll.u32 %s309_s28, 2  ;;  %s1428_s10 = scalar_lea.vmem %s1635_s1, %s1254_s27 }
  0x14   : > { %s1423_s7 = scalar_lea.vmem %s1634_s0, %s1020_s29  ;;  %v1041_v12 = vld [vmem:[%s1428_s10 + $0x8] sm:$0xf]  ;;  %v1210_v13 = vld [vmem:[%s1428_s10 + $0x10] sm:$0xf0] }
  0x15   : > { %v1113_v0 = vld [vmem:[%s1423_s7 + $0x70] sm:$0xf]  ;;  %v1229_v1 = vld [vmem:[%s1423_s7 + $0x74] sm:$0xf0]  ;;  %v1105_v9 = vld [vmem:[%s1423_s7 + $0x60] sm:$0xf]  ;;  %v1453_v30 = vor.u32 %v1210_v13, %v1041_v12 }
  0x16   : > { %v1177_v2 = vld [vmem:[%s1423_s7 + $0xf0] sm:$0xf]  ;;  %v1114_v3 = vor.u32 %v1229_v1, %v1113_v0  ;;  %v1245_v4 = vld [vmem:[%s1423_s7 + $0xf4] sm:$0xf0]  ;;  %v1227_v10 = vld [vmem:[%s1423_s7 + $0x64] sm:$0xf0] }
  0x17   : > { %v1193_v5 = vld [vmem:[%s1423_s7 + $0x110] sm:$0xf]  ;;  %v1249_v6 = vld [vmem:[%s1423_s7 + $0x114] sm:$0xf0]  ;;  %v1178_v7 = vor.u32 %v1245_v4, %v1177_v2  ;;  %v1169_v11 = vld [vmem:[%s1423_s7 + $0xe0] sm:$0xf]  ;;  %v1106_v14 = vor.u32 %v1227_v10, %v1105_v9 }
  0x18   : > { %v1194_v8 = vor.u32 %v1249_v6, %v1193_v5  ;;  %627 = vmatpush.bf16.msra.mxu0 %v1114_v3  ;;  %v1243_v15 = vld [vmem:[%s1423_s7 + $0xe4] sm:$0xf0]  ;;  %v1185_v16 = vld [vmem:[%s1423_s7 + $0x100] sm:$0xf]  ;;  %v1228_v20 = vld [vmem:[%s1423_s7 + $0x74] sm:$0xf] }
  0x19   : > { %v1247_v17 = vld [vmem:[%s1423_s7 + $0x104] sm:$0xf0]  ;;  %646 = vmatpush.bf16.msra.mxu1 %v1178_v7  ;;  %v1170_v18 = vor.u32 %v1243_v15, %v1169_v11  ;;  %v1115_v21 = vld [vmem:[%s1423_s7 + $0x78] sm:$0xf0]  ;;  %v1097_v22 = vld [vmem:[%s1423_s7 + $0x50] sm:$0xf] }
  0x1a   : > { %671 = vmatpush.bf16.msra.mxu2 %v1194_v8  ;;  %v1186_v19 = vor.u32 %v1247_v17, %v1185_v16  ;;  %v1118_v23 = vor.u32 %v1228_v20, %v1115_v21  ;;  %v1225_v24 = vld [vmem:[%s1423_s7 + $0x54] sm:$0xf0]  ;;  %v1161_v25 = vld [vmem:[%s1423_s7 + $0xd0] sm:$0xf]  ;;  %v1226_v27 = vld [vmem:[%s1423_s7 + $0x64] sm:$0xf] }
  0x1b   : > { %v1241_v26 = vld [vmem:[%s1423_s7 + $0xd4] sm:$0xf0]  ;;  %v1107_v28 = vld [vmem:[%s1423_s7 + $0x68] sm:$0xf0]  ;;  %v1244_v29 = vld [vmem:[%s1423_s7 + $0xf4] sm:$0xf]  ;;  %v1098_v31 = vor.u32 %v1225_v24, %v1097_v22 }
  0x1c   : > { %628 = vmatpush.bf16.msra.mxu0 %v1106_v14  ;;  %684 = vmatpush.bf16.msra.mxu3 %v1118_v23  ;;  %v1179_v32 = vld [vmem:[%s1423_s7 + $0xf8] sm:$0xf0]  ;;  %v1089_v33 = vld [vmem:[%s1423_s7 + $0x40] sm:$0xf]  ;;  %v1223_v34 = vld [vmem:[%s1423_s7 + $0x44] sm:$0xf0]  ;;  %v1162_v35 = vor.u32 %v1241_v26, %v1161_v25  ;;  %v1110_v36 = vor.u32 %v1226_v27, %v1107_v28 }
  0x1d   : > { %647 = vmatpush.bf16.msra.mxu1 %v1170_v18  ;;  %v1182_v37 = vor.u32 %v1244_v29, %v1179_v32  ;;  %v1153_v38 = vld [vmem:[%s1423_s7 + $0xc0] sm:$0xf]  ;;  %v1239_v39 = vld [vmem:[%s1423_s7 + $0xc4] sm:$0xf0]  ;;  %v1224_v40 = vld [vmem:[%s1423_s7 + $0x54] sm:$0xf]  ;;  %v1090_v45 = vor.u32 %v1223_v34, %v1089_v33 }
  0x1e   : > { %672 = vmatpush.bf16.msra.mxu2 %v1186_v19  ;;  %v1099_v41 = vld [vmem:[%s1423_s7 + $0x58] sm:$0xf0]  ;;  %v1242_v42 = vld [vmem:[%s1423_s7 + $0xe4] sm:$0xf]  ;;  %v1171_v43 = vld [vmem:[%s1423_s7 + $0xe8] sm:$0xf0]  ;;  %v1154_v48 = vor.u32 %v1239_v39, %v1153_v38 }
  0x1f   : > { %v1174_v44 = vor.u32 %v1242_v42, %v1171_v43  ;;  %v1081_v46 = vld [vmem:[%s1423_s7 + $0x30] sm:$0xf]  ;;  %v1221_v47 = vld [vmem:[%s1423_s7 + $0x34] sm:$0xf0]  ;;  %v1102_v49 = vor.u32 %v1224_v40, %v1099_v41  ;;  %v1240_v51 = vld [vmem:[%s1423_s7 + $0xd4] sm:$0xf] }
  0x20   : > { %629 = vmatpush.bf16.msra.mxu0 %v1098_v31  ;;  %685 = vmatpush.bf16.msra.mxu3 %v1110_v36  ;;  %v1145_v50 = vld [vmem:[%s1423_s7 + $0xb0] sm:$0xf]  ;;  %v1163_v52 = vld [vmem:[%s1423_s7 + $0xd8] sm:$0xf0]  ;;  %v1237_v53 = vld [vmem:[%s1423_s7 + $0xb4] sm:$0xf0]  ;;  %v1082_v57 = vor.u32 %v1221_v47, %v1081_v46 }
  0x21   : > { %1199 = vmatmul.msk.bf16.vlgmr.msra.gmra.mxu2 %vm620_vm0, %v1453_v30  ;;  %648 = vmatpush.bf16.msra.mxu1 %v1162_v35  ;;  %v1222_v54 = vld [vmem:[%s1423_s7 + $0x44] sm:$0xf]  ;;  %v1091_v55 = vld [vmem:[%s1423_s7 + $0x48] sm:$0xf0]  ;;  %v1166_v56 = vor.u32 %v1240_v51, %v1163_v52  ;;  %v1146_v60 = vor.u32 %v1237_v53, %v1145_v50  ;;  %v1073_v62 = vld [vmem:[%s1423_s7 + $0x20] sm:$0xf] }
  0x22   : > { %703 = vmatpush.bf16.msrb.mxu2 %v1182_v37  ;;  %v1238_v58 = vld [vmem:[%s1423_s7 + $0xc4] sm:$0xf]  ;;  %v1155_v59 = vld [vmem:[%s1423_s7 + $0xc8] sm:$0xf0]  ;;  %v1094_v61 = vor.u32 %v1222_v54, %v1091_v55  ;;  %v1219_v63 = vld [vmem:[%s1423_s7 + $0x24] sm:$0xf0] }
  0x23   : > { %v1137_v0 = vld [vmem:[%s1423_s7 + $0xa0] sm:$0xf]  ;;  %v1235_v1 = vld [vmem:[%s1423_s7 + $0xa4] sm:$0xf0]  ;;  %v1220_v2 = vld [vmem:[%s1423_s7 + $0x34] sm:$0xf]  ;;  %v1158_v4 = vor.u32 %v1238_v58, %v1155_v59  ;;  %v1074_v6 = vor.u32 %v1219_v63, %v1073_v62 }
  0x24   : > { %630 = vmatpush.bf16.msra.mxu0 %v1090_v45  ;;  %686 = vmatpush.bf16.msra.mxu3 %v1102_v49  ;;  %v1083_v3 = vld [vmem:[%s1423_s7 + $0x38] sm:$0xf0]  ;;  %v1053_v5 = vld [vmem:[%s1428_s10 + $0x20] sm:$0xf]  ;;  %v1213_v7 = vld [vmem:[%s1428_s10 + $0x28] sm:$0xf0]  ;;  %v1138_v10 = vor.u32 %v1235_v1, %v1137_v0 }
  0x25   : > { %649 = vmatpush.bf16.msra.mxu1 %v1154_v48  ;;  %v1236_v8 = vld [vmem:[%s1423_s7 + $0xb4] sm:$0xf]  ;;  %v1147_v9 = vld [vmem:[%s1423_s7 + $0xb8] sm:$0xf0]  ;;  %v1086_v11 = vor.u32 %v1220_v2, %v1083_v3  ;;  %v1065_v12 = vld [vmem:[%s1423_s7 + $0x10] sm:$0xf]  ;;  %v1495_v21 = vor.u32 %v1213_v7, %v1053_v5 }
  0x26   : > { %704 = vmatpush.bf16.msrb.mxu2 %v1174_v44  ;;  %v1217_v13 = vld [vmem:[%s1423_s7 + $0x14] sm:$0xf0]  ;;  %v1129_v14 = vld [vmem:[%s1423_s7 + $0x90] sm:$0xf]  ;;  %v1218_v16 = vld [vmem:[%s1423_s7 + $0x24] sm:$0xf]  ;;  %v1150_v18 = vor.u32 %v1236_v8, %v1147_v9 }
  0x27   : > { %v1233_v15 = vld [vmem:[%s1423_s7 + $0x94] sm:$0xf0]  ;;  %v1075_v17 = vld [vmem:[%s1423_s7 + $0x28] sm:$0xf0]  ;;  %v1057_v19 = vld [vmem:[%s1423_s7] sm:$0xf]  ;;  %v1066_v22 = vor.u32 %v1217_v13, %v1065_v12 }
  0x28   : > { %631 = vmatpush.bf16.msra.mxu0 %v1082_v57  ;;  %687 = vmatpush.bf16.msra.mxu3 %v1094_v61  ;;  %v1215_v20 = vld [vmem:[%s1423_s7 + $0x4] sm:$0xf0]  ;;  %v1121_v23 = vld [vmem:[%s1423_s7 + $0x80] sm:$0xf]  ;;  %v1234_v24 = vld [vmem:[%s1423_s7 + $0xa4] sm:$0xf]  ;;  %v1130_v26 = vor.u32 %v1233_v15, %v1129_v14  ;;  %v1078_v27 = vor.u32 %v1218_v16, %v1075_v17 }
  0x29   : > { %650 = vmatpush.bf16.msra.mxu1 %v1146_v60  ;;  %v1139_v25 = vld [vmem:[%s1423_s7 + $0xa8] sm:$0xf0]  ;;  %v1231_v28 = vld [vmem:[%s1423_s7 + $0x84] sm:$0xf0]  ;;  %v1216_v29 = vld [vmem:[%s1423_s7 + $0x14] sm:$0xf]  ;;  %v1058_v39 = vor.u32 %v1215_v20, %v1057_v19 }
  0x2a   : > { %705 = vmatpush.bf16.msrb.mxu2 %v1166_v56  ;;  %v1067_v31 = vld [vmem:[%s1423_s7 + $0x18] sm:$0xf0]  ;;  %v1033_v32 = vld [vmem:[%s1428_s10] sm:$0xf]  ;;  %v1209_v33 = vld [vmem:[%s1428_s10 + $0x8] sm:$0xf0]  ;;  %v1142_v34 = vor.u32 %v1234_v24, %v1139_v25  ;;  %v1122_v43 = vor.u32 %v1231_v28, %v1121_v23 }
  0x2b   : > { %v1248_v35 = vld [vmem:[%s1423_s7 + $0x114] sm:$0xf]  ;;  %v1195_v36 = vld [vmem:[%s1423_s7 + $0x118] sm:$0xf0]  ;;  %v1351_v37 = vmov 0   ;;  %v386_v38 = vld [vmem:[%s1503_s14] sm:$0xff]  ;;  %v1070_v44 = vor.u32 %v1216_v29, %v1067_v31  ;;  %v1034_v50 = vor.u32 %v1209_v33, %v1033_v32 }
  0x2c   : > { %632 = vmatpush.bf16.msra.mxu0 %v1074_v6  ;;  %688 = vmatpush.bf16.msra.mxu3 %v1086_v11  ;;  %v1232_v40 = vld [vmem:[%s1423_s7 + $0x94] sm:$0xf]  ;;  %v1131_v41 = vld [vmem:[%s1423_s7 + $0x98] sm:$0xf0]  ;;  %v1208_v45 = vld [vmem:[%s1428_s10 + $0x4] sm:$0xf]  ;;  %v1198_v47 = vor.u32 %v1248_v35, %v1195_v36 }
  0x2d   : > { %651 = vmatpush.bf16.msra.mxu1 %v1138_v10  ;;  %1305 = vset.pattern.permute.xlu0 %v1351_v37  ;;  %v388_v42 = vld [vmem:[%s1503_s14 + $0x10] sm:$0xff]  ;;  %v1214_v48 = vld [vmem:[%s1423_s7 + $0x4] sm:$0xf]  ;;  %v1059_v49 = vld [vmem:[%s1423_s7 + $0x8] sm:$0xf0]  ;;  %v1134_v51 = vor.u32 %v1232_v40, %v1131_v41 }
  0x2e   : > { %706 = vmatpush.bf16.msrb.mxu2 %v1158_v4  ;;  %v1035_v46 = vld [vmem:[%s1428_s10 + $0xc] sm:$0xf0]  ;;  %392 = vperm.xlu0 %1305, %v386_v38   ;;  %v1246_v52 = vld [vmem:[%s1423_s7 + $0x104] sm:$0xf]  ;;  %v1187_v53 = vld [vmem:[%s1423_s7 + $0x108] sm:$0xf0]  ;;  %v1062_v57 = vor.u32 %v1214_v48, %v1059_v49 }
  0x2f   : > { %1306 = vset.pattern.permute.xlu1 %v1351_v37  ;;  %v1038_v54 = vor.u32 %v1208_v45, %v1035_v46  ;;  %v1230_v55 = vld [vmem:[%s1423_s7 + $0x84] sm:$0xf]  ;;  %v1123_v56 = vld [vmem:[%s1423_s7 + $0x88] sm:$0xf0]  ;;  %v1190_v58 = vor.u32 %v1246_v52, %v1187_v53  ;;  %v389_v61 = vld [vmem:[%s1503_s14 + $0x18] sm:$0xff]  ;;  %s1029_s7 = sshll.u32 %s1651_s19, 4 }
  0x30   : > { %633 = vmatpush.bf16.msra.mxu0 %v1066_v22  ;;  %689 = vmatpush.bf16.msra.mxu3 %v1078_v27  ;;  %v1126_v59 = vor.u32 %v1230_v55, %v1123_v56  ;;  %v387_v60 = vld [vmem:[%s1503_s14 + $0x8] sm:$0xff]  ;;  %v1045_v62 = vld [vmem:[%s1428_s10 + $0x18] sm:$0xf]  ;;  %v1212_v63 = vld [vmem:[%s1428_s10 + $0x20] sm:$0xf0]  ;;  %s1584_s11 = sadd.s32 %s1029_s7, %s1028_s6  ;;  %s1590_s14 = scalar_lea.vmem %s1638_s4, %s1206_s30 }
  0x31   : > { %1200 = vmatmul.msk.bf16.gmra.mxu2 %vm620_vm0, %v1495_v21  ;;  %652 = vmatpush.bf16.msra.mxu1 %v1130_v26  ;;  %v1211_v0 = vld [vmem:[%s1428_s10 + $0x1c] sm:$0xf]  ;;  %v1047_v1 = vld [vmem:[%s1428_s10 + $0x24] sm:$0xf0]  ;;  %v1046_v2 = vor.u32 %v1212_v63, %v1045_v62  ;;  %s1582_s10 = scalar_lea.vmem %s1637_s3, %s1206_s30  ;;  %s1030_s19 = sshll.u32 %s1584_s11, 3 }
  0x32   : > { %707 = vmatpush.bf16.msrb.mxu2 %v1150_v18  ;;  %402 = vperm.xlu1 %1306, %v388_v42   ;;  %v1050_v3 = vor.u32 %v1211_v0, %v1047_v1 }
  0x34   : > { %634 = vmatpush.bf16.msra.mxu0 %v1058_v39  ;;  %690 = vmatpush.bf16.msra.mxu3 %v1070_v44 }
  0x35   : > { %653 = vmatpush.bf16.msra.mxu1 %v1122_v43 }
  0x36   : > { %708 = vmatpush.bf16.msrb.mxu2 %v1142_v34  ;;  %397 = vperm.xlu0 %1305, %v387_v60  }
  0x37   : > { %635 = vmatmul.bf16.vlgmr.msra.gmra.mxu0 %v1034_v50 }
  0x38   : > { %728 = vmatpush.bf16.msrb.mxu0 %v1198_v47  ;;  %654 = vmatmul.bf16.vlgmr.msra.gmra.mxu1 %v1038_v54 }
  0x39   : > { %1250 = vmatpush.bf16.msrb.mxu1 %v1198_v47  ;;  %691 = vmatpush.bf16.msra.mxu3 %v1062_v57 }
  0x3a   : > { %709 = vmatpush.bf16.msrb.mxu2 %v1134_v51  ;;  %407 = vperm.xlu1 %1306, %v389_v61  }
  0x3c   : > { %729 = vmatpush.bf16.msrb.mxu0 %v1190_v58  ;;  %692 = vmatmul.bf16.vlgmr.msra.gmra.mxu3 %v1034_v50 }
  0x3d   : > { %1251 = vmatpush.bf16.msrb.mxu1 %v1190_v58 }
  0x3e   : > { %710 = vmatpush.bf16.msrb.mxu2 %v1126_v59 }
  0x41   : > { %711 = vmatmul.bf16.vlgmr.msrb.gmra.mxu2 %v1038_v54 }
  0x47   : > { %640 = vmatmul.bf16.gmra.mxu0 %v1046_v2 }
  0x48   : > { %659 = vmatmul.bf16.gmra.mxu1 %v1050_v3 }
  0x4c   : > { %697 = vmatmul.bf16.gmra.mxu3 %v1046_v2 }
  0x51   : > { %716 = vmatmul.bf16.gmra.mxu2 %v1050_v3 }
  0x57   : > { %1201 = vmatmul.msk.bf16.vlgmr.msrb.gmra.mxu0 %vm620_vm0, %v1453_v30 }
  0x58   : > { %1202 = vmatmul.msk.bf16.vlgmr.msrb.gmra.mxu1 %vm620_vm0, %v1495_v21 }
  0xa0   : > { %v393_v14 = vpop.permute.xlu0 %392 }
  0xa4   : > { %v674_v4 = vpop.f32.mrf.mxu2  ;;  %v403_v20 = vpop.permute.xlu1 %402 }
  0xa8   : > { %v398_v22 = vpop.permute.xlu0 %397 }
  0xac   : > { %v676_v5 = vpop.f32.mrf.mxu2  ;;  %v408_v36 = vpop.permute.xlu1 %407 }
  0xb4   : > { %v679_v6 = vpop.f32.mrf.mxu2  ;;  %v636_v7 = vpop.f32.mrf.mxu0 }
  0xb5   : > { %v655_v8 = vpop.f32.mrf.mxu1  ;;  %v637_v30 = vadd.f32 %v636_v7, %v393_v14 }
  0xb7   : > { %v656_v24 = vadd.f32 %v655_v8, %v637_v30 }
  0xb9   : > { %v1536_v32 = vadd.f32 %v674_v4, %v656_v24 }
  0xbb   : > { %v757_v40 = vmul.f32 %v1536_v32, %v1536_v32 }
  0xbc   : > { %v681_v9 = vpop.f32.mrf.mxu2  ;;  %v638_v10 = vpop.f32.mrf.mxu0 }
  0xbd   : > { %v657_v11 = vpop.f32.mrf.mxu1  ;;  %v639_v25 = vadd.f32 %v638_v10, %v398_v22 }
  0xbf   : > { %v693_v12 = vpop.f32.mrf.mxu3  ;;  %v658_v33 = vadd.f32 %v657_v11, %v639_v25 }
  0xc0   : > { %v694_v23 = vadd.f32 %v693_v12, %v393_v14  ;;  %v1352_v14 = vmov 8192.0  }
  0xc1   : > { %v1544_v41 = vadd.f32 %v676_v5, %v658_v33  ;;  %1307 = vrcp.f32 %v1352_v14 }
  0xc3   : > { %v759_v50 = vmul.f32 %v1544_v41, %v1544_v41 }
  0xc4   : > { %v712_v13 = vpop.f32.mrf.mxu2  ;;  %v641_v15 = vpop.f32.mrf.mxu0 }
  0xc5   : > { %v660_v16 = vpop.f32.mrf.mxu1  ;;  %v713_v27 = vadd.f32 %v712_v13, %v694_v23  ;;  %v642_v28 = vadd.f32 %v641_v15, %v403_v20 }
  0xc7   : > { %v695_v17 = vpop.f32.mrf.mxu3  ;;  %v661_v38 = vadd.f32 %v660_v16, %v642_v28  ;;  %v1308_v15 = vpop.eup %1307 }
  0xc8   : > { %v696_v35 = vadd.f32 %v695_v17, %v398_v22  ;;  %vm786_vm1 = vweird.f32 %v1308_v15 }
  0xc9   : > { %v1548_v47 = vadd.f32 %v679_v6, %v661_v38 }
  0xcb   : > { %v761_v60 = vmul.f32 %v1548_v47, %v1548_v47 }
  0xcc   : > { %v714_v18 = vpop.f32.mrf.mxu2  ;;  %v643_v19 = vpop.f32.mrf.mxu0 }
  0xcd   : > { %v662_v21 = vpop.f32.mrf.mxu1  ;;  %v644_v44 = vadd.f32 %v643_v19, %v408_v36  ;;  %v715_v45 = vadd.f32 %v714_v18, %v696_v35  ;;  %v782_v19 = vmul.f32 8192.0, %v1308_v15 }
  0xcf   : > { %v698_v26 = vpop.f32.mrf.mxu3  ;;  %v663_v54 = vadd.f32 %v662_v21, %v644_v44  ;;  %v783_v22 = vsub.f32 1.0, %v782_v19 }
  0xd0   : > { %v699_v42 = vadd.f32 %v698_v26, %v403_v20 }
  0xd1   : > { %v1563_v2 = vadd.f32 %v681_v9, %v663_v54  ;;  %v832_v54 = vld [vmem:[%s1582_s10] sm:$0xff] }
  0xd3   : > { %v763_v11 = vmul.f32 %v1563_v2, %v1563_v2 }
  0xd4   : > { %v717_v29 = vpop.f32.mrf.mxu2  ;;  %v731_v31 = vpop.f32.mrf.mxu0 }
  0xd5   : > { %v1538_v34 = vadd.f32 %v731_v31, %v713_v27  ;;  %v736_v39 = vpop.f32.mrf.mxu1  ;;  %v718_v51 = vadd.f32 %v717_v29, %v699_v42  ;;  %v784_v27 = vmul.f32 %v1308_v15, %v783_v22  ;;  %v854_v22 = vld [vmem:[%s1590_s14 + $0x30] sm:$0xff] }
  0xd7   : > { %v758_v37 = vmul.f32 %v1538_v34, %v1538_v34  ;;  %v741_v43 = vadd.f32 %v1538_v34, %v1536_v32  ;;  %v700_v48 = vpop.f32.mrf.mxu3  ;;  %v1560_v61 = vadd.f32 %v736_v39, %v718_v51  ;;  %v785_v31 = vadd.f32 %v1308_v15, %v784_v27 }
  0xd8   : > { %v701_v56 = vadd.f32 %v700_v48, %v408_v36 }
  0xd9   : > { %v765_v46 = vadd.f32 %v758_v37, %v757_v40  ;;  %v742_v53 = vadd.f32 %v741_v43, %v1544_v41  ;;  %v762_v5 = vmul.f32 %v1560_v61, %v1560_v61  ;;  %v787_v36 = vsel %vm786_vm1, %v1308_v15, %v785_v31  ;;  %v852_v15 = vld [vmem:[%s1590_s14 + $0x20] sm:$0xff] }
  0xdb   : > { %v766_v59 = vadd.f32 %v765_v46, %v759_v50 }
  0xdc   : > { %v733_v49 = vpop.f32.mrf.mxu0  ;;  %v719_v55 = vpop.f32.mrf.mxu2 }
  0xdd   : > { %v1552_v52 = vadd.f32 %v733_v49, %v715_v45  ;;  %v720_v62 = vadd.f32 %v719_v55, %v701_v56  ;;  %v738_v1 = vpop.f32.mrf.mxu1 }
  0xdf   : > { %v743_v57 = vadd.f32 %v742_v53, %v1552_v52  ;;  %v760_v58 = vmul.f32 %v1552_v52, %v1552_v52  ;;  %v1568_v6 = vadd.f32 %v738_v1, %v720_v62  ;;  %v836_v62 = vld [vmem:[%s1582_s10 + $0x20] sm:$0xff] }
  0xe1   : > { %v767_v63 = vadd.f32 %v766_v59, %v760_v58  ;;  %v744_v0 = vadd.f32 %v743_v57, %v1548_v47  ;;  %v764_v9 = vmul.f32 %v1568_v6, %v1568_v6 }
  0xe3   : > { %v745_v3 = vadd.f32 %v744_v0, %v1560_v61  ;;  %v768_v4 = vadd.f32 %v767_v63, %v761_v60  ;;  %v838_v63 = vld [vmem:[%s1582_s10 + $0x30] sm:$0xff] }
  0xe5   : > { %v746_v7 = vadd.f32 %v745_v3, %v1563_v2  ;;  %v769_v10 = vadd.f32 %v768_v4, %v762_v5  ;;  %v848_v4 = vld [vmem:[%s1590_s14] sm:$0xff]  ;;  %v849_v5 = vld [vmem:[%s1590_s14 + $0x8] sm:$0xff] }
  0xe7   : > { %v747_v8 = vadd.f32 %v746_v7, %v1568_v6  ;;  %v770_v12 = vadd.f32 %v769_v10, %v763_v11  ;;  %v839_v7 = vld [vmem:[%s1582_s10 + $0x38] sm:$0xff] }
  0xe9   : > { %748 = vadd.xlane.f32.xlu2 %v747_v8  ;;  %v771_v13 = vadd.f32 %v770_v12, %v764_v9  ;;  %v851_v9 = vld [vmem:[%s1590_s14 + $0x18] sm:$0xff] }
  0xf1   : > { %772 = vadd.xlane.f32.xlu2 %v771_v13 }
 0x15c   : > { %v749_v16 = vpop.xlane.xlu2 %748 }
 0x15d   : > { %v750_v17 = vrot.slane %v749_v16, 4 }
 0x15f   : > { %v751_v18 = vadd.f32 %v750_v17, %v749_v16  ;;  %v853_v17 = vld [vmem:[%s1590_s14 + $0x28] sm:$0xff] }
 0x161   : > { %v752_v30 = vrot.slane %v751_v18, 2 }
 0x163   : > { %v753_v20 = vadd.f32 %v752_v30, %v751_v18 }
 0x164   : > { %v773_v21 = vpop.xlane.xlu2 %772 }
 0x165   : > { %v774_v23 = vrot.slane %v773_v21, 4  ;;  %v754_v24 = vrot.slane %v753_v20, 1 }
 0x167   : > { %v775_v25 = vadd.f32 %v774_v23, %v773_v21  ;;  %v755_v26 = vadd.f32 %v754_v24, %v753_v20  ;;  %v855_v23 = vld [vmem:[%s1590_s14 + $0x38] sm:$0xff] }
 0x169   : > { %v776_v28 = vrot.slane %v775_v25, 2  ;;  %1255 = vpush %v755_v26 }
 0x16b   : > { %v777_v29 = vadd.f32 %v776_v28, %v775_v25 }
 0x16d   : > { %v778_v33 = vrot.slane %v777_v29, 1 }
 0x16f   : > { %v779_v35 = vadd.f32 %v778_v33, %v777_v29 }
 0x171   : > { %1257 = vpush %v779_v35 }
 0x172   : > { %1259 = vpush %v787_v36 }
 0x19a   : > { %s1256_s15 = spop %1255 }
 0x1a2   : > { %s1258_s16 = spop %1257 }
 0x1a3   : > { %s1260_s17 = spop %1259 }
 0x1a4   : > { %s789_s25 = smul.f32 %s1260_s17, %s1256_s15 }
 0x1a5   : > { %s798_s26 = smul.f32 %s1260_s17, %s1258_s16  ;;  %s340_s17 = scalar_lea.vmem %s1639_s5, %s1030_s19 }
 0x1a6   : > { %s799_s27 = smul.f32 %s789_s25, %s789_s25  ;;  %v801_v46 = vstv %s789_s25 }
 0x1a7   : > { %v802_v48 = vsub.f32 %v1536_v32, %v801_v46  ;;  %v803_v49 = vsub.f32 %v1538_v34, %v801_v46  ;;  %v804_v50 = vsub.f32 %v1544_v41, %v801_v46  ;;  %v805_v51 = vsub.f32 %v1552_v52, %v801_v46  ;;  %v833_v34 = vld [vmem:[%s1582_s10 + $0x8] sm:$0xff]  ;;  %v834_v41 = vld [vmem:[%s1582_s10 + $0x10] sm:$0xff]  ;;  %v835_v52 = vld [vmem:[%s1582_s10 + $0x18] sm:$0xff] }
 0x1a8   : > { %s800_s28 = ssub.f32 %s798_s26, %s799_s27  ;;  %v806_v53 = vsub.f32 %v1548_v47, %v801_v46  ;;  %v807_v32 = vsub.f32 %v1560_v61, %v801_v46  ;;  %v808_v55 = vsub.f32 %v1563_v2, %v801_v46  ;;  %v809_v56 = vsub.f32 %v1568_v6, %v801_v46  ;;  %v837_v61 = vld [vmem:[%s1582_s10 + $0x28] sm:$0xff]  ;;  %v850_v6 = vld [vmem:[%s1590_s14 + $0x10] sm:$0xff] }
 0x1aa   : > { %s810_s29 = sadd.f32 1e-05, %s800_s28 }
 0x1ac   : > { %v811_v37 = vstv %s810_s29 }
 0x1ad   : > { %1309 = vrsqrt.f32 %v811_v37  ;;  %vm818_vm3 = vweird.f32 %v811_v37 }
 0x1b3   : > { %v1310_v38 = vpop.eup %1309 }
 0x1b4   : > { %v813_v39 = vmul.f32 %v1310_v38, %v811_v37  ;;  %vm819_vm2 = vweird.f32 %v1310_v38 }
 0x1b5   : > { %vm820_vm4 = vmor %vm818_vm3, %vm819_vm2 }
 0x1b6   : > { %v814_v40 = vmul.f32 %v1310_v38, %v813_v39 }
 0x1b8   : > { %v815_v42 = vmul.f32 0.5, %v814_v40 }
 0x1ba   : > { %v816_v43 = vsub.f32 1.5, %v815_v42 }
 0x1bc   : > { %v817_v44 = vmul.f32 %v1310_v38, %v816_v43 }
 0x1be   : > { %v821_v45 = vsel %vm820_vm4, %v1310_v38, %v817_v44 }
 0x1bf   : > { %1261 = vpush %v821_v45 }
 0x1f0   : > { %s1262_s18 = spop %1261 }
 0x1f1   : > { %v823_v57 = vstv %s1262_s18 }
 0x1f2   : > { %v824_v47 = vmul.f32 %v823_v57, %v802_v48  ;;  %v825_v58 = vmul.f32 %v823_v57, %v803_v49  ;;  %v826_v59 = vmul.f32 %v823_v57, %v804_v50  ;;  %v827_v60 = vmul.f32 %v823_v57, %v805_v51 }
 0x1f3   : > { %v828_v0 = vmul.f32 %v823_v57, %v806_v53  ;;  %v829_v1 = vmul.f32 %v823_v57, %v807_v32  ;;  %v830_v2 = vmul.f32 %v823_v57, %v808_v55  ;;  %v831_v3 = vmul.f32 %v823_v57, %v809_v56 }
 0x1f4   : > { %v840_v8 = vmul.f32 %v832_v54, %v824_v47  ;;  %v841_v10 = vmul.f32 %v833_v34, %v825_v58  ;;  %v842_v11 = vmul.f32 %v834_v41, %v826_v59  ;;  %v843_v12 = vmul.f32 %v835_v52, %v827_v60 }
 0x1f5   : > { %v844_v13 = vmul.f32 %v836_v62, %v828_v0  ;;  %v845_v14 = vmul.f32 %v837_v61, %v829_v1  ;;  %v846_v16 = vmul.f32 %v838_v63, %v830_v2  ;;  %v847_v20 = vmul.f32 %v839_v7, %v831_v3 }
 0x1f6   : > { %v856_v18 = vadd.f32 %v848_v4, %v840_v8  ;;  %v857_v19 = vadd.f32 %v849_v5, %v841_v10  ;;  %v858_v30 = vadd.f32 %v850_v6, %v842_v11  ;;  %v859_v21 = vadd.f32 %v851_v9, %v843_v12 }
 0x1f7   : > { %v860_v24 = vadd.f32 %v852_v15, %v844_v13  ;;  %v861_v25 = vadd.f32 %v853_v17, %v845_v14  ;;  %v862_v26 = vadd.f32 %v854_v22, %v846_v16  ;;  %v863_v27 = vadd.f32 %v855_v23, %v847_v20 }
 0x1f8   : > { %864 = vst [vmem:[%s340_s17] sm:$0xff] %v856_v18 }
 0x1f9   : > { %865 = vst [vmem:[%s340_s17 + $0x8] sm:$0xff] %v857_v19 }
 0x1fa   : > { %866 = vst [vmem:[%s340_s17 + $0x10] sm:$0xff] %v858_v30 }
 0x1fb   : > { %867 = vst [vmem:[%s340_s17 + $0x18] sm:$0xff] %v859_v21 }
 0x1fc   : > { %868 = vst [vmem:[%s340_s17 + $0x20] sm:$0xff] %v860_v24 }
 0x1fd   : > { %869 = vst [vmem:[%s340_s17 + $0x28] sm:$0xff] %v861_v25 }
 0x1fe   : > { %870 = vst [vmem:[%s340_s17 + $0x30] sm:$0xff] %v862_v26 }
 0x1ff   : > { %871 = vst [vmem:[%s340_s17 + $0x38] sm:$0xff] %v863_v27 }
 0x200 PF: > { %s15_s22 = sadd.s32 1, %s1349_s22   ;;  %s1640_s18 = smov %s1341_s20 }
 0x201   : > { %p12_p7 = scmp.ge.s32.totalorder %s15_s22, 12   ;;  %s1641_s19 = smov %s1345_s21 }
 0x202   : > { %s1642_s20 = smov %s1645_s23  ;;  %s1643_s21 = smov %s1649_s24 }
 0x203   :  { %14 = sbr.rel (!%p12_p7) target bundleno = 3 (0x3), region = 82 }

// kernel: strpm_forward.5
= control target key start
LH: loop header
LB: loop body
LE: loop exit
PB: predicated region body
PF: predicated region fallthrough
CT: control target
= control target key end

     0   :  { %s1909_s18 = smov 0   ;;  %s1911_s19 = smov 0   ;;  %s2269_s0 = inlined_call_operand.vmem [shape: bf16[2,2,576,256], index: 0, kind: input, shape index: {}]   ;;  %s2270_s1 = inlined_call_operand.vmem [shape: bf16[2,32,576], index: 1, kind: input, shape index: {}]   ;;  %s2271_s2 = inlined_call_operand.vmem [shape: f32[2,32,1], index: 2, kind: input, shape index: {}]   ;;  %s2272_s3 = inlined_call_operand.vmem [shape: f32[2,32,256], index: 3, kind: input, shape index: {}]   ;;  %s2273_s4 = inlined_call_operand.vmem [shape: f32[2,32,256], index: 4, kind: input, shape index: {}]   ;;  %s2274_s5 = inlined_call_operand.vmem [shape: f32[2,2,32,256], index: 5, kind: output, shape index: {}]  }
   0x1   :  { %s1913_s20 = smov 0   ;;  %s1915_s21 = smov 0  }
   0x2   :  { %s1917_s22 = smov 0  }
   0x3 LB: > { %s24_s23 = sadd.s32 1, %s1867_s20  ;;  %s27_s24 = sadd.s32 1, %s1871_s21  ;;  %s1875_s22 = sphi %s1917_s22, %s15_s22   ;;  %s1871_s21 = sphi %s1915_s21, %s2278_s21   ;;  %s1867_s20 = sphi %s1913_s20, %s2277_s20   ;;  %s1863_s19 = sphi %s1911_s19, %s2276_s19   ;;  %s1859_s18 = sphi %s1909_s18, %s2275_s18  }
   0x4   : > { %p25_p0 = scmp.ge.s32.totalorder %s24_s23, 2  ;;  %p1335_p1 = scmp.ge.s32.totalorder %s1875_s22, 1 }
   0x5   : > { %p247_p2 = scmp.lt.s32.totalorder %s1875_s22, 5 }
   0x6   : > { %s2280_s23 = smov (%p25_p0, %s24_s23), 0  ;;  %s2282_s24 = smov (!%p25_p0, %s27_s24), %s1871_s21 }
   0x7   : > { %p248_p3 = pnand %p1335_p1, %p247_p2  ;;  %p29_p4 = scmp.ge.s32.totalorder %s2282_s24, 2 }
   0x8   : > { %p303_p5 = scmp.lt.s32.totalorder (!%p248_p3), %s1863_s19, 1  ;;  %p305_p6 = scmp.lt.s32.totalorder (!%p248_p3), %s1859_s18, 1 }
   0x9   : > { %s2284_s24 = smov (%p29_p4, %s2282_s24), 0  ;;  %251 = sbr.rel (%p248_p3) target bundleno = 546 (0x222), region = 40 }
   0xe   : > { %s2286_s19 = smov (!%p303_p5, %s1863_s19), 1  ;;  %s2288_s18 = smov (!%p305_p6, %s1859_s18), 1  ;;  %vm860_vm0 = vcmask 523264  }
   0xf   : > { %s1779_s25 = smul.u32 288, %s2286_s19  ;;  %s1681_s8 = sshll.u32 %s2286_s19, 5 }
  0x10   : > { %s1778_s26 = smul.u32 144, %s2288_s18  ;;  %s2056_s14 = scalar_lea.vmem %s2271_s2, %s1681_s8 }
  0x11   : > { %s1780_s7 = smul.u32 80, %s2286_s19  ;;  %s1682_s30 = sshll.u32 %s2286_s19, 6 }
  0x12   : > { %s309_s27 = sadd.s32 %s1779_s25, %s1778_s26  ;;  %s2217_s10 = scalar_lea.vmem %s2272_s3, %s1682_s30 }
  0x13   : > { %s1336_s28 = sshll.u32 %s309_s27, 2  ;;  %s2012_s11 = scalar_lea.vmem %s2270_s1, %s1780_s7 }
  0x14   : > { %s1948_s6 = scalar_lea.vmem %s2269_s0, %s1336_s28  ;;  %s1345_s7 = sshll.u32 %s2286_s19, 4 }
  0x15   : > { %v1445_v0 = vld [vmem:[%s1948_s6 + $0x70] sm:$0xf]  ;;  %v1709_v1 = vld [vmem:[%s1948_s6 + $0x74] sm:$0xf0]  ;;  %v1437_v11 = vld [vmem:[%s1948_s6 + $0x60] sm:$0xf] }
  0x16   : > { %v1509_v2 = vld [vmem:[%s1948_s6 + $0xf0] sm:$0xf]  ;;  %v1446_v3 = vor.u32 %v1709_v1, %v1445_v0  ;;  %v1725_v4 = vld [vmem:[%s1948_s6 + $0xf4] sm:$0xf0]  ;;  %v1707_v13 = vld [vmem:[%s1948_s6 + $0x64] sm:$0xf0] }
  0x17   : > { %v1573_v5 = vld [vmem:[%s1948_s6 + $0x170] sm:$0xf]  ;;  %v1741_v6 = vld [vmem:[%s1948_s6 + $0x174] sm:$0xf0]  ;;  %v1510_v7 = vor.u32 %v1725_v4, %v1509_v2  ;;  %v1501_v14 = vld [vmem:[%s1948_s6 + $0xe0] sm:$0xf]  ;;  %v1438_v16 = vor.u32 %v1707_v13, %v1437_v11 }
  0x18   : > { %v1574_v8 = vor.u32 %v1741_v6, %v1573_v5  ;;  %v1637_v9 = vld [vmem:[%s1948_s6 + $0x1f0] sm:$0xf]  ;;  %v1757_v10 = vld [vmem:[%s1948_s6 + $0x1f4] sm:$0xf0]  ;;  %867 = vmatpush.bf16.msra.mxu0 %v1446_v3  ;;  %v1723_v15 = vld [vmem:[%s1948_s6 + $0xe4] sm:$0xf0] }
  0x19   : > { %v1638_v12 = vor.u32 %v1757_v10, %v1637_v9  ;;  %886 = vmatpush.bf16.msra.mxu1 %v1510_v7  ;;  %v1502_v17 = vor.u32 %v1723_v15, %v1501_v14  ;;  %v1565_v18 = vld [vmem:[%s1948_s6 + $0x160] sm:$0xf]  ;;  %v1739_v19 = vld [vmem:[%s1948_s6 + $0x164] sm:$0xf0]  ;;  %v1429_v23 = vld [vmem:[%s1948_s6 + $0x50] sm:$0xf] }
  0x1a   : > { %905 = vmatpush.bf16.msra.mxu2 %v1574_v8  ;;  %v1629_v20 = vld [vmem:[%s1948_s6 + $0x1e0] sm:$0xf]  ;;  %v1566_v21 = vor.u32 %v1739_v19, %v1565_v18  ;;  %v1755_v22 = vld [vmem:[%s1948_s6 + $0x1e4] sm:$0xf0]  ;;  %v1705_v24 = vld [vmem:[%s1948_s6 + $0x54] sm:$0xf0] }
  0x1b   : > { %924 = vmatpush.bf16.msra.mxu3 %v1638_v12  ;;  %v1630_v25 = vor.u32 %v1755_v22, %v1629_v20  ;;  %v1493_v26 = vld [vmem:[%s1948_s6 + $0xd0] sm:$0xf]  ;;  %v1721_v27 = vld [vmem:[%s1948_s6 + $0xd4] sm:$0xf0]  ;;  %v1430_v29 = vor.u32 %v1705_v24, %v1429_v23  ;;  %v1421_v35 = vld [vmem:[%s1948_s6 + $0x40] sm:$0xf] }
  0x1c   : > { %v1557_v28 = vld [vmem:[%s1948_s6 + $0x150] sm:$0xf]  ;;  %868 = vmatpush.bf16.msra.mxu0 %v1438_v16  ;;  %v1737_v30 = vld [vmem:[%s1948_s6 + $0x154] sm:$0xf0]  ;;  %v1494_v33 = vor.u32 %v1721_v27, %v1493_v26  ;;  %v1703_v36 = vld [vmem:[%s1948_s6 + $0x44] sm:$0xf0] }
  0x1d   : > { %v1621_v31 = vld [vmem:[%s1948_s6 + $0x1d0] sm:$0xf]  ;;  %v1753_v32 = vld [vmem:[%s1948_s6 + $0x1d4] sm:$0xf0]  ;;  %887 = vmatpush.bf16.msra.mxu1 %v1502_v17  ;;  %v1558_v34 = vor.u32 %v1737_v30, %v1557_v28  ;;  %v1485_v37 = vld [vmem:[%s1948_s6 + $0xc0] sm:$0xf]  ;;  %v1422_v44 = vor.u32 %v1703_v36, %v1421_v35 }
  0x1e   : > { %906 = vmatpush.bf16.msra.mxu2 %v1566_v21  ;;  %v1622_v38 = vor.u32 %v1753_v32, %v1621_v31  ;;  %v1719_v39 = vld [vmem:[%s1948_s6 + $0xc4] sm:$0xf0]  ;;  %v1549_v40 = vld [vmem:[%s1948_s6 + $0x140] sm:$0xf]  ;;  %v1413_v47 = vld [vmem:[%s1948_s6 + $0x30] sm:$0xf] }
  0x1f   : > { %925 = vmatpush.bf16.msra.mxu3 %v1630_v25  ;;  %v1735_v41 = vld [vmem:[%s1948_s6 + $0x144] sm:$0xf0]  ;;  %v1613_v42 = vld [vmem:[%s1948_s6 + $0x1c0] sm:$0xf]  ;;  %v1486_v45 = vor.u32 %v1719_v39, %v1485_v37  ;;  %v1701_v48 = vld [vmem:[%s1948_s6 + $0x34] sm:$0xf0] }
  0x20   : > { %v1751_v43 = vld [vmem:[%s1948_s6 + $0x1c4] sm:$0xf0]  ;;  %869 = vmatpush.bf16.msra.mxu0 %v1430_v29  ;;  %v1550_v46 = vor.u32 %v1735_v41, %v1549_v40  ;;  %v1477_v49 = vld [vmem:[%s1948_s6 + $0xb0] sm:$0xf]  ;;  %v1717_v51 = vld [vmem:[%s1948_s6 + $0xb4] sm:$0xf0]  ;;  %v1414_v56 = vor.u32 %v1701_v48, %v1413_v47 }
  0x21   : > { %888 = vmatpush.bf16.msra.mxu1 %v1494_v33  ;;  %v1614_v50 = vor.u32 %v1751_v43, %v1613_v42  ;;  %v1541_v52 = vld [vmem:[%s1948_s6 + $0x130] sm:$0xf]  ;;  %v1733_v53 = vld [vmem:[%s1948_s6 + $0x134] sm:$0xf0]  ;;  %v1478_v57 = vor.u32 %v1717_v51, %v1477_v49  ;;  %v1405_v59 = vld [vmem:[%s1948_s6 + $0x20] sm:$0xf] }
  0x22   : > { %907 = vmatpush.bf16.msra.mxu2 %v1558_v34  ;;  %v1605_v54 = vld [vmem:[%s1948_s6 + $0x1b0] sm:$0xf]  ;;  %v1749_v55 = vld [vmem:[%s1948_s6 + $0x1b4] sm:$0xf0]  ;;  %v1542_v58 = vor.u32 %v1733_v53, %v1541_v52  ;;  %v1699_v60 = vld [vmem:[%s1948_s6 + $0x24] sm:$0xf0] }
  0x23   : > { %926 = vmatpush.bf16.msra.mxu3 %v1622_v38  ;;  %v1469_v61 = vld [vmem:[%s1948_s6 + $0xa0] sm:$0xf]  ;;  %v1606_v62 = vor.u32 %v1749_v55, %v1605_v54  ;;  %v1715_v63 = vld [vmem:[%s1948_s6 + $0xa4] sm:$0xf0]  ;;  %v1406_v4 = vor.u32 %v1699_v60, %v1405_v59  ;;  %v1397_v7 = vld [vmem:[%s1948_s6 + $0x10] sm:$0xf] }
  0x24   : > { %870 = vmatpush.bf16.msra.mxu0 %v1422_v44  ;;  %v1533_v0 = vld [vmem:[%s1948_s6 + $0x120] sm:$0xf]  ;;  %v1731_v1 = vld [vmem:[%s1948_s6 + $0x124] sm:$0xf0]  ;;  %v1470_v5 = vor.u32 %v1715_v63, %v1469_v61  ;;  %v1697_v8 = vld [vmem:[%s1948_s6 + $0x14] sm:$0xf0] }
  0x25   : > { %889 = vmatpush.bf16.msra.mxu1 %v1486_v45  ;;  %v1597_v2 = vld [vmem:[%s1948_s6 + $0x1a0] sm:$0xf]  ;;  %v1747_v3 = vld [vmem:[%s1948_s6 + $0x1a4] sm:$0xf0]  ;;  %v1534_v6 = vor.u32 %v1731_v1, %v1533_v0  ;;  %v1461_v9 = vld [vmem:[%s1948_s6 + $0x90] sm:$0xf]  ;;  %v1398_v17 = vor.u32 %v1697_v8, %v1397_v7 }
  0x26   : > { %908 = vmatpush.bf16.msra.mxu2 %v1550_v46  ;;  %v1598_v10 = vor.u32 %v1747_v3, %v1597_v2  ;;  %v1713_v11 = vld [vmem:[%s1948_s6 + $0x94] sm:$0xf0]  ;;  %v1525_v12 = vld [vmem:[%s1948_s6 + $0x110] sm:$0xf]  ;;  %v1389_v16 = vld [vmem:[%s1948_s6] sm:$0xf] }
  0x27   : > { %927 = vmatpush.bf16.msra.mxu3 %v1614_v50  ;;  %v1729_v13 = vld [vmem:[%s1948_s6 + $0x114] sm:$0xf0]  ;;  %v1589_v14 = vld [vmem:[%s1948_s6 + $0x190] sm:$0xf]  ;;  %v1695_v18 = vld [vmem:[%s1948_s6 + $0x4] sm:$0xf0]  ;;  %v1462_v21 = vor.u32 %v1713_v11, %v1461_v9 }
  0x28   : > { %871 = vmatpush.bf16.msra.mxu0 %v1414_v56  ;;  %v1745_v15 = vld [vmem:[%s1948_s6 + $0x194] sm:$0xf0]  ;;  %v1453_v19 = vld [vmem:[%s1948_s6 + $0x80] sm:$0xf]  ;;  %v1711_v20 = vld [vmem:[%s1948_s6 + $0x84] sm:$0xf0]  ;;  %v1526_v22 = vor.u32 %v1729_v13, %v1525_v12  ;;  %v1390_v34 = vor.u32 %v1695_v18, %v1389_v16 }
  0x29   : > { %890 = vmatpush.bf16.msra.mxu1 %v1478_v57  ;;  %v1517_v23 = vld [vmem:[%s1948_s6 + $0x100] sm:$0xf]  ;;  %v1727_v24 = vld [vmem:[%s1948_s6 + $0x104] sm:$0xf0]  ;;  %v1590_v26 = vor.u32 %v1745_v15, %v1589_v14  ;;  %v1686_v29 = vld [vmem:[%s2012_s11 + $0x10] sm:$0xf0]  ;;  %v1454_v38 = vor.u32 %v1711_v20, %v1453_v19 }
  0x2a   : > { %909 = vmatpush.bf16.msra.mxu2 %v1542_v58  ;;  %v1581_v25 = vld [vmem:[%s1948_s6 + $0x180] sm:$0xf]  ;;  %v1743_v27 = vld [vmem:[%s1948_s6 + $0x184] sm:$0xf0]  ;;  %v1684_v30 = vld [vmem:[%s2012_s11 + $0x4] sm:$0xf]  ;;  %v1518_v39 = vor.u32 %v1727_v24, %v1517_v23 }
  0x2b   : > { %928 = vmatpush.bf16.msra.mxu3 %v1606_v62  ;;  %v1349_v28 = vld [vmem:[%s2012_s11] sm:$0xf]  ;;  %v1351_v31 = vld [vmem:[%s2012_s11 + $0x14] sm:$0xf0]  ;;  %v1669_v32 = vld [vmem:[%s1948_s6 + $0x230] sm:$0xf]  ;;  %v1582_v43 = vor.u32 %v1743_v27, %v1581_v25 }
  0x2c   : > { %872 = vmatpush.bf16.msra.mxu0 %v1406_v4  ;;  %v1765_v33 = vld [vmem:[%s1948_s6 + $0x234] sm:$0xf0]  ;;  %v1357_v35 = vld [vmem:[%s2012_s11 + $0x8] sm:$0xf]  ;;  %v1708_v36 = vld [vmem:[%s1948_s6 + $0x74] sm:$0xf]  ;;  %v2036_v48 = vor.u32 %v1686_v29, %v1349_v28  ;;  %v2041_v53 = vor.u32 %v1684_v30, %v1351_v31 }
  0x2d   : > { %891 = vmatpush.bf16.msra.mxu1 %v1470_v5  ;;  %v1447_v37 = vld [vmem:[%s1948_s6 + $0x78] sm:$0xf0]  ;;  %v1685_v41 = vld [vmem:[%s2012_s11 + $0xc] sm:$0xf]  ;;  %v1359_v42 = vld [vmem:[%s2012_s11 + $0x1c] sm:$0xf0]  ;;  %v1670_v44 = vor.u32 %v1765_v33, %v1669_v32 }
  0x2e   : > { %910 = vmatpush.bf16.msra.mxu2 %v1534_v6  ;;  %v1687_v40 = vld [vmem:[%s2012_s11 + $0x18] sm:$0xf0]  ;;  %v1724_v45 = vld [vmem:[%s1948_s6 + $0xf4] sm:$0xf]  ;;  %v1450_v49 = vor.u32 %v1708_v36, %v1447_v37  ;;  %v1661_v51 = vld [vmem:[%s1948_s6 + $0x220] sm:$0xf]  ;;  %v2047_v57 = vor.u32 %v1685_v41, %v1359_v42 }
  0x2f   : > { %929 = vmatpush.bf16.msra.mxu3 %v1598_v10  ;;  %v1511_v46 = vld [vmem:[%s1948_s6 + $0xf8] sm:$0xf0]  ;;  %v1740_v47 = vld [vmem:[%s1948_s6 + $0x174] sm:$0xf]  ;;  %v1763_v52 = vld [vmem:[%s1948_s6 + $0x224] sm:$0xf0]  ;;  %v2043_v54 = vor.u32 %v1687_v40, %v1357_v35 }
  0x30   : > { %873 = vmatpush.bf16.msra.mxu0 %v1398_v17  ;;  %v1575_v50 = vld [vmem:[%s1948_s6 + $0x178] sm:$0xf0]  ;;  %v1706_v55 = vld [vmem:[%s1948_s6 + $0x64] sm:$0xf]  ;;  %v1439_v56 = vld [vmem:[%s1948_s6 + $0x68] sm:$0xf0]  ;;  %v1514_v58 = vor.u32 %v1724_v45, %v1511_v46  ;;  %v1662_v62 = vor.u32 %v1763_v52, %v1661_v51 }
  0x31   : > { %892 = vmatpush.bf16.msra.mxu1 %v1462_v21  ;;  %v1578_v59 = vor.u32 %v1740_v47, %v1575_v50  ;;  %v1722_v60 = vld [vmem:[%s1948_s6 + $0xe4] sm:$0xf]  ;;  %v1503_v61 = vld [vmem:[%s1948_s6 + $0xe8] sm:$0xf0]  ;;  %v1442_v63 = vor.u32 %v1706_v55, %v1439_v56  ;;  %v1704_v2 = vld [vmem:[%s1948_s6 + $0x54] sm:$0xf] }
  0x32   : > { %911 = vmatpush.bf16.msra.mxu2 %v1526_v22  ;;  %v1738_v0 = vld [vmem:[%s1948_s6 + $0x164] sm:$0xf]  ;;  %v1567_v1 = vld [vmem:[%s1948_s6 + $0x168] sm:$0xf0]  ;;  %v1431_v3 = vld [vmem:[%s1948_s6 + $0x58] sm:$0xf0]  ;;  %v1506_v4 = vor.u32 %v1722_v60, %v1503_v61 }
  0x33   : > { %930 = vmatpush.bf16.msra.mxu3 %v1590_v26  ;;  %v426_v5 = vld [vmem:[%s2056_s14] sm:$0xff]  ;;  %v1653_v6 = vld [vmem:[%s1948_s6 + $0x210] sm:$0xf]  ;;  %v1761_v7 = vld [vmem:[%s1948_s6 + $0x214] sm:$0xf0]  ;;  %v1570_v8 = vor.u32 %v1738_v0, %v1567_v1  ;;  %v1434_v12 = vor.u32 %v1704_v2, %v1431_v3  ;;  %v1877_v15 = vmov 0  }
  0x34   : > { %874 = vmatpush.bf16.msra.mxu0 %v1390_v34  ;;  %v1720_v9 = vld [vmem:[%s1948_s6 + $0xd4] sm:$0xf]  ;;  %v1495_v10 = vld [vmem:[%s1948_s6 + $0xd8] sm:$0xf0]  ;;  %v1654_v11 = vor.u32 %v1761_v7, %v1653_v6  ;;  %1831 = vset.pattern.permute.xlu0 %v1877_v15  ;;  %v1702_v16 = vld [vmem:[%s1948_s6 + $0x44] sm:$0xf] }
  0x35   : > { %893 = vmatpush.bf16.msra.mxu1 %v1454_v38  ;;  %v1736_v13 = vld [vmem:[%s1948_s6 + $0x154] sm:$0xf]  ;;  %v1559_v14 = vld [vmem:[%s1948_s6 + $0x158] sm:$0xf0]  ;;  %432 = vperm.xlu0 %1831, %v426_v5   ;;  %v1423_v17 = vld [vmem:[%s1948_s6 + $0x48] sm:$0xf0]  ;;  %v1498_v19 = vor.u32 %v1720_v9, %v1495_v10 }
  0x36   : > { %912 = vmatpush.bf16.msra.mxu2 %v1518_v39  ;;  %v1718_v18 = vld [vmem:[%s1948_s6 + $0xc4] sm:$0xf]  ;;  %1832 = vset.pattern.permute.xlu1 %v1877_v15  ;;  %v1487_v20 = vld [vmem:[%s1948_s6 + $0xc8] sm:$0xf0]  ;;  %v1562_v23 = vor.u32 %v1736_v13, %v1559_v14  ;;  %v1369_v24 = vld [vmem:[%s2012_s11 + $0x28] sm:$0xf]  ;;  %v1426_v28 = vor.u32 %v1702_v16, %v1423_v17 }
  0x37   : > { %931 = vmatpush.bf16.msra.mxu3 %v1582_v43  ;;  %875 = vmatmul.bf16.vlgmr.msra.gmra.mxu0 %v2036_v48  ;;  %v1734_v21 = vld [vmem:[%s1948_s6 + $0x144] sm:$0xf]  ;;  %v1551_v22 = vld [vmem:[%s1948_s6 + $0x148] sm:$0xf0]  ;;  %v1691_v25 = vld [vmem:[%s2012_s11 + $0x38] sm:$0xf0]  ;;  %v1490_v36 = vor.u32 %v1718_v18, %v1487_v20 }
  0x38   : > { %947 = vmatpush.bf16.msrb.mxu0 %v1670_v44  ;;  %894 = vmatmul.bf16.vlgmr.msra.gmra.mxu1 %v2041_v53  ;;  %v1645_v26 = vld [vmem:[%s1948_s6 + $0x200] sm:$0xf]  ;;  %v1759_v27 = vld [vmem:[%s1948_s6 + $0x204] sm:$0xf0]  ;;  %v1689_v29 = vld [vmem:[%s2012_s11 + $0x2c] sm:$0xf]  ;;  %v1554_v40 = vor.u32 %v1734_v21, %v1551_v22  ;;  %v2095_v44 = vor.u32 %v1691_v25, %v1369_v24 }
  0x39   : > { %962 = vmatpush.bf16.msrb.mxu1 %v1450_v49  ;;  %913 = vmatmul.bf16.vlgmr.msra.gmra.mxu2 %v2043_v54  ;;  %v1371_v30 = vld [vmem:[%s2012_s11 + $0x3c] sm:$0xf0]  ;;  %v1377_v31 = vld [vmem:[%s2012_s11 + $0x30] sm:$0xf]  ;;  %v1646_v32 = vor.u32 %v1759_v27, %v1645_v26  ;;  %v1692_v33 = vld [vmem:[%s2012_s11 + $0x40] sm:$0xf0] }
  0x3a   : > { %932 = vmatmul.bf16.vlgmr.msra.gmra.mxu3 %v2047_v57  ;;  %981 = vmatpush.bf16.msrb.mxu2 %v1514_v58  ;;  %v1700_v34 = vld [vmem:[%s1948_s6 + $0x34] sm:$0xf]  ;;  %v1415_v35 = vld [vmem:[%s1948_s6 + $0x38] sm:$0xf0]  ;;  %v427_v38 = vld [vmem:[%s2056_s14 + $0x8] sm:$0xff]  ;;  %v2100_v50 = vor.u32 %v1689_v29, %v1371_v30  ;;  %v2102_v51 = vor.u32 %v1692_v33, %v1377_v31 }
  0x3b   : > { %1000 = vmatpush.bf16.msrb.mxu3 %v1578_v59  ;;  %v1690_v37 = vld [vmem:[%s2012_s11 + $0x34] sm:$0xf]  ;;  %v1379_v41 = vld [vmem:[%s2012_s11 + $0x44] sm:$0xf0]  ;;  %v1479_v43 = vld [vmem:[%s1948_s6 + $0xb8] sm:$0xf0]  ;;  %v1418_v45 = vor.u32 %v1700_v34, %v1415_v35 }
  0x3c   : > { %948 = vmatpush.bf16.msrb.mxu0 %v1662_v62  ;;  %v428_v39 = vld [vmem:[%s2056_s14 + $0x10] sm:$0xff]  ;;  %v1543_v47 = vld [vmem:[%s1948_s6 + $0x138] sm:$0xf0]  ;;  %v1698_v49 = vld [vmem:[%s1948_s6 + $0x24] sm:$0xf]  ;;  %v2107_v58 = vor.u32 %v1690_v37, %v1379_v41 }
  0x3d   : > { %963 = vmatpush.bf16.msrb.mxu1 %v1442_v63  ;;  %v1716_v42 = vld [vmem:[%s1948_s6 + $0xb4] sm:$0xf]  ;;  %442 = vperm.xlu1 %1832, %v428_v39   ;;  %v1407_v52 = vld [vmem:[%s1948_s6 + $0x28] sm:$0xf0]  ;;  %v1639_v56 = vld [vmem:[%s1948_s6 + $0x1f8] sm:$0xf0] }
  0x3e   : > { %982 = vmatpush.bf16.msrb.mxu2 %v1506_v4  ;;  %v1732_v46 = vld [vmem:[%s1948_s6 + $0x134] sm:$0xf]  ;;  %437 = vperm.xlu0 %1831, %v427_v38   ;;  %v1482_v59 = vor.u32 %v1716_v42, %v1479_v43  ;;  %v1714_v61 = vld [vmem:[%s1948_s6 + $0xa4] sm:$0xf]  ;;  %v1471_v62 = vld [vmem:[%s1948_s6 + $0xa8] sm:$0xf0]  ;;  %v1410_v1 = vor.u32 %v1698_v49, %v1407_v52 }
  0x3f   : > { %1001 = vmatpush.bf16.msrb.mxu3 %v1570_v8  ;;  %v1756_v55 = vld [vmem:[%s1948_s6 + $0x1f4] sm:$0xf]  ;;  %v1546_v60 = vor.u32 %v1732_v46, %v1543_v47  ;;  %v1730_v63 = vld [vmem:[%s1948_s6 + $0x124] sm:$0xf]  ;;  %v1535_v2 = vld [vmem:[%s1948_s6 + $0x128] sm:$0xf0]  ;;  %v1474_v8 = vor.u32 %v1714_v61, %v1471_v62 }
  0x40   : > { %949 = vmatpush.bf16.msrb.mxu0 %v1654_v11  ;;  %v1642_v0 = vor.u32 %v1756_v55, %v1639_v56  ;;  %v1754_v3 = vld [vmem:[%s1948_s6 + $0x1e4] sm:$0xf]  ;;  %v1631_v4 = vld [vmem:[%s1948_s6 + $0x1e8] sm:$0xf0]  ;;  %v1696_v5 = vld [vmem:[%s1948_s6 + $0x14] sm:$0xf]  ;;  %v1538_v9 = vor.u32 %v1730_v63, %v1535_v2 }
  0x41   : > { %964 = vmatpush.bf16.msrb.mxu1 %v1434_v12  ;;  %v1399_v6 = vld [vmem:[%s1948_s6 + $0x18] sm:$0xf0]  ;;  %v1712_v10 = vld [vmem:[%s1948_s6 + $0x94] sm:$0xf]  ;;  %v1634_v13 = vor.u32 %v1754_v3, %v1631_v4  ;;  %v1694_v18 = vld [vmem:[%s1948_s6 + $0x4] sm:$0xf] }
  0x42   : > { %983 = vmatpush.bf16.msrb.mxu2 %v1498_v19  ;;  %v429_v7 = vld [vmem:[%s2056_s14 + $0x18] sm:$0xff]  ;;  %v1728_v12 = vld [vmem:[%s1948_s6 + $0x114] sm:$0xf]  ;;  %v1402_v14 = vor.u32 %v1696_v5, %v1399_v6  ;;  %v1391_v19 = vld [vmem:[%s1948_s6 + $0x8] sm:$0xf0]  ;;  %s2225_s14 = scalar_lea.vmem %s2273_s4, %s1682_s30 }
  0x43   : > { %1002 = vmatpush.bf16.msrb.mxu3 %v1562_v23  ;;  %v1463_v11 = vld [vmem:[%s1948_s6 + $0x98] sm:$0xf0]  ;;  %v1752_v16 = vld [vmem:[%s1948_s6 + $0x1d4] sm:$0xf]  ;;  %v1710_v24 = vld [vmem:[%s1948_s6 + $0x84] sm:$0xf]  ;;  %v1394_v27 = vor.u32 %v1694_v18, %v1391_v19 }
  0x44   : > { %950 = vmatpush.bf16.msrb.mxu0 %v1646_v32  ;;  %v1527_v15 = vld [vmem:[%s1948_s6 + $0x118] sm:$0xf0]  ;;  %v1466_v20 = vor.u32 %v1712_v10, %v1463_v11  ;;  %v1764_v21 = vld [vmem:[%s1948_s6 + $0x234] sm:$0xf]  ;;  %v1455_v25 = vld [vmem:[%s1948_s6 + $0x88] sm:$0xf0] }
  0x45   : > { %965 = vmatpush.bf16.msrb.mxu1 %v1426_v28  ;;  %447 = vperm.xlu1 %1832, %v429_v7   ;;  %v1623_v17 = vld [vmem:[%s1948_s6 + $0x1d8] sm:$0xf0]  ;;  %v1530_v23 = vor.u32 %v1728_v12, %v1527_v15  ;;  %v1726_v28 = vld [vmem:[%s1948_s6 + $0x104] sm:$0xf]  ;;  %v1519_v29 = vld [vmem:[%s1948_s6 + $0x108] sm:$0xf0]  ;;  %v1458_v33 = vor.u32 %v1710_v24, %v1455_v25 }
  0x46   : > { %984 = vmatpush.bf16.msrb.mxu2 %v1490_v36  ;;  %v1671_v22 = vld [vmem:[%s1948_s6 + $0x238] sm:$0xf0]  ;;  %v1626_v26 = vor.u32 %v1752_v16, %v1623_v17  ;;  %v1365_v30 = vld [vmem:[%s2012_s11 + $0x10] sm:$0xf]  ;;  %v1688_v31 = vld [vmem:[%s2012_s11 + $0x20] sm:$0xf0]  ;;  %v1522_v34 = vor.u32 %v1726_v28, %v1519_v29 }
  0x47   : > { %1003 = vmatpush.bf16.msrb.mxu3 %v1554_v40  ;;  %880 = vmatmul.bf16.gmra.mxu0 %v2095_v44  ;;  %v1674_v32 = vor.u32 %v1764_v21, %v1671_v22  ;;  %v1762_v35 = vld [vmem:[%s1948_s6 + $0x224] sm:$0xf]  ;;  %v1663_v36 = vld [vmem:[%s1948_s6 + $0x228] sm:$0xf0]  ;;  %v1366_v37 = vor.u32 %v1688_v31, %v1365_v30  ;;  %v1760_v42 = vld [vmem:[%s1948_s6 + $0x214] sm:$0xf] }
  0x48   : > { %899 = vmatmul.bf16.gmra.mxu1 %v2100_v50  ;;  %1019 = vmatpush.bf16.msra.mxu0 %v1642_v0  ;;  %v1750_v38 = vld [vmem:[%s1948_s6 + $0x1c4] sm:$0xf]  ;;  %v1615_v39 = vld [vmem:[%s1948_s6 + $0x1c8] sm:$0xf0]  ;;  %v1666_v40 = vor.u32 %v1762_v35, %v1663_v36  ;;  %v1655_v43 = vld [vmem:[%s1948_s6 + $0x218] sm:$0xf0] }
  0x49   : > { %966 = vmatpush.bf16.msrb.mxu1 %v1418_v45  ;;  %918 = vmatmul.bf16.gmra.mxu2 %v2102_v51  ;;  %v1618_v41 = vor.u32 %v1750_v38, %v1615_v39  ;;  %v1748_v45 = vld [vmem:[%s1948_s6 + $0x1b4] sm:$0xf]  ;;  %v1607_v46 = vld [vmem:[%s1948_s6 + $0x1b8] sm:$0xf0]  ;;  %v1658_v47 = vor.u32 %v1760_v42, %v1655_v43  ;;  %v1758_v52 = vld [vmem:[%s1948_s6 + $0x204] sm:$0xf] }
  0x4a   : > { %937 = vmatmul.bf16.gmra.mxu3 %v2107_v58  ;;  %985 = vmatpush.bf16.msrb.mxu2 %v1482_v59  ;;  %v1610_v49 = vor.u32 %v1748_v45, %v1607_v46  ;;  %v1647_v55 = vld [vmem:[%s1948_s6 + $0x208] sm:$0xf0]  ;;  %v1746_v56 = vld [vmem:[%s1948_s6 + $0x1a4] sm:$0xf]  ;;  %v1385_v61 = vld [vmem:[%s2012_s11 + $0x38] sm:$0xf] }
  0x4b   : > { %1004 = vmatpush.bf16.msrb.mxu3 %v1546_v60  ;;  %v1599_v59 = vld [vmem:[%s1948_s6 + $0x1a8] sm:$0xf0]  ;;  %v1591_v60 = vld [vmem:[%s1948_s6 + $0x198] sm:$0xf0] }
  0x4c   : > { %1020 = vmatpush.bf16.msra.mxu0 %v1634_v13  ;;  %v1693_v62 = vld [vmem:[%s2012_s11 + $0x48] sm:$0xf0] }
  0x4d   : > { %967 = vmatpush.bf16.msrb.mxu1 %v1410_v1  ;;  %v1742_v1 = vld [vmem:[%s1948_s6 + $0x184] sm:$0xf]  ;;  %v1583_v2 = vld [vmem:[%s1948_s6 + $0x188] sm:$0xf0] }
  0x4e   : > { %986 = vmatpush.bf16.msrb.mxu2 %v1474_v8  ;;  %v1586_v3 = vor.u32 %v1742_v1, %v1583_v2 }
  0x4f   : > { %1005 = vmatpush.bf16.msrb.mxu3 %v1538_v9 }
  0x50   : > { %1021 = vmatpush.bf16.msra.mxu0 %v1626_v26 }
  0x51   : > { %968 = vmatpush.bf16.msrb.mxu1 %v1402_v14 }
  0x52   : > { %987 = vmatpush.bf16.msrb.mxu2 %v1466_v20 }
  0x53   : > { %1006 = vmatpush.bf16.msrb.mxu3 %v1530_v23 }
  0x54   : > { %1022 = vmatpush.bf16.msra.mxu0 %v1618_v41 }
  0x55   : > { %969 = vmatpush.bf16.msrb.mxu1 %v1394_v27 }
  0x56   : > { %988 = vmatpush.bf16.msrb.mxu2 %v1458_v33 }
  0x57   : > { %1007 = vmatpush.bf16.msrb.mxu3 %v1522_v34  ;;  %1675 = vmatmul.msk.bf16.vlgmr.msrb.gmra.mxu0 %vm860_vm0, %v1366_v37 }
  0x58   : > { %970 = vmatmul.bf16.vlgmr.msrb.gmra.mxu1 %v2036_v48  ;;  %v1650_v48 = vor.u32 %v1758_v52, %v1647_v55  ;;  %1023 = vmatpush.bf16.msra.mxu0 %v1610_v49 }
  0x59   : > { %1042 = vmatpush.bf16.msra.mxu1 %v1674_v32  ;;  %989 = vmatmul.bf16.vlgmr.msrb.gmra.mxu2 %v2041_v53  ;;  %v1602_v53 = vor.u32 %v1746_v56, %v1599_v59 }
  0x5a   : > { %1766 = vmatpush.bf16.msra.mxu2 %v1642_v0  ;;  %1008 = vmatmul.bf16.vlgmr.msrb.gmra.mxu3 %v2043_v54  ;;  %v1744_v54 = vld [vmem:[%s1948_s6 + $0x194] sm:$0xf]  ;;  %v1386_v0 = vor.u32 %v1693_v62, %v1385_v61  ;;  %s1344_s6 = sshll.u32 %s2288_s18, 3 }
  0x5b   : > { %1774 = vmatpush.bf16.msra.mxu3 %v1674_v32  ;;  %v1594_v63 = vor.u32 %v1744_v54, %v1591_v60  ;;  %s2219_s11 = sadd.s32 %s1345_s7, %s1344_s6 }
  0x5c   : > { %1024 = vmatpush.bf16.msra.mxu0 %v1602_v53  ;;  %s1346_s19 = sshll.u32 %s2219_s11, 3 }
  0x5d   : > { %1043 = vmatpush.bf16.msra.mxu1 %v1666_v40 }
  0x5e   : > { %1767 = vmatpush.bf16.msra.mxu2 %v1634_v13 }
  0x5f   : > { %1775 = vmatpush.bf16.msra.mxu3 %v1666_v40 }
  0x60   : > { %1025 = vmatpush.bf16.msra.mxu0 %v1594_v63 }
  0x61   : > { %1044 = vmatpush.bf16.msra.mxu1 %v1658_v47 }
  0x62   : > { %1768 = vmatpush.bf16.msra.mxu2 %v1626_v26 }
  0x63   : > { %1776 = vmatpush.bf16.msra.mxu3 %v1658_v47 }
  0x64   : > { %1026 = vmatpush.bf16.msra.mxu0 %v1586_v3 }
  0x65   : > { %1045 = vmatpush.bf16.msra.mxu1 %v1650_v48 }
  0x66   : > { %1769 = vmatpush.bf16.msra.mxu2 %v1618_v41 }
  0x67   : > { %1777 = vmatpush.bf16.msra.mxu3 %v1650_v48  ;;  %1676 = vmatmul.msk.bf16.gmra.mxu0 %vm860_vm0, %v1386_v0 }
  0x68   : > { %975 = vmatmul.bf16.gmra.mxu1 %v2095_v44 }
  0x69   : > { %994 = vmatmul.bf16.gmra.mxu2 %v2100_v50 }
  0x6a   : > { %1770 = vmatpush.bf16.msra.mxu2 %v1610_v49  ;;  %1013 = vmatmul.bf16.gmra.mxu3 %v2102_v51 }
  0x6e   : > { %1771 = vmatpush.bf16.msra.mxu2 %v1602_v53 }
  0x72   : > { %1772 = vmatpush.bf16.msra.mxu2 %v1594_v63 }
  0x76   : > { %1773 = vmatpush.bf16.msra.mxu2 %v1586_v3 }
  0x77   : > { %1027 = vmatmul.bf16.vlgmr.msra.gmra.mxu0 %v2047_v57 }
  0x78   : > { %1677 = vmatmul.msk.bf16.vlgmr.msra.gmra.mxu1 %vm860_vm0, %v1366_v37 }
  0x79   : > { %1032 = vmatmul.bf16.vlgmr.msra.gmra.mxu2 %v2107_v58 }
  0x7a   : > { %1678 = vmatmul.msk.bf16.vlgmr.msra.gmra.mxu3 %vm860_vm0, %v1386_v0 }
  0xa7   : > { %v433_v21 = vpop.permute.xlu0 %432 }
  0xaf   : > { %v443_v26 = vpop.permute.xlu1 %442 }
  0xb0   : > { %v438_v28 = vpop.permute.xlu0 %437 }
  0xb4   : > { %v876_v4 = vpop.f32.mrf.mxu0 }
  0xb5   : > { %v895_v5 = vpop.f32.mrf.mxu1  ;;  %v877_v27 = vadd.f32 %v876_v4, %v433_v21 }
  0xb7   : > { %v896_v35 = vadd.f32 %v895_v5, %v877_v27  ;;  %v448_v47 = vpop.permute.xlu1 %447 }
  0xbc   : > { %v914_v6 = vpop.f32.mrf.mxu2  ;;  %v878_v7 = vpop.f32.mrf.mxu0 }
  0xbd   : > { %v933_v44 = vpop.f32.mrf.mxu3  ;;  %v897_v50 = vpop.f32.mrf.mxu1  ;;  %v879_v34 = vadd.f32 %v878_v7, %v438_v28  ;;  %v915_v37 = vadd.f32 %v914_v6, %v896_v35 }
  0xbf   : > { %v898_v38 = vadd.f32 %v897_v50, %v879_v34  ;;  %v934_v46 = vadd.f32 %v933_v44, %v915_v37 }
  0xc4   : > { %v916_v8 = vpop.f32.mrf.mxu2  ;;  %v881_v9 = vpop.f32.mrf.mxu0 }
  0xc5   : > { %v935_v51 = vpop.f32.mrf.mxu3  ;;  %v900_v10 = vpop.f32.mrf.mxu1  ;;  %v882_v39 = vadd.f32 %v881_v9, %v443_v26  ;;  %v917_v42 = vadd.f32 %v916_v8, %v898_v38 }
  0xc7   : > { %v901_v56 = vadd.f32 %v900_v10, %v882_v39  ;;  %v936_v60 = vadd.f32 %v935_v51, %v917_v42 }
  0xcc   : > { %v919_v11 = vpop.f32.mrf.mxu2  ;;  %v883_v13 = vpop.f32.mrf.mxu0 }
  0xcd   : > { %v938_v12 = vpop.f32.mrf.mxu3  ;;  %v902_v57 = vpop.f32.mrf.mxu1  ;;  %v884_v61 = vadd.f32 %v883_v13, %v448_v47  ;;  %v920_v62 = vadd.f32 %v919_v11, %v901_v56 }
  0xcf   : > { %v903_v6 = vadd.f32 %v902_v57, %v884_v61  ;;  %v939_v8 = vadd.f32 %v938_v12, %v920_v62 }
  0xd4   : > { %v921_v14 = vpop.f32.mrf.mxu2  ;;  %v952_v15 = vpop.f32.mrf.mxu0 }
  0xd5   : > { %v2168_v58 = vpop.f32.mrf.mxu3  ;;  %v971_v16 = vpop.f32.mrf.mxu1  ;;  %v2170_v59 = vadd.f32 %v952_v15, %v934_v46  ;;  %v922_v11 = vadd.f32 %v921_v14, %v903_v6 }
  0xd6   : > { %v972_v32 = vadd.f32 %v971_v16, %v433_v21 }
  0xd7   : > { %v1073_v2 = vmul.f32 %v2170_v59, %v2170_v59  ;;  %v941_v14 = vadd.f32 %v2168_v58, %v922_v11 }
  0xdc   : > { %v990_v17 = vpop.f32.mrf.mxu2  ;;  %v954_v19 = vpop.f32.mrf.mxu0 }
  0xdd   : > { %v1009_v18 = vpop.f32.mrf.mxu3  ;;  %v973_v20 = vpop.f32.mrf.mxu1  ;;  %v991_v36 = vadd.f32 %v990_v17, %v972_v32  ;;  %v2176_v1 = vadd.f32 %v954_v19, %v936_v60 }
  0xde   : > { %v974_v49 = vadd.f32 %v973_v20, %v438_v28 }
  0xdf   : > { %v1010_v40 = vadd.f32 %v1009_v18, %v991_v36  ;;  %v1075_v13 = vmul.f32 %v2176_v1, %v2176_v1 }
  0xe4   : > { %v992_v22 = vpop.f32.mrf.mxu2  ;;  %v957_v24 = vpop.f32.mrf.mxu0 }
  0xe5   : > { %v1011_v23 = vpop.f32.mrf.mxu3  ;;  %v976_v25 = vpop.f32.mrf.mxu1  ;;  %v993_v48 = vadd.f32 %v992_v22, %v974_v49  ;;  %v2184_v17 = vadd.f32 %v957_v24, %v939_v8 }
  0xe6   : > { %v977_v53 = vadd.f32 %v976_v25, %v443_v26 }
  0xe7   : > { %v1012_v3 = vadd.f32 %v1011_v23, %v993_v48  ;;  %v1077_v23 = vmul.f32 %v2184_v17, %v2184_v17 }
  0xec   : > { %v995_v29 = vpop.f32.mrf.mxu2  ;;  %v959_v31 = vpop.f32.mrf.mxu0 }
  0xed   : > { %v1014_v30 = vpop.f32.mrf.mxu3  ;;  %v978_v33 = vpop.f32.mrf.mxu1  ;;  %v996_v63 = vadd.f32 %v995_v29, %v977_v53  ;;  %v2198_v29 = vadd.f32 %v959_v31, %v941_v14 }
  0xee   : > { %v979_v44 = vadd.f32 %v978_v33, %v448_v47 }
  0xef   : > { %v1015_v51 = vadd.f32 %v1014_v30, %v996_v63  ;;  %v1079_v38 = vmul.f32 %v2198_v29, %v2198_v29 }
  0xf4   : > { %v997_v41 = vpop.f32.mrf.mxu2  ;;  %v1028_v45 = vpop.f32.mrf.mxu0 }
  0xf5   : > { %v1016_v43 = vpop.f32.mrf.mxu3  ;;  %v1029_v52 = vadd.f32 %v1028_v45, %v1010_v40  ;;  %v1047_v55 = vpop.f32.mrf.mxu1  ;;  %v998_v15 = vadd.f32 %v997_v41, %v979_v44  ;;  %v1878_v41 = vmov 8192.0  }
  0xf6   : > { %1833 = vrcp.f32 %v1878_v41 }
  0xf7   : > { %v2172_v54 = vadd.f32 %v1047_v55, %v1029_v52  ;;  %v1017_v22 = vadd.f32 %v1016_v43, %v998_v15 }
  0xf9   : > { %v1074_v0 = vmul.f32 %v2172_v54, %v2172_v54  ;;  %v1057_v4 = vadd.f32 %v2172_v54, %v2170_v59 }
  0xfb   : > { %v1081_v9 = vadd.f32 %v1074_v0, %v1073_v2  ;;  %v1058_v57 = vadd.f32 %v1057_v4, %v2176_v1 }
  0xfc   : > { %v1033_v5 = vpop.f32.mrf.mxu2  ;;  %v1030_v50 = vpop.f32.mrf.mxu0 }
  0xfd   : > { %v1052_v7 = vpop.f32.mrf.mxu3  ;;  %v1031_v10 = vadd.f32 %v1030_v50, %v1012_v3  ;;  %v1049_v16 = vpop.f32.mrf.mxu1  ;;  %v1034_v18 = vadd.f32 %v1033_v5, %v1015_v51  ;;  %v1082_v21 = vadd.f32 %v1081_v9, %v1075_v13 }
  0xfe   : > { %v1834_v42 = vpop.eup %1833 }
  0xff   : > { %v2186_v19 = vadd.f32 %v1049_v16, %v1031_v10  ;;  %v2195_v25 = vadd.f32 %v1052_v7, %v1034_v18  ;;  %v1098_v47 = vmul.f32 8192.0, %v1834_v42  ;;  %vm1102_vm1 = vweird.f32 %v1834_v42 }
 0x101   : > { %v1059_v20 = vadd.f32 %v1058_v57, %v2186_v19  ;;  %v1076_v12 = vmul.f32 %v2186_v19, %v2186_v19  ;;  %v1078_v58 = vmul.f32 %v2195_v25, %v2195_v25  ;;  %v1099_v55 = vsub.f32 1.0, %v1098_v47 }
 0x103   : > { %v1083_v24 = vadd.f32 %v1082_v21, %v1076_v12  ;;  %v1060_v27 = vadd.f32 %v1059_v20, %v2184_v17  ;;  %v1100_v62 = vmul.f32 %v1834_v42, %v1099_v55  ;;  %v1148_v20 = vld [vmem:[%s2217_s10] sm:$0xff]  ;;  %v1170_v55 = vld [vmem:[%s2225_s14 + $0x30] sm:$0xff] }
 0x104   : > { %v1035_v26 = vpop.f32.mrf.mxu2 }
 0x105   : > { %v1036_v28 = vadd.f32 %v1035_v26, %v1017_v22  ;;  %v1061_v30 = vadd.f32 %v1060_v27, %v2195_v25  ;;  %v1084_v32 = vadd.f32 %v1083_v24, %v1077_v23  ;;  %v1054_v33 = vpop.f32.mrf.mxu3  ;;  %v1101_v2 = vadd.f32 %v1834_v42, %v1100_v62  ;;  %v1152_v26 = vld [vmem:[%s2217_s10 + $0x20] sm:$0xff]  ;;  %v1154_v27 = vld [vmem:[%s2217_s10 + $0x30] sm:$0xff] }
 0x107   : > { %v2203_v34 = vadd.f32 %v1054_v33, %v1036_v28  ;;  %v1062_v35 = vadd.f32 %v1061_v30, %v2198_v29  ;;  %v1085_v37 = vadd.f32 %v1084_v32, %v1078_v58  ;;  %v1103_v5 = vsel %vm1102_vm1, %v1834_v42, %v1101_v2  ;;  %v1164_v33 = vld [vmem:[%s2225_s14] sm:$0xff]  ;;  %v1165_v58 = vld [vmem:[%s2225_s14 + $0x8] sm:$0xff] }
 0x108   : > { %v1168_v42 = vld [vmem:[%s2225_s14 + $0x20] sm:$0xff] }
 0x109   : > { %v1063_v36 = vadd.f32 %v1062_v35, %v2203_v34  ;;  %v1086_v31 = vadd.f32 %v1085_v37, %v1079_v38  ;;  %v1080_v39 = vmul.f32 %v2203_v34, %v2203_v34  ;;  %v1155_v35 = vld [vmem:[%s2217_s10 + $0x38] sm:$0xff] }
 0x10b   : > { %1064 = vadd.xlane.f32.xlu2 %v1063_v36  ;;  %v1087_v40 = vadd.f32 %v1086_v31, %v1080_v39  ;;  %v1167_v39 = vld [vmem:[%s2225_s14 + $0x18] sm:$0xff] }
 0x113   : > { %1088 = vadd.xlane.f32.xlu2 %v1087_v40 }
 0x17e   : > { %v1065_v43 = vpop.xlane.xlu2 %1064 }
 0x17f   : > { %v1066_v45 = vrot.slane %v1065_v43, 4 }
 0x181   : > { %v1067_v46 = vadd.f32 %v1066_v45, %v1065_v43  ;;  %v1169_v45 = vld [vmem:[%s2225_s14 + $0x28] sm:$0xff] }
 0x183   : > { %v1068_v49 = vrot.slane %v1067_v46, 2 }
 0x185   : > { %v1069_v52 = vadd.f32 %v1068_v49, %v1067_v46 }
 0x186   : > { %v1089_v56 = vpop.xlane.xlu2 %1088 }
 0x187   : > { %v1090_v48 = vrot.slane %v1089_v56, 4  ;;  %v1070_v53 = vrot.slane %v1069_v52, 1 }
 0x189   : > { %v1091_v60 = vadd.f32 %v1090_v48, %v1089_v56  ;;  %v1071_v61 = vadd.f32 %v1070_v53, %v1069_v52  ;;  %v1171_v48 = vld [vmem:[%s2225_s14 + $0x38] sm:$0xff] }
 0x18b   : > { %v1092_v63 = vrot.slane %v1091_v60, 2  ;;  %1781 = vpush %v1071_v61 }
 0x18d   : > { %v1093_v0 = vadd.f32 %v1092_v63, %v1091_v60 }
 0x18f   : > { %v1094_v3 = vrot.slane %v1093_v0, 1 }
 0x191   : > { %v1095_v4 = vadd.f32 %v1094_v3, %v1093_v0 }
 0x193   : > { %1783 = vpush %v1095_v4 }
 0x194   : > { %1785 = vpush %v1103_v5 }
 0x1bc   : > { %s1782_s15 = spop %1781 }
 0x1c4   : > { %s1784_s16 = spop %1783 }
 0x1c5   : > { %s1786_s17 = spop %1785 }
 0x1c6   : > { %s1105_s25 = smul.f32 %s1786_s17, %s1782_s15 }
 0x1c7   : > { %s1114_s26 = smul.f32 %s1786_s17, %s1784_s16  ;;  %s340_s17 = scalar_lea.vmem %s2274_s5, %s1346_s19 }
 0x1c8   : > { %s1115_s27 = smul.f32 %s1105_s25, %s1105_s25  ;;  %v1117_v11 = vstv %s1105_s25 }
 0x1c9   : > { %v1118_v13 = vsub.f32 %v2170_v59, %v1117_v11  ;;  %v1119_v15 = vsub.f32 %v2172_v54, %v1117_v11  ;;  %v1120_v16 = vsub.f32 %v2176_v1, %v1117_v11  ;;  %v1121_v18 = vsub.f32 %v2186_v19, %v1117_v11  ;;  %v1149_v54 = vld [vmem:[%s2217_s10 + $0x8] sm:$0xff]  ;;  %v1150_v1 = vld [vmem:[%s2217_s10 + $0x10] sm:$0xff]  ;;  %v1151_v19 = vld [vmem:[%s2217_s10 + $0x18] sm:$0xff] }
 0x1ca   : > { %s1116_s28 = ssub.f32 %s1114_s26, %s1115_s27  ;;  %v1122_v57 = vsub.f32 %v2184_v17, %v1117_v11  ;;  %v1123_v59 = vsub.f32 %v2195_v25, %v1117_v11  ;;  %v1124_v12 = vsub.f32 %v2198_v29, %v1117_v11  ;;  %v1125_v21 = vsub.f32 %v2203_v34, %v1117_v11  ;;  %v1153_v25 = vld [vmem:[%s2217_s10 + $0x28] sm:$0xff]  ;;  %v1166_v34 = vld [vmem:[%s2225_s14 + $0x10] sm:$0xff] }
 0x1cc   : > { %s1126_s29 = sadd.f32 1e-05, %s1116_s28 }
 0x1ce   : > { %v1127_v6 = vstv %s1126_s29 }
 0x1cf   : > { %1835 = vrsqrt.f32 %v1127_v6  ;;  %vm1134_vm3 = vweird.f32 %v1127_v6 }
 0x1d5   : > { %v1836_v44 = vpop.eup %1835 }
 0x1d6   : > { %v1129_v7 = vmul.f32 %v1836_v44, %v1127_v6  ;;  %vm1135_vm2 = vweird.f32 %v1836_v44 }
 0x1d7   : > { %vm1136_vm4 = vmor %vm1134_vm3, %vm1135_vm2 }
 0x1d8   : > { %v1130_v50 = vmul.f32 %v1836_v44, %v1129_v7 }
 0x1da   : > { %v1131_v8 = vmul.f32 0.5, %v1130_v50 }
 0x1dc   : > { %v1132_v51 = vsub.f32 1.5, %v1131_v8 }
 0x1de   : > { %v1133_v9 = vmul.f32 %v1836_v44, %v1132_v51 }
 0x1e0   : > { %v1137_v10 = vsel %vm1136_vm4, %v1836_v44, %v1133_v9 }
 0x1e1   : > { %1787 = vpush %v1137_v10 }
 0x212   : > { %s1788_s18 = spop %1787 }
 0x213   : > { %v1139_v14 = vstv %s1788_s18 }
 0x214   : > { %v1140_v17 = vmul.f32 %v1139_v14, %v1118_v13  ;;  %v1141_v22 = vmul.f32 %v1139_v14, %v1119_v15  ;;  %v1142_v23 = vmul.f32 %v1139_v14, %v1120_v16  ;;  %v1143_v24 = vmul.f32 %v1139_v14, %v1121_v18 }
 0x215   : > { %v1144_v28 = vmul.f32 %v1139_v14, %v1122_v57  ;;  %v1145_v29 = vmul.f32 %v1139_v14, %v1123_v59  ;;  %v1146_v30 = vmul.f32 %v1139_v14, %v1124_v12  ;;  %v1147_v32 = vmul.f32 %v1139_v14, %v1125_v21 }
 0x216   : > { %v1156_v36 = vmul.f32 %v1148_v20, %v1140_v17  ;;  %v1157_v37 = vmul.f32 %v1149_v54, %v1141_v22  ;;  %v1158_v38 = vmul.f32 %v1150_v1, %v1142_v23  ;;  %v1159_v31 = vmul.f32 %v1151_v19, %v1143_v24 }
 0x217   : > { %v1160_v40 = vmul.f32 %v1152_v26, %v1144_v28  ;;  %v1161_v41 = vmul.f32 %v1153_v25, %v1145_v29  ;;  %v1162_v43 = vmul.f32 %v1154_v27, %v1146_v30  ;;  %v1163_v52 = vmul.f32 %v1155_v35, %v1147_v32 }
 0x218   : > { %v1172_v46 = vadd.f32 %v1164_v33, %v1156_v36  ;;  %v1173_v47 = vadd.f32 %v1165_v58, %v1157_v37  ;;  %v1174_v49 = vadd.f32 %v1166_v34, %v1158_v38  ;;  %v1175_v56 = vadd.f32 %v1167_v39, %v1159_v31 }
 0x219   : > { %v1176_v53 = vadd.f32 %v1168_v42, %v1160_v40  ;;  %v1177_v60 = vadd.f32 %v1169_v45, %v1161_v41  ;;  %v1178_v61 = vadd.f32 %v1170_v55, %v1162_v43  ;;  %v1179_v62 = vadd.f32 %v1171_v48, %v1163_v52 }
 0x21a   : > { %1180 = vst [vmem:[%s340_s17] sm:$0xff] %v1172_v46 }
 0x21b   : > { %1181 = vst [vmem:[%s340_s17 + $0x8] sm:$0xff] %v1173_v47 }
 0x21c   : > { %1182 = vst [vmem:[%s340_s17 + $0x10] sm:$0xff] %v1174_v49 }
 0x21d   : > { %1183 = vst [vmem:[%s340_s17 + $0x18] sm:$0xff] %v1175_v56 }
 0x21e   : > { %1184 = vst [vmem:[%s340_s17 + $0x20] sm:$0xff] %v1176_v53 }
 0x21f   : > { %1185 = vst [vmem:[%s340_s17 + $0x28] sm:$0xff] %v1177_v60 }
 0x220   : > { %1186 = vst [vmem:[%s340_s17 + $0x30] sm:$0xff] %v1178_v61 }
 0x221   : > { %1187 = vst [vmem:[%s340_s17 + $0x38] sm:$0xff] %v1179_v62 }
 0x222 PF: > { %s15_s22 = sadd.s32 1, %s1875_s22   ;;  %s2275_s18 = smov %s1867_s20 }
 0x223   : > { %p12_p7 = scmp.ge.s32.totalorder %s15_s22, 6   ;;  %s2276_s19 = smov %s1871_s21 }
 0x224   : > { %s2277_s20 = smov %s2280_s23  ;;  %s2278_s21 = smov %s2284_s24 }
 0x225   :  { %14 = sbr.rel (!%p12_p7) target bundleno = 3 (0x3), region = 82 }

// kernel: strpm_forward.6
= control target key start
LH: loop header
LB: loop body
LE: loop exit
PB: predicated region body
PF: predicated region fallthrough
CT: control target
= control target key end

     0   :  { %s1157_s24 = smov 0   ;;  %s1583_s0 = inlined_call_operand.vmem [shape: f32[64,256], index: 0, kind: input, shape index: {}]   ;;  %s1584_s1 = inlined_call_operand.vmem [shape: f32[64,256], index: 1, kind: input, shape index: {}]   ;;  %s1585_s2 = inlined_call_operand.vmem [shape: f32[64,256], index: 2, kind: input, shape index: {}]   ;;  %s1586_s3 = inlined_call_operand.vmem [shape: f32[64,256], index: 3, kind: input, shape index: {}]   ;;  %s1587_s4 = inlined_call_operand.vmem [shape: f32[64,256], index: 4, kind: input, shape index: {}]   ;;  %s1588_s5 = inlined_call_operand.vmem [shape: f32[64,256], index: 5, kind: input, shape index: {}]   ;;  %s1589_s6 = inlined_call_operand.vmem [shape: f32[64,256], index: 6, kind: output, shape index: {0}]   ;;  %s1590_s7 = inlined_call_operand.vmem [shape: f32[64,256], index: 7, kind: output, shape index: {1}]  }
   0x1 LB: > { %s966_s25 = sadd.s32 4294967295, %s1115_s24   ;;  %p970_p0 = scmp.ge.s32.totalorder %s1115_s24, 1  ;;  %s1115_s24 = sphi %s1157_s24, %s18_s24  }
   0x2   : > { %p302_p1 = scmp.lt.s32.totalorder %s1115_s24, 5 }
   0x4   : > { %p303_p2 = pnand %p970_p0, %p302_p1 }
   0x5   : > { %s971_s26 = sshll.u32 (!%p303_p2), %s966_s25, 1 }
   0x6   : > { %306 = sbr.rel (%p303_p2) target bundleno = 117 (0x75), region = 44  ;;  %p373_p3 = scmp.lt.s32.totalorder (!%p303_p2), %s971_s26, 7 }
   0xb   : > { %s1642_s26 = smov (!%p373_p3, %s971_s26), 7 }
   0xc   : > { %s1165_s27 = sshll.u32 %s1642_s26, 4 }
   0xd   : > { %s1171_s30 = scalar_lea.vmem %s1583_s0, %s1165_s27  ;;  %s1177_s10 = scalar_lea.vmem %s1585_s2, %s1165_s27 }
   0xe   : > { %v428_v0 = vld [vmem:[%s1171_s30] sm:$0xff]  ;;  %v429_v2 = vld [vmem:[%s1171_s30 + $0x8] sm:$0xff]  ;;  %s1187_s13 = scalar_lea.vmem %s1584_s1, %s1165_s27  ;;  %s1193_s16 = scalar_lea.vmem %s1586_s3, %s1165_s27  ;;  %v430_v22 = vld [vmem:[%s1171_s30 + $0x10] sm:$0xff] }
   0xf   : > { %v432_v1 = vld [vmem:[%s1177_s10] sm:$0xff]  ;;  %v433_v4 = vld [vmem:[%s1177_s10 + $0x8] sm:$0xff]  ;;  %v434_v23 = vld [vmem:[%s1177_s10 + $0x10] sm:$0xff]  ;;  %s1296_s19 = scalar_lea.vmem %s1587_s4, %s1165_s27  ;;  %s1343_s22 = scalar_lea.vmem %s1588_s5, %s1165_s27 }
  0x10   : > { %v436_v3 = vadd.f32 %v432_v1, %v428_v0  ;;  %v437_v5 = vadd.f32 %v433_v4, %v429_v2  ;;  %v620_v6 = vld [vmem:[%s1187_s13] sm:$0xff]  ;;  %v621_v13 = vld [vmem:[%s1187_s13 + $0x8] sm:$0xff]  ;;  %v431_v25 = vld [vmem:[%s1171_s30 + $0x18] sm:$0xff]  ;;  %v1211_v32 = vadd.f32 %v434_v23, %v430_v22  ;;  %s1357_s26 = scalar_lea.vmem %s1589_s6, %s1165_s27  ;;  %s1392_s30 = scalar_lea.vmem %s1590_s7, %s1165_s27 }
  0x11   : > { %v624_v7 = vld [vmem:[%s1193_s16] sm:$0xff]  ;;  %v625_v14 = vld [vmem:[%s1193_s16 + $0x8] sm:$0xff]  ;;  %v435_v26 = vld [vmem:[%s1177_s10 + $0x18] sm:$0xff] }
  0x12   : > { %v995_v8 = vmul.f32 -1.442695, %v436_v3  ;;  %v524_v9 = vadd.f32 1.0, %v436_v3  ;;  %v628_v10 = vadd.f32 %v624_v7, %v620_v6  ;;  %v996_v11 = vmul.f32 -1.442695, %v437_v5 }
  0x13   : > { %v525_v12 = vadd.f32 1.0, %v437_v5  ;;  %v1199_v20 = vadd.f32 %v625_v14, %v621_v13  ;;  %v1214_v34 = vadd.f32 %v435_v26, %v431_v25  ;;  %v1230_v46 = vadd.f32 1.0, %v1211_v32 }
  0x14   : > { %1029 = vpow2.f32 %v995_v8  ;;  %v999_v15 = vmul.f32 -1.442695, %v524_v9  ;;  %v716_v16 = vadd.f32 1.0, %v628_v10  ;;  %v1003_v18 = vmul.f32 -1.442695, %v628_v10 }
  0x15   : > { %1031 = vpow2.f32 %v996_v11  ;;  %v1000_v17 = vmul.f32 -1.442695, %v525_v12  ;;  %v1004_v21 = vmul.f32 -1.442695, %v1199_v20  ;;  %v717_v31 = vadd.f32 1.0, %v1199_v20 }
  0x16   : > { %1033 = vpow2.f32 %v999_v15  ;;  %v1007_v19 = vmul.f32 -1.442695, %v716_v16 }
  0x17   : > { %1035 = vpow2.f32 %v1000_v17  ;;  %v1008_v45 = vmul.f32 -1.442695, %v717_v31 }
  0x18   : > { %1037 = vtanh.f32 %v436_v3 }
  0x19   : > { %1039 = vpow2.f32 %v1003_v18 }
  0x1a   : > { %v1030_v24 = vpop.eup %1029  ;;  %1041 = vpow2.f32 %v1007_v19 }
  0x1b   : > { %v1032_v27 = vpop.eup %1031  ;;  %v1206_v28 = vadd.f32 1.0, %v1030_v24  ;;  %1043 = vtanh.f32 %v437_v5 }
  0x1c   : > { %v1034_v29 = vpop.eup %1033  ;;  %v1208_v30 = vadd.f32 1.0, %v1032_v27  ;;  %1045 = vpow2.f32 %v1004_v21 }
  0x1d   : > { %v1036_v33 = vpop.eup %1035  ;;  %1047 = vrcp.f32 %v1206_v28  ;;  %v465_v36 = vand.u32 2147483647, %v1206_v28  ;;  %v467_v37 = vand.u32 2147483648, %v1206_v28  ;;  %v1220_v38 = vadd.f32 1.0, %v1034_v29 }
  0x1e   : > { %v1216_v35 = vpop.eup %1037  ;;  %1049 = vrcp.f32 %v1208_v30  ;;  %v480_v40 = vand.u32 2147483647, %v1208_v30  ;;  %v482_v41 = vand.u32 2147483648, %v1208_v30  ;;  %v1225_v42 = vadd.f32 1.0, %v1036_v33 }
  0x1f   : > { %v1040_v39 = vpop.eup %1039  ;;  %1051 = vtanh.f32 %v628_v10  ;;  %v555_v44 = vand.u32 2147483648, %v1220_v38  ;;  %vm461_vm0 = vweird.f32 %v1206_v28  ;;  %v553_v48 = vand.u32 2147483647, %v1220_v38 }
  0x20   : > { %v1042_v43 = vpop.eup %1041  ;;  %1053 = vrcp.f32 %v1220_v38  ;;  %vm476_vm1 = vweird.f32 %v1208_v30  ;;  %vm1238_vm2 = vcmp.eq.f32.partialorder %v465_v36, 8.507059e+37  ;;  %v468_v51 = vor.u32 1.1754944e-38, %v467_v37 }
  0x21   : > { %v1232_v47 = vpop.eup %1043  ;;  %1055 = vrcp.f32 %v1225_v42  ;;  %vm549_vm3 = vweird.f32 %v1220_v38  ;;  %v568_v52 = vand.u32 2147483647, %v1225_v42  ;;  %v570_v53 = vand.u32 2147483648, %v1225_v42 }
  0x22   : > { %v1046_v49 = vpop.eup %1045  ;;  %vm1245_vm4 = vcmp.eq.f32.partialorder %v480_v40, 8.507059e+37  ;;  %v483_v56 = vor.u32 1.1754944e-38, %v482_v41  ;;  %v1249_v57 = vadd.f32 1.0, %v1040_v39  ;;  %v1251_v58 = vadd.f32 1.0, %v1042_v43  ;;  %v604_v40 = vld [vmem:[%s1296_s19] sm:$0xff] }
  0x23   : > { %v1048_v54 = vpop.eup %1047  ;;  %v1254_v61 = vor.u32 1.1754944e-38, %v555_v44  ;;  %vm564_vm5 = vweird.f32 %v1225_v42  ;;  %1057 = vpow2.f32 %v1008_v45  ;;  %vm1259_vm7 = vcmp.eq.f32.partialorder %v553_v48, 8.507059e+37  ;;  %v605_v48 = vld [vmem:[%s1296_s19 + $0x8] sm:$0xff] }
  0x24   : > { %v1050_v59 = vpop.eup %1049  ;;  %v457_v60 = vmul.f32 %v1048_v54, %v1206_v28  ;;  %vm462_vm6 = vweird.f32 %v1048_v54  ;;  %1059 = vrcp.f32 %v1249_v57  ;;  %v1265_v1 = vadd.f32 1.0, %v1046_v49 }
  0x25   : > { %v1257_v62 = vpop.eup %1051  ;;  %v472_v0 = vmul.f32 %v1050_v59, %v1208_v30  ;;  %vm1267_vm8 = vcmp.eq.f32.partialorder %v568_v52, 8.507059e+37  ;;  %v571_v5 = vor.u32 1.1754944e-38, %v570_v53  ;;  %1061 = vrcp.f32 %v1251_v58  ;;  %vm1280_vm11 = vmor %vm461_vm0, %vm462_vm6 }
  0x26   : > { %v1054_v2 = vpop.eup %1053  ;;  %v458_v3 = vsub.f32 1.0, %v457_v60  ;;  %vm477_vm9 = vweird.f32 %v1050_v59  ;;  %v659_v9 = vand.u32 2147483648, %v1249_v57  ;;  %vm653_vm10 = vweird.f32 %v1249_v57 }
  0x27   : > { %v1056_v6 = vpop.eup %1055  ;;  %v545_v7 = vmul.f32 %v1054_v2, %v1220_v38  ;;  %v473_v8 = vsub.f32 1.0, %v472_v0  ;;  %v657_v12 = vand.u32 2147483647, %v1249_v57  ;;  %vm550_vm12 = vweird.f32 %v1054_v2  ;;  %vm1287_vm14 = vmor %vm476_vm1, %vm477_vm9 }
  0x28   : > { %v459_v10 = vmul.f32 %v1048_v54, %v458_v3  ;;  %v560_v11 = vmul.f32 %v1056_v6, %v1225_v42  ;;  %vm741_vm13 = vweird.f32 %v1251_v58  ;;  %vm565_vm15 = vweird.f32 %v1056_v6  ;;  %vm1304_vm0 = vmor %vm549_vm3, %vm550_vm12 }
  0x29   : > { %v546_v14 = vsub.f32 1.0, %v545_v7  ;;  %v474_v15 = vmul.f32 %v1050_v59, %v473_v8  ;;  %v1058_v16 = vpop.eup %1057  ;;  %1063 = vrcp.f32 %v1265_v1  ;;  %v660_v24 = vor.u32 1.1754944e-38, %v659_v9  ;;  %vm1317_vm1 = vmor %vm564_vm5, %vm565_vm15 }
  0x2a   : > { %v460_v17 = vadd.f32 %v1048_v54, %v459_v10  ;;  %v561_v19 = vsub.f32 1.0, %v560_v11  ;;  %v1060_v21 = vpop.eup %1059  ;;  %v745_v25 = vand.u32 2147483647, %v1251_v58  ;;  %v747_v31 = vand.u32 2147483648, %v1251_v58 }
  0x2b   : > { %v547_v22 = vmul.f32 %v1054_v2, %v546_v14  ;;  %v475_v23 = vadd.f32 %v1050_v59, %v474_v15  ;;  %v1062_v26 = vpop.eup %1061  ;;  %v649_v30 = vmul.f32 %v1060_v21, %v1249_v57  ;;  %vm658_vm5 = vcmp.eq.f32.partialorder %v657_v12, 8.507059e+37 }
  0x2c   : > { %v464_v27 = vsel %vm1280_vm11, %v1048_v54, %v460_v17  ;;  %v562_v29 = vmul.f32 %v1056_v6, %v561_v19  ;;  %v737_v39 = vmul.f32 %v1062_v26, %v1251_v58  ;;  %vm742_vm3 = vweird.f32 %v1062_v26  ;;  %v796_v58 = vld [vmem:[%s1343_s22] sm:$0xff] }
  0x2d   : > { %v469_v33 = vsel %vm1238_vm2, %v468_v51, %v464_v27  ;;  %v548_v36 = vadd.f32 %v1054_v2, %v547_v22  ;;  %v479_v37 = vsel %vm1287_vm14, %v1050_v59, %v475_v23  ;;  %v650_v44 = vsub.f32 1.0, %v649_v30  ;;  %vm1362_vm6 = vmor %vm741_vm13, %vm742_vm3 }
  0x2e   : > { %v484_v41 = vsel %vm1245_vm4, %v483_v56, %v479_v37  ;;  %v563_v43 = vadd.f32 %v1056_v6, %v562_v29  ;;  %vm654_vm2 = vweird.f32 %v1060_v21  ;;  %v520_v45 = vmul.f32 %v1216_v35, %v469_v33 }
  0x2f   : > { %v552_v42 = vsel %vm1304_vm0, %v1054_v2, %v548_v36  ;;  %v738_v49 = vsub.f32 1.0, %v737_v39  ;;  %v1329_v50 = vpop.eup %1063  ;;  %v521_v52 = vmul.f32 %v1232_v47, %v484_v41  ;;  %v651_v54 = vmul.f32 %v1060_v21, %v650_v44  ;;  %vm1347_vm4 = vmor %vm653_vm10, %vm654_vm2 }
  0x30   : > { %v557_v51 = vsel %vm1259_vm7, %v1254_v61, %v552_v42  ;;  %v567_v53 = vsel %vm1317_vm1, %v1056_v6, %v563_v43  ;;  %v664_v59 = vmul.f32 %v1329_v50, %v1265_v1  ;;  %v748_v63 = vor.u32 1.1754944e-38, %v747_v31  ;;  %v626_v6 = vld [vmem:[%s1193_s16 + $0x10] sm:$0xff] }
  0x31   : > { %v608_v35 = vmul.f32 %v604_v40, %v557_v51  ;;  %v572_v55 = vsel %vm1267_vm8, %v571_v5, %v567_v53  ;;  %v739_v47 = vmul.f32 %v1062_v26, %v738_v49  ;;  %v652_v61 = vadd.f32 %v1060_v21, %v651_v54  ;;  %v622_v5 = vld [vmem:[%s1187_s13 + $0x10] sm:$0xff] }
  0x32   : > { %v609_v60 = vmul.f32 %v605_v48, %v572_v55  ;;  %vm1366_vm7 = vcmp.eq.f32.partialorder %v745_v25, 8.507059e+37  ;;  %v665_v4 = vsub.f32 1.0, %v664_v59  ;;  %v733_v9 = vadd.f32 1.0, %v1058_v16  ;;  %v623_v25 = vld [vmem:[%s1187_s13 + $0x18] sm:$0xff]  ;;  %v797_v59 = vld [vmem:[%s1343_s22 + $0x8] sm:$0xff] }
  0x33   : > { %v612_v0 = vadd.f32 %v608_v35, %v520_v45  ;;  %v740_v2 = vadd.f32 %v1062_v26, %v739_v47  ;;  %v656_v8 = vsel %vm1347_vm4, %v1060_v21, %v652_v61  ;;  %v997_v10 = vmul.f32 -1.442695, %v1211_v32 }
  0x34   : > { %v613_v7 = vadd.f32 %v609_v60, %v521_v52  ;;  %v661_v11 = vsel %vm658_vm5, %v660_v24, %v656_v8  ;;  %v666_v13 = vmul.f32 %v1329_v50, %v665_v4  ;;  %v527_v14 = vadd.f32 1.0, %v1214_v34 }
  0x35   : > { %616 = vst [vmem:[%s1357_s26] sm:$0xff] %v612_v0  ;;  %v744_v12 = vsel %vm1362_vm6, %v1062_v26, %v740_v2  ;;  %v712_v15 = vmul.f32 %v1257_v62, %v661_v11  ;;  %1065 = vrcp.f32 %v733_v9  ;;  %v630_v17 = vadd.f32 %v626_v6, %v622_v5  ;;  %v627_v26 = vld [vmem:[%s1193_s16 + $0x18] sm:$0xff] }
  0x36   : > { %617 = vst [vmem:[%s1357_s26 + $0x8] sm:$0xff] %v613_v7  ;;  %v749_v16 = vsel %vm1366_vm7, %v748_v63, %v744_v12  ;;  %vm668_vm8 = vweird.f32 %v1265_v1  ;;  %vm669_vm9 = vweird.f32 %v1329_v50  ;;  %v1001_v19 = vmul.f32 -1.442695, %v1230_v46 }
  0x37   : > { %v800_v18 = vmul.f32 %v796_v58, %v749_v16  ;;  %v672_v62 = vand.u32 2147483647, %v1265_v1  ;;  %v674_v21 = vand.u32 2147483648, %v1265_v1  ;;  %1067 = vpow2.f32 %v997_v10  ;;  %vm1400_vm10 = vmor %vm668_vm8, %vm669_vm9 }
  0x38   : > { %v998_v22 = vmul.f32 -1.442695, %v1214_v34  ;;  %v667_v24 = vadd.f32 %v1329_v50, %v666_v13  ;;  %1069 = vtanh.f32 %v1199_v20  ;;  %v1002_v27 = vmul.f32 -1.442695, %v527_v14 }
  0x39   : > { %v804_v23 = vadd.f32 %v800_v18, %v712_v15  ;;  %v718_v28 = vadd.f32 1.0, %v630_v17  ;;  %1071 = vpow2.f32 %v1001_v19  ;;  %v1005_v29 = vmul.f32 -1.442695, %v630_v17 }
  0x3a   : > { %vm1406_vm11 = vcmp.eq.f32.partialorder %v672_v62, 8.507059e+37  ;;  %v675_v31 = vor.u32 1.1754944e-38, %v674_v21  ;;  %1073 = vpow2.f32 %v998_v22  ;;  %v1410_v33 = vadd.f32 %v627_v26, %v623_v25 }
  0x3b   : > { %808 = vst [vmem:[%s1392_s30] sm:$0xff] %v804_v23  ;;  %v1066_v1 = vpop.eup %1065  ;;  %v671_v36 = vsel %vm1400_vm10, %v1329_v50, %v667_v24  ;;  %v760_v20 = vand.u32 2147483647, %v733_v9  ;;  %1075 = vtanh.f32 %v1211_v32  ;;  %vm756_vm12 = vweird.f32 %v733_v9 }
  0x3c   : > { %v752_v37 = vmul.f32 %v1066_v1, %v733_v9  ;;  %v762_v39 = vand.u32 2147483648, %v733_v9  ;;  %1077 = vpow2.f32 %v1002_v27  ;;  %v1009_v40 = vmul.f32 -1.442695, %v718_v28 }
  0x3d   : > { %v1068_v38 = vpop.eup %1067  ;;  %vm757_vm13 = vweird.f32 %v1066_v1  ;;  %1079 = vpow2.f32 %v1005_v29  ;;  %v676_v45 = vsel %vm1406_vm11, %v675_v31, %v671_v36  ;;  %v719_v42 = vadd.f32 1.0, %v1410_v33 }
  0x3e   : > { %v753_v41 = vsub.f32 1.0, %v752_v37  ;;  %v1416_v43 = vadd.f32 1.0, %v1068_v38  ;;  %v1070_v44 = vpop.eup %1069  ;;  %1081 = vtanh.f32 %v1214_v34  ;;  %vm1422_vm14 = vcmp.eq.f32.partialorder %v760_v20, 8.507059e+37  ;;  %vm1428_vm15 = vmor %vm756_vm12, %vm757_vm13 }
  0x3f   : > { %v1072_v48 = vpop.eup %1071  ;;  %v763_v52 = vor.u32 1.1754944e-38, %v762_v39  ;;  %v1006_v34 = vmul.f32 -1.442695, %v1410_v33  ;;  %v713_v35 = vmul.f32 %v1070_v44, %v676_v45  ;;  %v1443_v57 = vmul.f32 -1.442695, %v719_v42 }
  0x40   : > { %v754_v32 = vmul.f32 %v1066_v1, %v753_v41  ;;  %1083 = vrcp.f32 %v1416_v43  ;;  %v1074_v50 = vpop.eup %1073  ;;  %v1432_v53 = vadd.f32 1.0, %v1072_v48  ;;  %v495_v60 = vand.u32 2147483647, %v1416_v43 }
  0x41   : > { %1085 = vtanh.f32 %v630_v17  ;;  %v1435_v54 = vpop.eup %1075  ;;  %v1437_v56 = vadd.f32 1.0, %v1074_v50  ;;  %v497_v61 = vand.u32 2147483648, %v1416_v43  ;;  %vm491_vm0 = vweird.f32 %v1416_v43 }
  0x42   : > { %v755_v55 = vadd.f32 %v1066_v1, %v754_v32  ;;  %1087 = vpow2.f32 %v1009_v40  ;;  %v1078_v47 = vpop.eup %1077  ;;  %v583_v2 = vand.u32 2147483647, %v1432_v53  ;;  %v585_v5 = vand.u32 2147483648, %v1432_v53 }
  0x43   : > { %1089 = vrcp.f32 %v1432_v53  ;;  %v1080_v63 = vpop.eup %1079  ;;  %v510_v6 = vand.u32 2147483647, %v1437_v56  ;;  %v512_v58 = vand.u32 2147483648, %v1437_v56  ;;  %v1457_v9 = vadd.f32 1.0, %v1078_v47 }
  0x44   : > { %v759_v0 = vsel %vm1428_vm15, %v1066_v1, %v755_v55  ;;  %1091 = vrcp.f32 %v1437_v56  ;;  %v1450_v3 = vpop.eup %1081  ;;  %v1459_v10 = vadd.f32 1.0, %v1080_v63  ;;  %vm1464_vm1 = vcmp.eq.f32.partialorder %v495_v60, 8.507059e+37 }
  0x45   : > { %v764_v4 = vsel %vm1422_vm14, %v763_v52, %v759_v0  ;;  %1093 = vpow2.f32 %v1006_v34  ;;  %v498_v14 = vor.u32 1.1754944e-38, %v497_v61  ;;  %vm579_vm2 = vweird.f32 %v1432_v53 }
  0x46   : > { %v1084_v7 = vpop.eup %1083  ;;  %v801_v8 = vmul.f32 %v797_v59, %v764_v4  ;;  %vm1469_vm3 = vcmp.eq.f32.partialorder %v583_v2, 8.507059e+37  ;;  %vm506_vm4 = vweird.f32 %v1437_v56  ;;  %1095 = vrcp.f32 %v1457_v9 }
  0x47   : > { %v1461_v11 = vpop.eup %1085  ;;  %v487_v12 = vmul.f32 %v1084_v7, %v1416_v43  ;;  %vm492_vm5 = vweird.f32 %v1084_v7  ;;  %v598_v62 = vand.u32 2147483647, %v1457_v9  ;;  %1097 = vrcp.f32 %v1459_v10 }
  0x48   : > { %v1088_v15 = vpop.eup %1087  ;;  %v805_v16 = vadd.f32 %v801_v8, %v713_v35  ;;  %v586_v23 = vor.u32 1.1754944e-38, %v585_v5  ;;  %vm1479_vm6 = vcmp.eq.f32.partialorder %v510_v6, 8.507059e+37  ;;  %v513_v25 = vor.u32 1.1754944e-38, %v512_v58  ;;  %vm1488_vm8 = vmor %vm491_vm0, %vm492_vm5 }
  0x49   : > { %v1090_v18 = vpop.eup %1089  ;;  %v488_v19 = vsub.f32 1.0, %v487_v12  ;;  %vm594_vm7 = vweird.f32 %v1457_v9  ;;  %v600_v28 = vand.u32 2147483648, %v1457_v9  ;;  %vm683_vm10 = vweird.f32 %v1459_v10 }
  0x4a   : > { %v1092_v21 = vpop.eup %1091  ;;  %809 = vst [vmem:[%s1392_s30 + $0x8] sm:$0xff] %v805_v16  ;;  %v575_v22 = vmul.f32 %v1090_v18, %v1432_v53  ;;  %vm580_vm9 = vweird.f32 %v1090_v18  ;;  %v1493_v30 = vadd.f32 1.0, %v1088_v15  ;;  %vm1495_vm12 = vcmp.eq.f32.partialorder %v598_v62, 8.507059e+37  ;;  %v606_v53 = vld [vmem:[%s1296_s19 + $0x10] sm:$0xff] }
  0x4b   : > { %v1094_v26 = vpop.eup %1093  ;;  %v489_v46 = vmul.f32 %v1084_v7, %v488_v19  ;;  %v502_v27 = vmul.f32 %v1092_v21, %v1437_v56  ;;  %vm507_vm11 = vweird.f32 %v1092_v21  ;;  %v687_v39 = vand.u32 2147483647, %v1459_v10  ;;  %vm1507_vm13 = vmor %vm579_vm2, %vm580_vm9 }
  0x4c   : > { %v576_v1 = vsub.f32 1.0, %v575_v22  ;;  %v1096_v20 = vpop.eup %1095  ;;  %1099 = vrcp.f32 %v1493_v30  ;;  %v1501_v40 = vadd.f32 1.0, %v1094_v26  ;;  %v601_v48 = vor.u32 1.1754944e-38, %v600_v28  ;;  %vm1517_vm14 = vmor %vm506_vm4, %vm507_vm11  ;;  %v798_v26 = vld [vmem:[%s1343_s22 + $0x10] sm:$0xff] }
  0x4d   : > { %v490_v31 = vadd.f32 %v1084_v7, %v489_v46  ;;  %v503_v36 = vsub.f32 1.0, %v502_v27  ;;  %v1098_v41 = vpop.eup %1097  ;;  %v590_v42 = vmul.f32 %v1096_v20, %v1457_v9  ;;  %v689_v52 = vand.u32 2147483648, %v1459_v10 }
  0x4e   : > { %v577_v38 = vmul.f32 %v1090_v18, %v576_v1  ;;  %v679_v51 = vmul.f32 %v1098_v41, %v1459_v10  ;;  %vm595_vm15 = vweird.f32 %v1096_v20  ;;  %vm684_vm0 = vweird.f32 %v1098_v41 }
  0x4f   : > { %v494_v43 = vsel %vm1488_vm8, %v1084_v7, %v490_v31  ;;  %v504_v45 = vmul.f32 %v1092_v21, %v503_v36  ;;  %v591_v35 = vsub.f32 1.0, %v590_v42  ;;  %1101 = vrcp.f32 %v1501_v40  ;;  %vm1540_vm2 = vmor %vm594_vm7, %vm595_vm15 }
  0x50   : > { %v499_v32 = vsel %vm1464_vm1, %v498_v14, %v494_v43  ;;  %v578_v49 = vadd.f32 %v1090_v18, %v577_v38  ;;  %v680_v59 = vsub.f32 1.0, %v679_v51  ;;  %vm1532_vm1 = vcmp.eq.f32.partialorder %v687_v39, 8.507059e+37  ;;  %v607_v14 = vld [vmem:[%s1296_s19 + $0x18] sm:$0xff] }
  0x51   : > { %v505_v34 = vadd.f32 %v1092_v21, %v504_v45  ;;  %v522_v55 = vmul.f32 %v1435_v54, %v499_v32  ;;  %v592_v61 = vmul.f32 %v1096_v20, %v591_v35  ;;  %v690_v6 = vor.u32 1.1754944e-38, %v689_v52  ;;  %v799_v52 = vld [vmem:[%s1343_s22 + $0x18] sm:$0xff] }
  0x52   : > { %v582_v47 = vsel %vm1507_vm13, %v1090_v18, %v578_v49  ;;  %v1100_v0 = vpop.eup %1099  ;;  %v681_v5 = vmul.f32 %v1098_v41, %v680_v59  ;;  %vm771_vm4 = vweird.f32 %v1493_v30  ;;  %v775_v9 = vand.u32 2147483647, %v1493_v30 }
  0x53   : > { %v587_v56 = vsel %vm1469_vm3, %v586_v23, %v582_v47  ;;  %v509_v60 = vsel %vm1517_vm14, %v1092_v21, %v505_v34  ;;  %v593_v7 = vadd.f32 %v1096_v20, %v592_v61  ;;  %vm1547_vm3 = vmor %vm683_vm10, %vm684_vm0  ;;  %v767_v58 = vmul.f32 %v1100_v0, %v1493_v30 }
  0x54   : > { %v610_v54 = vmul.f32 %v606_v53, %v587_v56  ;;  %v514_v2 = vsel %vm1479_vm6, %v513_v25, %v509_v60  ;;  %v682_v15 = vadd.f32 %v1098_v41, %v681_v5  ;;  %v777_v16 = vand.u32 2147483648, %v1493_v30 }
  0x55   : > { %v523_v13 = vmul.f32 %v1450_v3, %v514_v2  ;;  %v597_v10 = vsel %vm1540_vm2, %v1096_v20, %v593_v7  ;;  %v768_v17 = vsub.f32 1.0, %v767_v58  ;;  %vm772_vm5 = vweird.f32 %v1100_v0  ;;  %v1102_v18 = vpop.eup %1101 }
  0x56   : > { %v614_v12 = vadd.f32 %v610_v54, %v522_v55  ;;  %1103 = vpow2.f32 %v1443_v57  ;;  %v602_v19 = vsel %vm1495_vm12, %v601_v48, %v597_v10  ;;  %v686_v3 = vsel %vm1547_vm3, %v1098_v41, %v682_v15  ;;  %vm773_vm6 = vmor %vm771_vm4, %vm772_vm5 }
  0x57   : > { %v611_v62 = vmul.f32 %v607_v14, %v602_v19  ;;  %v769_v21 = vmul.f32 %v1100_v0, %v768_v17  ;;  %v694_v22 = vmul.f32 %v1102_v18, %v1501_v40  ;;  %v691_v23 = vsel %vm1532_vm1, %v690_v6, %v686_v3 }
  0x58   : > { %618 = vst [vmem:[%s1357_s26 + $0x10] sm:$0xff] %v614_v12  ;;  %v778_v57 = vor.u32 1.1754944e-38, %v777_v16  ;;  %vm776_vm7 = vcmp.eq.f32.partialorder %v775_v9, 8.507059e+37  ;;  %v714_v27 = vmul.f32 %v1461_v11, %v691_v23  ;;  %vm698_vm8 = vweird.f32 %v1501_v40 }
  0x59   : > { %v615_v24 = vadd.f32 %v611_v62, %v523_v13  ;;  %v770_v25 = vadd.f32 %v1100_v0, %v769_v21  ;;  %v695_v29 = vsub.f32 1.0, %v694_v22  ;;  %vm699_vm9 = vweird.f32 %v1102_v18 }
  0x5a   : > { %v702_v30 = vand.u32 2147483647, %v1501_v40  ;;  %v704_v38 = vand.u32 2147483648, %v1501_v40  ;;  %vm700_vm10 = vmor %vm698_vm8, %vm699_vm9 }
  0x5b   : > { %619 = vst [vmem:[%s1357_s26 + $0x18] sm:$0xff] %v615_v24  ;;  %v774_v28 = vsel %vm773_vm6, %v1100_v0, %v770_v25  ;;  %v696_v20 = vmul.f32 %v1102_v18, %v695_v29 }
  0x5c   : > { %v1104_v46 = vpop.eup %1103  ;;  %v779_v1 = vsel %vm776_vm7, %v778_v57, %v774_v28  ;;  %vm703_vm11 = vcmp.eq.f32.partialorder %v702_v30, 8.507059e+37  ;;  %v705_v43 = vor.u32 1.1754944e-38, %v704_v38 }
  0x5d   : > { %v735_v31 = vadd.f32 1.0, %v1104_v46  ;;  %v802_v36 = vmul.f32 %v798_v26, %v779_v1  ;;  %v697_v39 = vadd.f32 %v1102_v18, %v696_v20 }
  0x5f   : > { %1105 = vrcp.f32 %v735_v31  ;;  %v806_v37 = vadd.f32 %v802_v36, %v714_v27  ;;  %vm786_vm12 = vweird.f32 %v735_v31  ;;  %v792_v44 = vand.u32 2147483648, %v735_v31 }
  0x60   : > { %1107 = vtanh.f32 %v1410_v33  ;;  %v701_v45 = vsel %vm700_vm10, %v1102_v18, %v697_v39  ;;  %v790_v48 = vand.u32 2147483647, %v735_v31 }
  0x61   : > { %810 = vst [vmem:[%s1392_s30 + $0x10] sm:$0xff] %v806_v37  ;;  %v706_v50 = vsel %vm703_vm11, %v705_v43, %v701_v45  ;;  %v793_v40 = vor.u32 1.1754944e-38, %v792_v44 }
  0x62   : > { %vm791_vm15 = vcmp.eq.f32.partialorder %v790_v48, 8.507059e+37 }
  0x65   : > { %v1106_v41 = vpop.eup %1105 }
  0x66   : > { %v782_v11 = vmul.f32 %v1106_v41, %v735_v31  ;;  %vm787_vm13 = vweird.f32 %v1106_v41  ;;  %v1108_v49 = vpop.eup %1107 }
  0x67   : > { %vm788_vm14 = vmor %vm786_vm12, %vm787_vm13  ;;  %v715_v33 = vmul.f32 %v1108_v49, %v706_v50 }
  0x68   : > { %v783_v42 = vsub.f32 1.0, %v782_v11 }
  0x6a   : > { %v784_v32 = vmul.f32 %v1106_v41, %v783_v42 }
  0x6c   : > { %v785_v51 = vadd.f32 %v1106_v41, %v784_v32 }
  0x6e   : > { %v789_v53 = vsel %vm788_vm14, %v1106_v41, %v785_v51 }
  0x6f   : > { %v794_v34 = vsel %vm791_vm15, %v793_v40, %v789_v53 }
  0x70   : > { %v803_v35 = vmul.f32 %v799_v52, %v794_v34 }
  0x72   : > { %v807_v55 = vadd.f32 %v803_v35, %v715_v33 }
  0x74   : > { %811 = vst [vmem:[%s1392_s30 + $0x18] sm:$0xff] %v807_v55 }
  0x75 PF: > { %s18_s24 = sadd.s32 1, %s1115_s24  }
  0x76   : > { %p15_p4 = scmp.ge.s32.totalorder %s18_s24, 6  }
  0x78   :  { %17 = sbr.rel (!%p15_p4) target bundleno = 1 (0x1), region = 101 }

// kernel: strpm_forward.7
= control target key start
LH: loop header
LB: loop body
LE: loop exit
PB: predicated region body
PF: predicated region fallthrough
CT: control target
= control target key end

     0   :  { %s2992_s20 = smov 0   ;;  %s3927_s0 = inlined_call_operand.<no memory space> [shape: f32[1,1], index: 0, kind: input, shape index: {}]   ;;  %s3928_s1 = inlined_call_operand.vmem [shape: bf16[2,576,256], index: 1, kind: input, shape index: {}]   ;;  %s3929_s2 = inlined_call_operand.vmem [shape: bf16[64,576], index: 2, kind: input, shape index: {}]   ;;  %s3930_s3 = inlined_call_operand.vmem [shape: f32[64,1], index: 3, kind: input, shape index: {}]   ;;  %s3931_s4 = inlined_call_operand.vmem [shape: f32[32,256], index: 4, kind: input, shape index: {}]   ;;  %s3932_s5 = inlined_call_operand.vmem [shape: f32[32,256], index: 5, kind: input, shape index: {}]   ;;  %s3933_s6 = inlined_call_operand.vmem [shape: f32[2,32,256], index: 6, kind: input, shape index: {}]   ;;  %s3934_s7 = inlined_call_operand.vmem [shape: f32[2,32,256], index: 7, kind: input, shape index: {}]   ;;  %s3935_s8 = inlined_call_operand.vmem [shape: f32[2,32,256], index: 8, kind: input, shape index: {}]   ;;  %s3936_s9 = inlined_call_operand.vmem [shape: f32[2,32,256], index: 9, kind: input, shape index: {}]   ;;  %s3937_s10 = inlined_call_operand.vmem [shape: f32[32,32], index: 10, kind: input, shape index: {}]   ;;  %s3938_s11 = inlined_call_operand.vmem [shape: f32[32,32], index: 11, kind: input, shape index: {}]   ;;  %s3939_s12 = inlined_call_operand.vmem [shape: f32[32,32], index: 12, kind: input, shape index: {}]   ;;  %s3940_s13 = inlined_call_operand.vmem [shape: f32[32,1], index: 13, kind: input, shape index: {}]   ;;  %s3941_s14 = inlined_call_operand.vmem [shape: f32[2,32,256], index: 14, kind: output, shape index: {0}]   ;;  %s3942_s15 = inlined_call_operand.vmem [shape: f32[2,32,256], index: 15, kind: output, shape index: {1}]  }
   0x1   :  { %21 = sst [smem:[#allocation2]] %s3927_s0 }
   0x2 LB: > { %s2287_s21 = sadd.s32 4294967295, %s2905_s20   ;;  %p2291_p0 = scmp.ge.s32.totalorder %s2905_s20, 1  ;;  %s2905_s20 = sphi %s2992_s20, %s27_s20  }
   0x3   : > { %p481_p1 = scmp.lt.s32.totalorder %s2905_s20, 3 }
   0x5   : > { %p482_p2 = pnand %p2291_p0, %p481_p1 }
   0x6   : > { %p554_p3 = scmp.lt.s32.totalorder (!%p482_p2), %s2287_s21, 1 }
   0x7   : > { %485 = sbr.rel (%p482_p2) target bundleno = 812 (0x32c), region = 76 }
   0xc   : > { %s3962_s21 = smov (!%p554_p3, %s2287_s21), 1  ;;  %vm1194_vm0 = vcmask 523264   ;;  %vm3943_vm2 = vcmask 261120  }
   0xd   : > { %s2825_s0 = smul.u32 576, %s3962_s21  ;;  %s3516_s23 = sshll.u32 %s3962_s21, 6 }
   0xe   : > { %s578_s26 = scalar_lea.vmem %s3936_s9, %s3516_s23  ;;  %s3585_s22 = scalar_lea.vmem %s3933_s6, %s3516_s23 }
   0xf   : > { %s3006_s24 = scalar_lea.vmem %s3928_s1, %s2825_s0 }
  0x10   : > { %v2443_v0 = vld [vmem:[%s3006_s24 + $0x70] sm:$0xf]  ;;  %v2756_v1 = vld [vmem:[%s3006_s24 + $0x74] sm:$0xf0]  ;;  %v2435_v11 = vld [vmem:[%s3006_s24 + $0x60] sm:$0xf] }
  0x11   : > { %v2507_v2 = vld [vmem:[%s3006_s24 + $0xf0] sm:$0xf]  ;;  %v2444_v3 = vor.u32 %v2756_v1, %v2443_v0  ;;  %v2772_v4 = vld [vmem:[%s3006_s24 + $0xf4] sm:$0xf0]  ;;  %v2754_v13 = vld [vmem:[%s3006_s24 + $0x64] sm:$0xf0] }
  0x12   : > { %v2571_v5 = vld [vmem:[%s3006_s24 + $0x170] sm:$0xf]  ;;  %v2788_v6 = vld [vmem:[%s3006_s24 + $0x174] sm:$0xf0]  ;;  %v2508_v7 = vor.u32 %v2772_v4, %v2507_v2  ;;  %v2499_v14 = vld [vmem:[%s3006_s24 + $0xe0] sm:$0xf]  ;;  %v2436_v16 = vor.u32 %v2754_v13, %v2435_v11 }
  0x13   : > { %v2572_v8 = vor.u32 %v2788_v6, %v2571_v5  ;;  %v2635_v9 = vld [vmem:[%s3006_s24 + $0x1f0] sm:$0xf]  ;;  %v2804_v10 = vld [vmem:[%s3006_s24 + $0x1f4] sm:$0xf0]  ;;  %1207 = vmatpush.bf16.msra.mxu0 %v2444_v3  ;;  %v2770_v15 = vld [vmem:[%s3006_s24 + $0xe4] sm:$0xf0] }
  0x14   : > { %v2636_v12 = vor.u32 %v2804_v10, %v2635_v9  ;;  %1236 = vmatpush.bf16.msra.mxu1 %v2508_v7  ;;  %v2500_v17 = vor.u32 %v2770_v15, %v2499_v14  ;;  %v2563_v18 = vld [vmem:[%s3006_s24 + $0x160] sm:$0xf]  ;;  %v2786_v19 = vld [vmem:[%s3006_s24 + $0x164] sm:$0xf0]  ;;  %v2427_v23 = vld [vmem:[%s3006_s24 + $0x50] sm:$0xf] }
  0x15   : > { %1265 = vmatpush.bf16.msra.mxu2 %v2572_v8  ;;  %v2627_v20 = vld [vmem:[%s3006_s24 + $0x1e0] sm:$0xf]  ;;  %v2564_v21 = vor.u32 %v2786_v19, %v2563_v18  ;;  %v2802_v22 = vld [vmem:[%s3006_s24 + $0x1e4] sm:$0xf0]  ;;  %v2752_v24 = vld [vmem:[%s3006_s24 + $0x54] sm:$0xf0] }
  0x16   : > { %1294 = vmatpush.bf16.msra.mxu3 %v2636_v12  ;;  %v2628_v25 = vor.u32 %v2802_v22, %v2627_v20  ;;  %v2491_v26 = vld [vmem:[%s3006_s24 + $0xd0] sm:$0xf]  ;;  %v2768_v27 = vld [vmem:[%s3006_s24 + $0xd4] sm:$0xf0]  ;;  %v2428_v29 = vor.u32 %v2752_v24, %v2427_v23  ;;  %v2419_v35 = vld [vmem:[%s3006_s24 + $0x40] sm:$0xf] }
  0x17   : > { %v2555_v28 = vld [vmem:[%s3006_s24 + $0x150] sm:$0xf]  ;;  %1208 = vmatpush.bf16.msra.mxu0 %v2436_v16  ;;  %v2784_v30 = vld [vmem:[%s3006_s24 + $0x154] sm:$0xf0]  ;;  %v2492_v33 = vor.u32 %v2768_v27, %v2491_v26  ;;  %v2750_v36 = vld [vmem:[%s3006_s24 + $0x44] sm:$0xf0] }
  0x18   : > { %v2619_v31 = vld [vmem:[%s3006_s24 + $0x1d0] sm:$0xf]  ;;  %v2800_v32 = vld [vmem:[%s3006_s24 + $0x1d4] sm:$0xf0]  ;;  %1237 = vmatpush.bf16.msra.mxu1 %v2500_v17  ;;  %v2556_v34 = vor.u32 %v2784_v30, %v2555_v28  ;;  %v2483_v37 = vld [vmem:[%s3006_s24 + $0xc0] sm:$0xf]  ;;  %v2420_v44 = vor.u32 %v2750_v36, %v2419_v35 }
  0x19   : > { %1266 = vmatpush.bf16.msra.mxu2 %v2564_v21  ;;  %v2620_v38 = vor.u32 %v2800_v32, %v2619_v31  ;;  %v2766_v39 = vld [vmem:[%s3006_s24 + $0xc4] sm:$0xf0]  ;;  %v2547_v40 = vld [vmem:[%s3006_s24 + $0x140] sm:$0xf]  ;;  %v2411_v47 = vld [vmem:[%s3006_s24 + $0x30] sm:$0xf] }
  0x1a   : > { %1295 = vmatpush.bf16.msra.mxu3 %v2628_v25  ;;  %v2782_v41 = vld [vmem:[%s3006_s24 + $0x144] sm:$0xf0]  ;;  %v2611_v42 = vld [vmem:[%s3006_s24 + $0x1c0] sm:$0xf]  ;;  %v2484_v45 = vor.u32 %v2766_v39, %v2483_v37  ;;  %v2748_v48 = vld [vmem:[%s3006_s24 + $0x34] sm:$0xf0] }
  0x1b   : > { %v2798_v43 = vld [vmem:[%s3006_s24 + $0x1c4] sm:$0xf0]  ;;  %1209 = vmatpush.bf16.msra.mxu0 %v2428_v29  ;;  %v2548_v46 = vor.u32 %v2782_v41, %v2547_v40  ;;  %v2475_v49 = vld [vmem:[%s3006_s24 + $0xb0] sm:$0xf]  ;;  %v2764_v51 = vld [vmem:[%s3006_s24 + $0xb4] sm:$0xf0]  ;;  %v2412_v56 = vor.u32 %v2748_v48, %v2411_v47 }
  0x1c   : > { %1238 = vmatpush.bf16.msra.mxu1 %v2492_v33  ;;  %v2612_v50 = vor.u32 %v2798_v43, %v2611_v42  ;;  %v2539_v52 = vld [vmem:[%s3006_s24 + $0x130] sm:$0xf]  ;;  %v2780_v53 = vld [vmem:[%s3006_s24 + $0x134] sm:$0xf0]  ;;  %v2476_v57 = vor.u32 %v2764_v51, %v2475_v49  ;;  %v2403_v59 = vld [vmem:[%s3006_s24 + $0x20] sm:$0xf] }
  0x1d   : > { %1267 = vmatpush.bf16.msra.mxu2 %v2556_v34  ;;  %v2603_v54 = vld [vmem:[%s3006_s24 + $0x1b0] sm:$0xf]  ;;  %v2796_v55 = vld [vmem:[%s3006_s24 + $0x1b4] sm:$0xf0]  ;;  %v2540_v58 = vor.u32 %v2780_v53, %v2539_v52  ;;  %v2746_v60 = vld [vmem:[%s3006_s24 + $0x24] sm:$0xf0] }
  0x1e   : > { %1296 = vmatpush.bf16.msra.mxu3 %v2620_v38  ;;  %v2467_v61 = vld [vmem:[%s3006_s24 + $0xa0] sm:$0xf]  ;;  %v2604_v62 = vor.u32 %v2796_v55, %v2603_v54  ;;  %v2762_v63 = vld [vmem:[%s3006_s24 + $0xa4] sm:$0xf0]  ;;  %v2404_v4 = vor.u32 %v2746_v60, %v2403_v59  ;;  %v2395_v7 = vld [vmem:[%s3006_s24 + $0x10] sm:$0xf] }
  0x1f   : > { %1210 = vmatpush.bf16.msra.mxu0 %v2420_v44  ;;  %v2531_v0 = vld [vmem:[%s3006_s24 + $0x120] sm:$0xf]  ;;  %v2778_v1 = vld [vmem:[%s3006_s24 + $0x124] sm:$0xf0]  ;;  %v2468_v5 = vor.u32 %v2762_v63, %v2467_v61  ;;  %v2744_v8 = vld [vmem:[%s3006_s24 + $0x14] sm:$0xf0] }
  0x20   : > { %1239 = vmatpush.bf16.msra.mxu1 %v2484_v45  ;;  %v2595_v2 = vld [vmem:[%s3006_s24 + $0x1a0] sm:$0xf]  ;;  %v2794_v3 = vld [vmem:[%s3006_s24 + $0x1a4] sm:$0xf0]  ;;  %v2532_v6 = vor.u32 %v2778_v1, %v2531_v0  ;;  %v2459_v9 = vld [vmem:[%s3006_s24 + $0x90] sm:$0xf]  ;;  %v2396_v16 = vor.u32 %v2744_v8, %v2395_v7 }
  0x21   : > { %1268 = vmatpush.bf16.msra.mxu2 %v2548_v46  ;;  %v2596_v10 = vor.u32 %v2794_v3, %v2595_v2  ;;  %v2760_v11 = vld [vmem:[%s3006_s24 + $0x94] sm:$0xf0]  ;;  %v2523_v12 = vld [vmem:[%s3006_s24 + $0x110] sm:$0xf]  ;;  %v2387_v17 = vld [vmem:[%s3006_s24] sm:$0xf] }
  0x22   : > { %1297 = vmatpush.bf16.msra.mxu3 %v2612_v50  ;;  %v2776_v13 = vld [vmem:[%s3006_s24 + $0x114] sm:$0xf0]  ;;  %v2587_v14 = vld [vmem:[%s3006_s24 + $0x190] sm:$0xf]  ;;  %v2460_v18 = vor.u32 %v2760_v11, %v2459_v9  ;;  %v2742_v20 = vld [vmem:[%s3006_s24 + $0x4] sm:$0xf0] }
  0x23   : > { %1211 = vmatpush.bf16.msra.mxu0 %v2412_v56  ;;  %v2792_v15 = vld [vmem:[%s3006_s24 + $0x194] sm:$0xf0]  ;;  %v2524_v19 = vor.u32 %v2776_v13, %v2523_v12  ;;  %v2451_v21 = vld [vmem:[%s3006_s24 + $0x80] sm:$0xf]  ;;  %v2758_v24 = vld [vmem:[%s3006_s24 + $0x84] sm:$0xf0]  ;;  %v2388_v31 = vor.u32 %v2742_v20, %v2387_v17 }
  0x24   : > { %1240 = vmatpush.bf16.msra.mxu1 %v2476_v57  ;;  %v686_v22 = vld [vmem:[%s3930_s3] sm:$0xff]  ;;  %v2588_v23 = vor.u32 %v2792_v15, %v2587_v14  ;;  %v2774_v26 = vld [vmem:[%s3006_s24 + $0x104] sm:$0xf0]  ;;  %v2907_v27 = vmov 0   ;;  %v2723_v32 = vld [vmem:[%s3929_s2 + $0x10] sm:$0xf0]  ;;  %v2452_v35 = vor.u32 %v2758_v24, %v2451_v21 }
  0x25   : > { %1269 = vmatpush.bf16.msra.mxu2 %v2540_v58  ;;  %v2515_v25 = vld [vmem:[%s3006_s24 + $0x100] sm:$0xf]  ;;  %2844 = vset.pattern.permute.xlu0 %v2907_v27  ;;  %v2790_v29 = vld [vmem:[%s3006_s24 + $0x184] sm:$0xf0]  ;;  %v2721_v33 = vld [vmem:[%s3929_s2 + $0x4] sm:$0xf] }
  0x26   : > { %1298 = vmatpush.bf16.msra.mxu3 %v2604_v62  ;;  %v2579_v28 = vld [vmem:[%s3006_s24 + $0x180] sm:$0xf]  ;;  %696 = vperm.xlu0 %2844, %v686_v22   ;;  %v688_v34 = vld [vmem:[%s3930_s3 + $0x10] sm:$0xff]  ;;  %v2516_v36 = vor.u32 %v2774_v26, %v2515_v25  ;;  %v2309_v37 = vld [vmem:[%s3929_s2 + $0x14] sm:$0xf0] }
  0x27   : > { %1212 = vmatpush.bf16.msra.mxu0 %v2404_v4  ;;  %v2307_v30 = vld [vmem:[%s3929_s2] sm:$0xf]  ;;  %2845 = vset.pattern.permute.xlu1 %v2907_v27  ;;  %v2315_v38 = vld [vmem:[%s3929_s2 + $0x8] sm:$0xf]  ;;  %v2724_v39 = vld [vmem:[%s3929_s2 + $0x18] sm:$0xf0]  ;;  %v2580_v40 = vor.u32 %v2790_v29, %v2579_v28  ;;  %v3104_v44 = vor.u32 %v2721_v33, %v2309_v37 }
  0x28   : > { %1241 = vmatpush.bf16.msra.mxu1 %v2468_v5  ;;  %2846 = vset.pattern.permute.xlu2 %v2907_v27  ;;  %v2722_v41 = vld [vmem:[%s3929_s2 + $0xc] sm:$0xf]  ;;  %v2317_v42 = vld [vmem:[%s3929_s2 + $0x1c] sm:$0xf0]  ;;  %v3102_v43 = vor.u32 %v2723_v32, %v2307_v30  ;;  %v3106_v45 = vor.u32 %v2724_v39, %v2315_v38  ;;  %v2755_v48 = vld [vmem:[%s3006_s24 + $0x74] sm:$0xf] }
  0x29   : > { %1270 = vmatpush.bf16.msra.mxu2 %v2532_v6  ;;  %706 = vperm.xlu1 %2845, %v688_v34   ;;  %v687_v46 = vld [vmem:[%s3930_s3 + $0x8] sm:$0xff]  ;;  %v3111_v47 = vor.u32 %v2722_v41, %v2317_v42  ;;  %v2445_v49 = vld [vmem:[%s3006_s24 + $0x78] sm:$0xf0]  ;;  %v2771_v51 = vld [vmem:[%s3006_s24 + $0xf4] sm:$0xf] }
  0x2a   : > { %1299 = vmatpush.bf16.msra.mxu3 %v2596_v10  ;;  %v2448_v50 = vor.u32 %v2755_v48, %v2445_v49  ;;  %v2509_v52 = vld [vmem:[%s3006_s24 + $0xf8] sm:$0xf0]  ;;  %v2787_v54 = vld [vmem:[%s3006_s24 + $0x174] sm:$0xf]  ;;  %v2753_v58 = vld [vmem:[%s3006_s24 + $0x64] sm:$0xf] }
  0x2b   : > { %1213 = vmatpush.bf16.msra.mxu0 %v2396_v16  ;;  %v2512_v53 = vor.u32 %v2771_v51, %v2509_v52  ;;  %v2573_v55 = vld [vmem:[%s3006_s24 + $0x178] sm:$0xf0]  ;;  %v2437_v59 = vld [vmem:[%s3006_s24 + $0x68] sm:$0xf0]  ;;  %v2769_v61 = vld [vmem:[%s3006_s24 + $0xe4] sm:$0xf] }
  0x2c   : > { %1242 = vmatpush.bf16.msra.mxu1 %v2460_v18  ;;  %v689_v56 = vld [vmem:[%s3930_s3 + $0x18] sm:$0xff]  ;;  %v2576_v57 = vor.u32 %v2787_v54, %v2573_v55  ;;  %v2440_v60 = vor.u32 %v2753_v58, %v2437_v59  ;;  %v2501_v62 = vld [vmem:[%s3006_s24 + $0xe8] sm:$0xf0]  ;;  %v2785_v63 = vld [vmem:[%s3006_s24 + $0x164] sm:$0xf] }
  0x2d   : > { %1271 = vmatpush.bf16.msra.mxu2 %v2524_v19  ;;  %v2504_v0 = vor.u32 %v2769_v61, %v2501_v62  ;;  %v2565_v1 = vld [vmem:[%s3006_s24 + $0x168] sm:$0xf0]  ;;  %v2667_v2 = vld [vmem:[%s3006_s24 + $0x230] sm:$0xf]  ;;  %v2812_v3 = vld [vmem:[%s3006_s24 + $0x234] sm:$0xf0] }
  0x2e   : > { %1300 = vmatpush.bf16.msra.mxu3 %v2588_v23  ;;  %701 = vperm.xlu0 %2844, %v687_v46   ;;  %v2568_v4 = vor.u32 %v2785_v63, %v2565_v1  ;;  %v2668_v5 = vor.u32 %v2812_v3, %v2667_v2  ;;  %v2751_v6 = vld [vmem:[%s3006_s24 + $0x54] sm:$0xf]  ;;  %v2429_v7 = vld [vmem:[%s3006_s24 + $0x58] sm:$0xf0]  ;;  %v690_v11 = vld [vmem:[%s3930_s3 + $0x20] sm:$0xff] }
  0x2f   : > { %1214 = vmatpush.bf16.msra.mxu0 %v2388_v31  ;;  %v2767_v8 = vld [vmem:[%s3006_s24 + $0xd4] sm:$0xf]  ;;  %v2432_v9 = vor.u32 %v2751_v6, %v2429_v7  ;;  %v2493_v10 = vld [vmem:[%s3006_s24 + $0xd8] sm:$0xf0]  ;;  %v2327_v13 = vld [vmem:[%s3929_s2 + $0x28] sm:$0xf] }
  0x30   : > { %1243 = vmatpush.bf16.msra.mxu1 %v2452_v35  ;;  %v2783_v12 = vld [vmem:[%s3006_s24 + $0x154] sm:$0xf]  ;;  %v2496_v14 = vor.u32 %v2767_v8, %v2493_v10  ;;  %v2557_v15 = vld [vmem:[%s3006_s24 + $0x158] sm:$0xf0]  ;;  %v2749_v16 = vld [vmem:[%s3006_s24 + $0x44] sm:$0xf] }
  0x31   : > { %1272 = vmatpush.bf16.msra.mxu2 %v2516_v36  ;;  %711 = vperm.xlu1 %2845, %v689_v56   ;;  %v2421_v17 = vld [vmem:[%s3006_s24 + $0x48] sm:$0xf0]  ;;  %v2728_v18 = vld [vmem:[%s3929_s2 + $0x38] sm:$0xf0]  ;;  %v2560_v19 = vor.u32 %v2783_v12, %v2557_v15  ;;  %v2765_v20 = vld [vmem:[%s3006_s24 + $0xc4] sm:$0xf] }
  0x32   : > { %1301 = vmatpush.bf16.msra.mxu3 %v2580_v40  ;;  %1215 = vmatmul.bf16.vlgmr.msra.gmra.mxu0 %v3102_v43  ;;  %v2485_v21 = vld [vmem:[%s3006_s24 + $0xc8] sm:$0xf0]  ;;  %v2781_v23 = vld [vmem:[%s3006_s24 + $0x144] sm:$0xf]  ;;  %v2329_v25 = vld [vmem:[%s3929_s2 + $0x3c] sm:$0xf0]  ;;  %v2424_v28 = vor.u32 %v2749_v16, %v2421_v17  ;;  %v3173_v32 = vor.u32 %v2728_v18, %v2327_v13 }
  0x33   : > { %1244 = vmatmul.bf16.vlgmr.msra.gmra.mxu1 %v3104_v44  ;;  %1327 = vmatpush.bf16.msrb.mxu0 %v2668_v5  ;;  %v2726_v22 = vld [vmem:[%s3929_s2 + $0x2c] sm:$0xf]  ;;  %v2335_v26 = vld [vmem:[%s3929_s2 + $0x30] sm:$0xf]  ;;  %v2729_v27 = vld [vmem:[%s3929_s2 + $0x40] sm:$0xf0]  ;;  %v2488_v31 = vor.u32 %v2765_v20, %v2485_v21 }
  0x34   : > { %1273 = vmatmul.bf16.vlgmr.msra.gmra.mxu2 %v3106_v45  ;;  %1352 = vmatpush.bf16.msrb.mxu1 %v2448_v50  ;;  %v2549_v24 = vld [vmem:[%s3006_s24 + $0x148] sm:$0xf0]  ;;  %v2727_v29 = vld [vmem:[%s3929_s2 + $0x34] sm:$0xf]  ;;  %v2337_v30 = vld [vmem:[%s3929_s2 + $0x44] sm:$0xf0]  ;;  %v3175_v34 = vor.u32 %v2726_v22, %v2329_v25  ;;  %v3177_v35 = vor.u32 %v2729_v27, %v2335_v26 }
  0x35   : > { %1302 = vmatmul.bf16.vlgmr.msra.gmra.mxu3 %v3111_v47  ;;  %1381 = vmatpush.bf16.msrb.mxu2 %v2512_v53  ;;  %v2552_v33 = vor.u32 %v2781_v23, %v2549_v24  ;;  %v3179_v36 = vor.u32 %v2727_v29, %v2337_v30  ;;  %v2747_v37 = vld [vmem:[%s3006_s24 + $0x34] sm:$0xf]  ;;  %v2413_v38 = vld [vmem:[%s3006_s24 + $0x38] sm:$0xf0]  ;;  %v691_v49 = vld [vmem:[%s3930_s3 + $0x28] sm:$0xff] }
  0x36   : > { %1410 = vmatpush.bf16.msrb.mxu3 %v2576_v57  ;;  %716 = vperm.xlu0 %2844, %v690_v11   ;;  %v2416_v39 = vor.u32 %v2747_v37, %v2413_v38  ;;  %v2763_v40 = vld [vmem:[%s3006_s24 + $0xb4] sm:$0xf]  ;;  %v2477_v41 = vld [vmem:[%s3006_s24 + $0xb8] sm:$0xf0]  ;;  %v2659_v51 = vld [vmem:[%s3006_s24 + $0x220] sm:$0xf] }
  0x37   : > { %v2480_v42 = vor.u32 %v2763_v40, %v2477_v41  ;;  %v2779_v46 = vld [vmem:[%s3006_s24 + $0x134] sm:$0xf]  ;;  %v2541_v48 = vld [vmem:[%s3006_s24 + $0x138] sm:$0xf0]  ;;  %v2810_v52 = vld [vmem:[%s3006_s24 + $0x224] sm:$0xf0] }
  0x38   : > { %1353 = vmatpush.bf16.msrb.mxu1 %v2440_v60  ;;  %v2544_v50 = vor.u32 %v2779_v46, %v2541_v48  ;;  %v2660_v53 = vor.u32 %v2810_v52, %v2659_v51  ;;  %v2745_v54 = vld [vmem:[%s3006_s24 + $0x24] sm:$0xf]  ;;  %v2405_v55 = vld [vmem:[%s3006_s24 + $0x28] sm:$0xf0]  ;;  %v2651_v63 = vld [vmem:[%s3006_s24 + $0x210] sm:$0xf] }
  0x39   : > { %1382 = vmatpush.bf16.msrb.mxu2 %v2504_v0  ;;  %721 = vperm.xlu1 %2845, %v691_v49   ;;  %v2761_v56 = vld [vmem:[%s3006_s24 + $0xa4] sm:$0xf]  ;;  %v2408_v57 = vor.u32 %v2745_v54, %v2405_v55  ;;  %v2469_v58 = vld [vmem:[%s3006_s24 + $0xa8] sm:$0xf0]  ;;  %v2808_v0 = vld [vmem:[%s3006_s24 + $0x214] sm:$0xf0] }
  0x3a   : > { %1411 = vmatpush.bf16.msrb.mxu3 %v2568_v4  ;;  %v2777_v59 = vld [vmem:[%s3006_s24 + $0x124] sm:$0xf]  ;;  %v2533_v60 = vld [vmem:[%s3006_s24 + $0x128] sm:$0xf0]  ;;  %1328 = vmatpush.bf16.msrb.mxu0 %v2660_v53  ;;  %v2472_v61 = vor.u32 %v2761_v56, %v2469_v58  ;;  %v2743_v1 = vld [vmem:[%s3006_s24 + $0x14] sm:$0xf]  ;;  %v2652_v2 = vor.u32 %v2808_v0, %v2651_v63 }
  0x3b   : > { %v2536_v62 = vor.u32 %v2777_v59, %v2533_v60  ;;  %v2397_v3 = vld [vmem:[%s3006_s24 + $0x18] sm:$0xf0]  ;;  %v2759_v4 = vld [vmem:[%s3006_s24 + $0x94] sm:$0xf]  ;;  %v2347_v6 = vld [vmem:[%s3929_s2 + $0x50] sm:$0xf] }
  0x3c   : > { %1354 = vmatpush.bf16.msrb.mxu1 %v2432_v9  ;;  %v2461_v5 = vld [vmem:[%s3006_s24 + $0x98] sm:$0xf0]  ;;  %v2733_v7 = vld [vmem:[%s3929_s2 + $0x60] sm:$0xf0]  ;;  %v2400_v8 = vor.u32 %v2743_v1, %v2397_v3  ;;  %v2775_v10 = vld [vmem:[%s3006_s24 + $0x114] sm:$0xf] }
  0x3d   : > { %1383 = vmatpush.bf16.msrb.mxu2 %v2496_v14  ;;  %v2464_v9 = vor.u32 %v2759_v4, %v2461_v5  ;;  %v2525_v11 = vld [vmem:[%s3006_s24 + $0x118] sm:$0xf0]  ;;  %v2643_v12 = vld [vmem:[%s3006_s24 + $0x200] sm:$0xf]  ;;  %v2731_v13 = vld [vmem:[%s3929_s2 + $0x54] sm:$0xf]  ;;  %v3242_v30 = vor.u32 %v2733_v7, %v2347_v6 }
  0x3e   : > { %1412 = vmatpush.bf16.msrb.mxu3 %v2560_v19  ;;  %v2349_v14 = vld [vmem:[%s3929_s2 + $0x64] sm:$0xf0]  ;;  %v2528_v15 = vor.u32 %v2775_v10, %v2525_v11  ;;  %v2741_v17 = vld [vmem:[%s3006_s24 + $0x4] sm:$0xf]  ;;  %v2389_v18 = vld [vmem:[%s3006_s24 + $0x8] sm:$0xf0]  ;;  %1329 = vmatpush.bf16.msrb.mxu0 %v2652_v2 }
  0x3f   : > { %v2806_v16 = vld [vmem:[%s3006_s24 + $0x204] sm:$0xf0]  ;;  %v2757_v20 = vld [vmem:[%s3006_s24 + $0x84] sm:$0xf]  ;;  %v2453_v21 = vld [vmem:[%s3006_s24 + $0x88] sm:$0xf0]  ;;  %v2392_v25 = vor.u32 %v2741_v17, %v2389_v18 }
  0x40   : > { %1355 = vmatpush.bf16.msrb.mxu1 %v2424_v28  ;;  %v2644_v19 = vor.u32 %v2806_v16, %v2643_v12  ;;  %v2773_v22 = vld [vmem:[%s3006_s24 + $0x104] sm:$0xf]  ;;  %v2355_v23 = vld [vmem:[%s3929_s2 + $0x58] sm:$0xf]  ;;  %v2734_v24 = vld [vmem:[%s3929_s2 + $0x68] sm:$0xf0]  ;;  %v2456_v29 = vor.u32 %v2757_v20, %v2453_v21 }
  0x41   : > { %1384 = vmatpush.bf16.msrb.mxu2 %v2488_v31  ;;  %v2517_v26 = vld [vmem:[%s3006_s24 + $0x108] sm:$0xf0]  ;;  %v2732_v27 = vld [vmem:[%s3929_s2 + $0x5c] sm:$0xf]  ;;  %v2357_v28 = vld [vmem:[%s3929_s2 + $0x6c] sm:$0xf0]  ;;  %v3246_v37 = vor.u32 %v2734_v24, %v2355_v23 }
  0x42   : > { %1220 = vmatmul.bf16.gmra.mxu0 %v3173_v32  ;;  %1413 = vmatpush.bf16.msrb.mxu3 %v2552_v33  ;;  %v2520_v31 = vor.u32 %v2773_v22, %v2517_v26  ;;  %v3244_v33 = vor.u32 %v2731_v13, %v2349_v14  ;;  %v3248_v38 = vor.u32 %v2732_v27, %v2357_v28  ;;  %v2367_v40 = vld [vmem:[%s3929_s2 + $0x78] sm:$0xf]  ;;  %v2738_v41 = vld [vmem:[%s3929_s2 + $0x88] sm:$0xf0]  ;;  %v2369_v46 = vld [vmem:[%s3929_s2 + $0x8c] sm:$0xf0] }
  0x43   : > { %1249 = vmatmul.bf16.gmra.mxu1 %v3175_v34  ;;  %1330 = vmatpush.bf16.msrb.mxu0 %v2644_v19  ;;  %v2375_v48 = vld [vmem:[%s3929_s2 + $0x80] sm:$0xf]  ;;  %v2739_v49 = vld [vmem:[%s3929_s2 + $0x90] sm:$0xf0]  ;;  %v2377_v51 = vld [vmem:[%s3929_s2 + $0x94] sm:$0xf0]  ;;  %v3281_v52 = vor.u32 %v2738_v41, %v2367_v40 }
  0x44   : > { %1278 = vmatmul.bf16.gmra.mxu2 %v3177_v35  ;;  %1356 = vmatpush.bf16.msrb.mxu1 %v2416_v39  ;;  %v693_v39 = vld [vmem:[%s3930_s3 + $0x38] sm:$0xff]  ;;  %v3285_v54 = vor.u32 %v2739_v49, %v2375_v48  ;;  %v2323_v56 = vld [vmem:[%s3929_s2 + $0x10] sm:$0xf]  ;;  %v2803_v59 = vld [vmem:[%s3006_s24 + $0x1f4] sm:$0xf] }
  0x45   : > { %1307 = vmatmul.bf16.gmra.mxu3 %v3179_v36  ;;  %1385 = vmatpush.bf16.msrb.mxu2 %v2480_v42  ;;  %v2736_v42 = vld [vmem:[%s3929_s2 + $0x7c] sm:$0xf]  ;;  %v2629_v63 = vld [vmem:[%s3006_s24 + $0x1e8] sm:$0xf0]  ;;  %v2799_v0 = vld [vmem:[%s3006_s24 + $0x1d4] sm:$0xf] }
  0x46   : > { %1414 = vmatpush.bf16.msrb.mxu3 %v2544_v50  ;;  %731 = vperm.xlu0 %2844, %v693_v39   ;;  %v2737_v50 = vld [vmem:[%s3929_s2 + $0x84] sm:$0xf]  ;;  %v3283_v53 = vor.u32 %v2736_v42, %v2369_v46  ;;  %v2637_v60 = vld [vmem:[%s3006_s24 + $0x1f8] sm:$0xf0]  ;;  %v2811_v3 = vld [vmem:[%s3006_s24 + $0x234] sm:$0xf] }
  0x47   : > { %v3287_v55 = vor.u32 %v2737_v50, %v2377_v51  ;;  %v2621_v2 = vld [vmem:[%s3006_s24 + $0x1d8] sm:$0xf0]  ;;  %v2613_v6 = vld [vmem:[%s3006_s24 + $0x1c8] sm:$0xf0]  ;;  %v2795_v10 = vld [vmem:[%s3006_s24 + $0x1b4] sm:$0xf] }
  0x48   : > { %1357 = vmatpush.bf16.msrb.mxu1 %v2408_v57  ;;  %v2725_v57 = vld [vmem:[%s3929_s2 + $0x20] sm:$0xf0]  ;;  %v2669_v4 = vld [vmem:[%s3006_s24 + $0x238] sm:$0xf0]  ;;  %v2730_v7 = vld [vmem:[%s3929_s2 + $0x48] sm:$0xf0] }
  0x49   : > { %1386 = vmatpush.bf16.msrb.mxu2 %v2472_v61  ;;  %v3299_v58 = vor.u32 %v2725_v57, %v2323_v56  ;;  %v2640_v61 = vor.u32 %v2803_v59, %v2637_v60  ;;  %v2672_v5 = vor.u32 %v2811_v3, %v2669_v4  ;;  %v2605_v11 = vld [vmem:[%s3006_s24 + $0x1b8] sm:$0xf0]  ;;  %v2793_v13 = vld [vmem:[%s3006_s24 + $0x1a4] sm:$0xf]  ;;  %v2597_v14 = vld [vmem:[%s3006_s24 + $0x1a8] sm:$0xf0] }
  0x4a   : > { %1415 = vmatpush.bf16.msrb.mxu3 %v2536_v62  ;;  %v2801_v62 = vld [vmem:[%s3006_s24 + $0x1e4] sm:$0xf]  ;;  %v2608_v12 = vor.u32 %v2795_v10, %v2605_v11  ;;  %v2600_v16 = vor.u32 %v2793_v13, %v2597_v14  ;;  %v2661_v17 = vld [vmem:[%s3006_s24 + $0x228] sm:$0xf0]  ;;  %v2791_v18 = vld [vmem:[%s3006_s24 + $0x194] sm:$0xf] }
  0x4b   : > { %1439 = vmatpush.bf16.msra.mxu0 %v2640_v61  ;;  %v2632_v1 = vor.u32 %v2801_v62, %v2629_v63  ;;  %v2589_v19 = vld [vmem:[%s3006_s24 + $0x198] sm:$0xf0]  ;;  %v2807_v21 = vld [vmem:[%s3006_s24 + $0x214] sm:$0xf]  ;;  %v2789_v24 = vld [vmem:[%s3006_s24 + $0x184] sm:$0xf] }
  0x4c   : > { %1358 = vmatpush.bf16.msrb.mxu1 %v2400_v8  ;;  %v2653_v22 = vld [vmem:[%s3006_s24 + $0x218] sm:$0xf0]  ;;  %v2735_v23 = vld [vmem:[%s3929_s2 + $0x70] sm:$0xf0]  ;;  %v2805_v26 = vld [vmem:[%s3006_s24 + $0x204] sm:$0xf] }
  0x4d   : > { %1387 = vmatpush.bf16.msrb.mxu2 %v2464_v9  ;;  %v2068_v39 = vld [vmem:[%s3940_s13 + $0x8] sm:$0xff]  ;;  %v2067_v40 = vld [vmem:[%s3940_s13] sm:$0xff]  ;;  %v2070_v41 = vld [vmem:[%s3940_s13 + $0x18] sm:$0xff] }
  0x4e   : > { %1416 = vmatpush.bf16.msrb.mxu3 %v2528_v15  ;;  %v2809_v15 = vld [vmem:[%s3006_s24 + $0x224] sm:$0xf]  ;;  %2078 = vperm.xlu0 %2844, %v2068_v39   ;;  %v2069_v42 = vld [vmem:[%s3940_s13 + $0x10] sm:$0xff] }
  0x4f   : > { %1440 = vmatpush.bf16.msra.mxu0 %v2632_v1  ;;  %v2664_v20 = vor.u32 %v2809_v15, %v2661_v17  ;;  %2073 = vperm.xlu1 %2845, %v2067_v40  }
  0x50   : > { %1359 = vmatpush.bf16.msrb.mxu1 %v2392_v25  ;;  %v2581_v25 = vld [vmem:[%s3006_s24 + $0x188] sm:$0xf0] }
  0x51   : > { %1388 = vmatpush.bf16.msrb.mxu2 %v2456_v29  ;;  %v2584_v28 = vor.u32 %v2789_v24, %v2581_v25  ;;  %v2645_v29 = vld [vmem:[%s3006_s24 + $0x208] sm:$0xf0] }
  0x52   : > { %1225 = vmatmul.bf16.gmra.mxu0 %v3242_v30  ;;  %1417 = vmatpush.bf16.msrb.mxu3 %v2520_v31  ;;  %v2648_v31 = vor.u32 %v2805_v26, %v2645_v29 }
  0x53   : > { %1254 = vmatmul.bf16.gmra.mxu1 %v3244_v33 }
  0x54   : > { %1283 = vmatmul.bf16.gmra.mxu2 %v3246_v37  ;;  %1472 = vmatpush.bf16.msra.mxu1 %v2672_v5 }
  0x55   : > { %1312 = vmatmul.bf16.gmra.mxu3 %v3248_v38  ;;  %2813 = vmatpush.bf16.msra.mxu2 %v2640_v61 }
  0x56   : > { %2821 = vmatpush.bf16.msra.mxu3 %v2672_v5  ;;  %2088 = vperm.xlu0 %2844, %v2070_v41  }
  0x57   : > { %2083 = vperm.xlu1 %2845, %v2069_v42  }
  0x58   : > { %1473 = vmatpush.bf16.msra.mxu1 %v2664_v20 }
  0x59   : > { %2814 = vmatpush.bf16.msra.mxu2 %v2632_v1 }
  0x5a   : > { %2822 = vmatpush.bf16.msra.mxu3 %v2664_v20 }
  0x62   : > { %1230 = vmatmul.bf16.gmra.mxu0 %v3281_v52 }
  0x63   : > { %1259 = vmatmul.bf16.gmra.mxu1 %v3283_v53 }
  0x64   : > { %1288 = vmatmul.bf16.gmra.mxu2 %v3285_v54 }
  0x65   : > { %1317 = vmatmul.bf16.gmra.mxu3 %v3287_v55 }
  0x72   : > { %2673 = vmatmul.msk.bf16.vlgmr.msrb.gmra.mxu0 %vm1194_vm0, %v3299_v58 }
  0x73   : > { %1360 = vmatmul.bf16.vlgmr.msrb.gmra.mxu1 %v3102_v43  ;;  %v2624_v43 = vor.u32 %v2799_v0, %v2621_v2 }
  0x74   : > { %1389 = vmatmul.bf16.vlgmr.msrb.gmra.mxu2 %v3104_v44  ;;  %v2797_v44 = vld [vmem:[%s3006_s24 + $0x1c4] sm:$0xf]  ;;  %s3692_s24 = sld [smem:[#allocation2]] }
  0x75   : > { %1418 = vmatmul.bf16.vlgmr.msrb.gmra.mxu3 %v3106_v45  ;;  %v2343_v45 = vld [vmem:[%s3929_s2 + $0x38] sm:$0xf]  ;;  %1441 = vmatpush.bf16.msra.mxu0 %v2624_v43  ;;  %v2616_v8 = vor.u32 %v2797_v44, %v2613_v6 }
  0x76   : > { %2815 = vmatpush.bf16.msra.mxu2 %v2624_v43  ;;  %v3322_v9 = vor.u32 %v2730_v7, %v2343_v45 }
  0x79   : > { %1442 = vmatpush.bf16.msra.mxu0 %v2616_v8 }
  0x7a   : > { %2816 = vmatpush.bf16.msra.mxu2 %v2616_v8 }
  0x7d   : > { %1443 = vmatpush.bf16.msra.mxu0 %v2608_v12 }
  0x7e   : > { %2817 = vmatpush.bf16.msra.mxu2 %v2608_v12 }
  0x81   : > { %1444 = vmatpush.bf16.msra.mxu0 %v2600_v16 }
  0x82   : > { %2674 = vmatmul.msk.bf16.gmra.mxu0 %vm1194_vm0, %v3322_v9  ;;  %2818 = vmatpush.bf16.msra.mxu2 %v2600_v16 }
  0x83   : > { %1365 = vmatmul.bf16.gmra.mxu1 %v3173_v32  ;;  %v2592_v32 = vor.u32 %v2791_v18, %v2589_v19 }
  0x84   : > { %1394 = vmatmul.bf16.gmra.mxu2 %v3175_v34  ;;  %v2656_v34 = vor.u32 %v2807_v21, %v2653_v22 }
  0x85   : > { %1423 = vmatmul.bf16.gmra.mxu3 %v3177_v35  ;;  %v2363_v35 = vld [vmem:[%s3929_s2 + $0x60] sm:$0xf]  ;;  %1445 = vmatpush.bf16.msra.mxu0 %v2592_v32 }
  0x86   : > { %1474 = vmatpush.bf16.msra.mxu1 %v2656_v34  ;;  %2819 = vmatpush.bf16.msra.mxu2 %v2592_v32  ;;  %v3348_v27 = vor.u32 %v2735_v23, %v2363_v35 }
  0x87   : > { %2823 = vmatpush.bf16.msra.mxu3 %v2656_v34 }
  0x89   : > { %1446 = vmatpush.bf16.msra.mxu0 %v2584_v28 }
  0x8a   : > { %2820 = vmatpush.bf16.msra.mxu2 %v2584_v28  ;;  %1475 = vmatpush.bf16.msra.mxu1 %v2648_v31 }
  0x8b   : > { %2824 = vmatpush.bf16.msra.mxu3 %v2648_v31 }
  0x92   : > { %2675 = vmatmul.msk.bf16.gmra.mxu0 %vm1194_vm0, %v3348_v27 }
  0x93   : > { %1370 = vmatmul.bf16.gmra.mxu1 %v3242_v30  ;;  %v2383_v30 = vld [vmem:[%s3929_s2 + $0x88] sm:$0xf] }
  0x94   : > { %1399 = vmatmul.bf16.gmra.mxu2 %v3244_v33  ;;  %v2740_v33 = vld [vmem:[%s3929_s2 + $0x98] sm:$0xf0] }
  0x95   : > { %1428 = vmatmul.bf16.gmra.mxu3 %v3246_v37  ;;  %v2384_v37 = vor.u32 %v2740_v33, %v2383_v30 }
  0xa2   : > { %2676 = vmatmul.msk.bf16.gmra.mxu0 %vm1194_vm0, %v2384_v37 }
  0xa3   : > { %1375 = vmatmul.bf16.gmra.mxu1 %v3281_v52 }
  0xa4   : > { %1404 = vmatmul.bf16.gmra.mxu2 %v3283_v53  ;;  %v3395_v53 = vpop.permute.xlu0 %696 }
  0xa5   : > { %1433 = vmatmul.bf16.gmra.mxu3 %v3285_v54  ;;  %v3397_v54 = vpop.permute.xlu1 %706 }
  0xac   : > { %v3407_v60 = vpop.permute.xlu0 %701 }
  0xad   : > { %v3409_v61 = vpop.permute.xlu1 %711 }
  0xaf   : > { %v3378_v46 = vpop.f32.mrf.mxu0 }
  0xb0   : > { %v3380_v48 = vpop.f32.mrf.mxu1 }
  0xb2   : > { %1447 = vmatmul.bf16.vlgmr.msra.gmra.mxu0 %v3111_v47 }
  0xb3   : > { %2677 = vmatmul.msk.bf16.vlgmr.msra.gmra.mxu1 %vm1194_vm0, %v3299_v58 }
  0xb4   : > { %1462 = vmatmul.bf16.vlgmr.msra.gmra.mxu2 %v3287_v55  ;;  %v717_v43 = vpop.permute.xlu0 %716 }
  0xb5   : > { %2680 = vmatmul.msk.bf16.vlgmr.msra.gmra.mxu3 %vm1194_vm0, %v2384_v37  ;;  %v722_v11 = vpop.permute.xlu1 %721 }
  0xb7   : > { %v3387_v49 = vpop.f32.mrf.mxu2  ;;  %v3389_v50 = vpop.f32.mrf.mxu0 }
  0xb8   : > { %v3391_v51 = vpop.f32.mrf.mxu3  ;;  %v3393_v52 = vpop.f32.mrf.mxu1 }
  0xbc   : > { %v732_v35 = vpop.permute.xlu0 %731 }
  0xbf   : > { %v3399_v47 = vpop.f32.mrf.mxu2  ;;  %v1221_v55 = vpop.f32.mrf.mxu0 }
  0xc0   : > { %v3401_v56 = vpop.f32.mrf.mxu3  ;;  %v1222_v57 = vadd.f32 %v1221_v55, %v3397_v54  ;;  %v1250_v58 = vpop.f32.mrf.mxu1 }
  0xc2   : > { %v1251_v59 = vadd.f32 %v1250_v58, %v1222_v57  ;;  %1452 = vmatmul.bf16.gmra.mxu0 %v3179_v36 }
  0xc3   : > { %2678 = vmatmul.msk.bf16.gmra.mxu1 %vm1194_vm0, %v3322_v9 }
  0xc7   : > { %v1279_v62 = vpop.f32.mrf.mxu2  ;;  %v1223_v0 = vpop.f32.mrf.mxu0 }
  0xc8   : > { %v1280_v63 = vadd.f32 %v1279_v62, %v1251_v59  ;;  %v1308_v1 = vpop.f32.mrf.mxu3  ;;  %v1224_v2 = vadd.f32 %v1223_v0, %v3409_v61  ;;  %v1252_v3 = vpop.f32.mrf.mxu1 }
  0xca   : > { %v1309_v4 = vadd.f32 %v1308_v1, %v1280_v63  ;;  %v1253_v5 = vadd.f32 %v1252_v3, %v1224_v2 }
  0xcf   : > { %v1281_v44 = vpop.f32.mrf.mxu2  ;;  %v1226_v36 = vpop.f32.mrf.mxu0 }
  0xd0   : > { %v1282_v6 = vadd.f32 %v1281_v44, %v1253_v5  ;;  %v1310_v45 = vpop.f32.mrf.mxu3  ;;  %v1227_v7 = vadd.f32 %v1226_v36, %v717_v43  ;;  %v1255_v8 = vpop.f32.mrf.mxu1 }
  0xd2   : > { %v1311_v9 = vadd.f32 %v1310_v45, %v1282_v6  ;;  %v1256_v10 = vadd.f32 %v1255_v8, %v1227_v7  ;;  %1457 = vmatmul.bf16.gmra.mxu0 %v3248_v38 }
  0xd3   : > { %2679 = vmatmul.msk.bf16.gmra.mxu1 %vm1194_vm0, %v3348_v27 }
  0xd7   : > { %v1284_v12 = vpop.f32.mrf.mxu2  ;;  %v1228_v14 = vpop.f32.mrf.mxu0 }
  0xd8   : > { %v1285_v13 = vadd.f32 %v1284_v12, %v1256_v10  ;;  %v1313_v15 = vpop.f32.mrf.mxu3  ;;  %v1229_v16 = vadd.f32 %v1228_v14, %v722_v11  ;;  %v1257_v17 = vpop.f32.mrf.mxu1 }
  0xda   : > { %v1314_v18 = vadd.f32 %v1313_v15, %v1285_v13  ;;  %v1258_v19 = vadd.f32 %v1257_v17, %v1229_v16 }
  0xdf   : > { %v1286_v20 = vpop.f32.mrf.mxu2  ;;  %v3415_v22 = vpop.f32.mrf.mxu0 }
  0xe0   : > { %v1287_v21 = vadd.f32 %v1286_v20, %v1258_v19  ;;  %v1315_v32 = vpop.f32.mrf.mxu3  ;;  %v3417_v34 = vpop.f32.mrf.mxu1 }
  0xe2   : > { %v1316_v38 = vadd.f32 %v1315_v32, %v1287_v21 }
  0xe7   : > { %v3419_v23 = vpop.f32.mrf.mxu2  ;;  %v1233_v24 = vpop.f32.mrf.mxu0 }
  0xe8   : > { %v3421_v25 = vpop.f32.mrf.mxu3  ;;  %v1234_v26 = vadd.f32 %v1233_v24, %v732_v35  ;;  %v1262_v27 = vpop.f32.mrf.mxu1 }
  0xea   : > { %v1263_v28 = vadd.f32 %v1262_v27, %v1234_v26 }
  0xef   : > { %v1291_v29 = vpop.f32.mrf.mxu2  ;;  %v3423_v40 = vpop.f32.mrf.mxu0 }
  0xf0   : > { %v1292_v31 = vadd.f32 %v1291_v29, %v1263_v28  ;;  %v1320_v39 = vpop.f32.mrf.mxu3  ;;  %v1361_v41 = vpop.f32.mrf.mxu1 }
  0xf1   : > { %v1362_v28 = vadd.f32 %v1361_v41, %v3395_v53 }
  0xf2   : > { %v1321_v30 = vadd.f32 %v1320_v39, %v1292_v31 }
  0xf7   : > { %v1390_v33 = vpop.f32.mrf.mxu2  ;;  %v3425_v37 = vpop.f32.mrf.mxu0 }
  0xf8   : > { %v1419_v42 = vpop.f32.mrf.mxu3  ;;  %v1363_v55 = vpop.f32.mrf.mxu1  ;;  %v1391_v29 = vadd.f32 %v1390_v33, %v1362_v28 }
  0xff   : > { %v1392_v57 = vpop.f32.mrf.mxu2  ;;  %v1337_v58 = vpop.f32.mrf.mxu0 }
 0x100   : > { %v1421_v59 = vpop.f32.mrf.mxu3  ;;  %v3427_v62 = vadd.f32 %v1337_v58, %v1309_v4  ;;  %v1366_v63 = vpop.f32.mrf.mxu1 }
 0x107   : > { %v1395_v0 = vpop.f32.mrf.mxu2  ;;  %v1339_v1 = vpop.f32.mrf.mxu0 }
 0x108   : > { %v1424_v2 = vpop.f32.mrf.mxu3  ;;  %v3429_v3 = vadd.f32 %v1339_v1, %v1311_v9  ;;  %v3431_v5 = vpop.f32.mrf.mxu1 }
 0x10f   : > { %v3433_v44 = vpop.f32.mrf.mxu2  ;;  %v1342_v6 = vpop.f32.mrf.mxu0 }
 0x110   : > { %v3435_v36 = vpop.f32.mrf.mxu3  ;;  %v3437_v45 = vadd.f32 %v1342_v6, %v1314_v18  ;;  %v1371_v7 = vpop.f32.mrf.mxu1 }
 0x111   : > { %v1372_v8 = vadd.f32 %v1371_v7, %v717_v43 }
 0x117   : > { %v1400_v10 = vpop.f32.mrf.mxu2  ;;  %v1344_v12 = vpop.f32.mrf.mxu0 }
 0x118   : > { %v1401_v4 = vadd.f32 %v1400_v10, %v1372_v8  ;;  %v1429_v13 = vpop.f32.mrf.mxu3  ;;  %v3439_v14 = vadd.f32 %v1344_v12, %v1316_v38  ;;  %v1373_v15 = vpop.f32.mrf.mxu1  ;;  %v1219_v8 = vadd.f32 %v3389_v50, %v3407_v60  ;;  %v1420_v10 = vadd.f32 %v1419_v42, %v1391_v29 }
 0x119   : > { %v1374_v16 = vadd.f32 %v1373_v15, %v722_v11  ;;  %v1217_v11 = vadd.f32 %v3378_v46, %v3395_v53  ;;  %v1367_v42 = vadd.f32 %v1366_v63, %v3397_v54 }
 0x11a   : > { %v3441_v9 = vadd.f32 %v1429_v13, %v1401_v4 }
 0x11b   : > { %v1246_v7 = vadd.f32 %v3380_v48, %v1217_v11 }
 0x11d   : > { %v1275_v41 = vadd.f32 %v3387_v49, %v1246_v7 }
 0x11f   : > { %v1402_v17 = vpop.f32.mrf.mxu2  ;;  %v3443_v20 = vpop.f32.mrf.mxu0  ;;  %v1304_v33 = vadd.f32 %v3391_v51, %v1275_v41 }
 0x120   : > { %v1403_v19 = vadd.f32 %v1402_v17, %v1374_v16  ;;  %v1431_v21 = vpop.f32.mrf.mxu3  ;;  %v3445_v32 = vpop.f32.mrf.mxu1 }
 0x122   : > { %v3447_v18 = vadd.f32 %v1431_v21, %v1403_v19 }
 0x127   : > { %v3449_v43 = vpop.f32.mrf.mxu2  ;;  %v1349_v24 = vpop.f32.mrf.mxu0 }
 0x128   : > { %v3451_v26 = vpop.f32.mrf.mxu3  ;;  %v3453_v38 = vadd.f32 %v1349_v24, %v1321_v30  ;;  %v1378_v27 = vpop.f32.mrf.mxu1  ;;  %v1364_v30 = vadd.f32 %v1363_v55, %v3407_v60  ;;  %v3471_v60 = vadd.f32 %v3423_v40, %v1304_v33  ;;  %v2908_v33 = vmov 8192.0  }
 0x129   : > { %v1379_v31 = vadd.f32 %v1378_v27, %v732_v35  ;;  %v1248_v35 = vadd.f32 %v3393_v52, %v1219_v8  ;;  %2847 = vrcp.f32 %v2908_v33 }
 0x12a   : > { %v1393_v46 = vadd.f32 %v1392_v57, %v1364_v30  ;;  %v1396_v57 = vadd.f32 %v1395_v0, %v1367_v42  ;;  %v1522_v63 = vmul.f32 %v3471_v60, %v3471_v60 }
 0x12b   : > { %v1277_v13 = vadd.f32 %v3399_v47, %v1248_v35  ;;  %v692_v35 = vld [vmem:[%s3930_s3 + $0x30] sm:$0xff] }
 0x12c   : > { %v1422_v48 = vadd.f32 %v1421_v59, %v1393_v46  ;;  %v1425_v59 = vadd.f32 %v1424_v2, %v1396_v57 }
 0x12d   : > { %v1306_v49 = vadd.f32 %v3401_v56, %v1277_v13  ;;  %v1369_v56 = vadd.f32 %v3431_v5, %v3409_v61 }
 0x12f   : > { %v1407_v39 = vpop.f32.mrf.mxu2  ;;  %v1448_v6 = vpop.f32.mrf.mxu0  ;;  %v3478_v51 = vadd.f32 %v3425_v37, %v1306_v49  ;;  %v1398_v21 = vadd.f32 %v3433_v44, %v1369_v56 }
 0x130   : > { %v1408_v58 = vadd.f32 %v1407_v39, %v1379_v31  ;;  %v1436_v1 = vpop.f32.mrf.mxu3  ;;  %v1477_v4 = vpop.f32.mrf.mxu1  ;;  %v1449_v53 = vadd.f32 %v1448_v6, %v1420_v10 }
 0x131   : > { %v1524_v27 = vmul.f32 %v3478_v51, %v3478_v51  ;;  %v1427_v29 = vadd.f32 %v3435_v36, %v1398_v21  ;;  %v2848_v13 = vpop.eup %2847 }
 0x132   : > { %v3462_v12 = vadd.f32 %v1436_v1, %v1408_v58  ;;  %v3468_v15 = vadd.f32 %v1477_v4, %v1449_v53  ;;  %v1526_v1 = vmul.f32 %v3427_v62, %v3427_v62  ;;  %v1528_v4 = vmul.f32 %v3429_v3, %v3429_v3 }
 0x133   : > { %vm1518_vm1 = vweird.f32 %v2848_v13 }
 0x134   : > { %v1497_v52 = vadd.f32 %v3468_v15, %v3471_v60  ;;  %v1523_v40 = vmul.f32 %v3468_v15, %v3468_v15 }
 0x136   : > { %v1498_v17 = vadd.f32 %v1497_v52, %v3478_v51  ;;  %v1530_v24 = vadd.f32 %v1523_v40, %v1522_v63 }
 0x137   : > { %v1450_v50 = vpop.f32.mrf.mxu0 }
 0x138   : > { %v1451_v55 = vadd.f32 %v1450_v50, %v1422_v48  ;;  %v1479_v16 = vpop.f32.mrf.mxu1  ;;  %v1531_v61 = vadd.f32 %v1530_v24, %v1524_v27  ;;  %v1514_v48 = vmul.f32 8192.0, %v2848_v13  ;;  %v1842_v27 = vld [vmem:[%s578_s26 + $0x30] sm:$0xff] }
 0x139   : > { %1869 = vmatpush.msrb.mxu2 %v1842_v27  ;;  %v1625_v27 = vld [vmem:[%s3585_s22 + $0x28] sm:$0xff] }
 0x13a   : > { %v3480_v47 = vadd.f32 %v1479_v16, %v1451_v55  ;;  %v1515_v50 = vsub.f32 1.0, %v1514_v48 }
 0x13c   : > { %v1499_v0 = vadd.f32 %v1498_v17, %v3480_v47  ;;  %v1525_v28 = vmul.f32 %v3480_v47, %v3480_v47  ;;  %v1516_v49 = vmul.f32 %v2848_v13, %v1515_v50 }
 0x13e   : > { %v1500_v11 = vadd.f32 %v1499_v0, %v3427_v62  ;;  %v1532_v39 = vadd.f32 %v1531_v61, %v1525_v28  ;;  %v1843_v28 = vld [vmem:[%s578_s26 + $0x38] sm:$0xff]  ;;  %v1841_v61 = vld [vmem:[%s578_s26 + $0x28] sm:$0xff] }
 0x13f   : > { %v1453_v54 = vpop.f32.mrf.mxu0  ;;  %1898 = vmatpush.msrb.mxu3 %v1843_v28 }
 0x140   : > { %v1454_v19 = vadd.f32 %v1453_v54, %v1425_v59  ;;  %v1482_v37 = vpop.f32.mrf.mxu1  ;;  %v1533_v36 = vadd.f32 %v1532_v39, %v1526_v1  ;;  %v1517_v59 = vadd.f32 %v2848_v13, %v1516_v49  ;;  %v1839_v39 = vld [vmem:[%s578_s26 + $0x18] sm:$0xff]  ;;  %v1837_v1 = vld [vmem:[%s578_s26 + $0x8] sm:$0xff]  ;;  %v1820_v49 = vld [vmem:[%s3937_s10] sm:$0xff] }
 0x141   : > { %1899 = vmatpush.msrb.mxu3 %v1841_v61 }
 0x142   : > { %v3491_v2 = vadd.f32 %v1482_v37, %v1454_v19  ;;  %v1519_v0 = vsel %vm1518_vm1, %v2848_v13, %v1517_v59 }
 0x143   : > { %1900 = vmatpush.msrb.mxu3 %v1839_v39 }
 0x144   : > { %v1501_v5 = vadd.f32 %v1500_v11, %v3491_v2  ;;  %v1527_v6 = vmul.f32 %v3491_v2, %v3491_v2 }
 0x145   : > { %1901 = vmatpush.msrb.mxu3 %v1837_v1 }
 0x146   : > { %v1502_v8 = vadd.f32 %v1501_v5, %v3429_v3  ;;  %v1534_v10 = vadd.f32 %v1533_v36, %v1527_v6 }
 0x147   : > { %v1455_v31 = vpop.f32.mrf.mxu0 }
 0x148   : > { %v1456_v58 = vadd.f32 %v1455_v31, %v1427_v29  ;;  %v1484_v44 = vpop.f32.mrf.mxu1  ;;  %v1535_v46 = vadd.f32 %v1534_v10, %v1528_v4  ;;  %v1840_v29 = vld [vmem:[%s578_s26 + $0x20] sm:$0xff]  ;;  %v1838_v31 = vld [vmem:[%s578_s26 + $0x10] sm:$0xff] }
 0x149   : > { %1870 = vmatpush.msrb.mxu2 %v1840_v29 }
 0x14a   : > { %v3504_v7 = vadd.f32 %v1484_v44, %v1456_v58  ;;  %v1836_v44 = vld [vmem:[%s578_s26] sm:$0xff]  ;;  %s3593_s26 = scalar_lea.vmem %s3934_s7, %s3516_s23 }
 0x14b   : > { %1871 = vmatpush.msrb.mxu2 %v1838_v31  ;;  %v1630_v31 = vld [vmem:[%s3593_s26 + $0x10] sm:$0xff] }
 0x14c   : > { %v1503_v30 = vadd.f32 %v1502_v8, %v3504_v7  ;;  %v1529_v41 = vmul.f32 %v3504_v7, %v3504_v7  ;;  %v1832_v8 = vld [vmem:[%s3938_s11] sm:$0xff] }
 0x14d   : > { %1872 = vmatpush.msrb.mxu2 %v1836_v44  ;;  %2693 = vmatmul.msk.f32.vlgmr.msrb.gmra.mxu3 %vm3943_vm2, %v1832_v8 }
 0x14e   : > { %1504 = vadd.xlane.f32.xlu2 %v1503_v30  ;;  %v1536_v53 = vadd.f32 %v1535_v46, %v1529_v41  ;;  %2689 = vmatmul.msk.f32.vlgmr.msrb.gmra.mxu2 %vm3943_vm2, %v1832_v8  ;;  %v1833_v41 = vld [vmem:[%s3938_s11 + $0x8] sm:$0xff]  ;;  %v1834_v46 = vld [vmem:[%s3938_s11 + $0x10] sm:$0xff]  ;;  %v1595_v8 = vld [vmem:[%s3931_s4 + $0x38] sm:$0xff] }
 0x155   : > { %2694 = vmatmul.msk.f32.gmra.mxu3 %vm3943_vm2, %v1833_v41 }
 0x156   : > { %1537 = vadd.xlane.f32.xlu2 %v1536_v53  ;;  %2690 = vmatmul.msk.f32.gmra.mxu2 %vm3943_vm2, %v1833_v41  ;;  %v1835_v53 = vld [vmem:[%s3938_s11 + $0x18] sm:$0xff] }
 0x15d   : > { %2695 = vmatmul.msk.f32.gmra.mxu3 %vm3943_vm2, %v1834_v46 }
 0x15e   : > { %2691 = vmatmul.msk.f32.gmra.mxu2 %vm3943_vm2, %v1834_v46 }
 0x165   : > { %2696 = vmatmul.msk.f32.gmra.mxu3 %vm3943_vm2, %v1835_v53 }
 0x166   : > { %2692 = vmatmul.msk.f32.gmra.mxu2 %vm3943_vm2, %v1835_v53 }
 0x16e   : > { %726 = vperm.xlu2 %2846, %v692_v35  }
 0x1c1   : > { %v1505_v42 = vpop.xlane.xlu2 %1504 }
 0x1c2   : > { %v1506_v55 = vrot.slane %v1505_v42, 4 }
 0x1c4   : > { %v1507_v16 = vadd.f32 %v1506_v55, %v1505_v42 }
 0x1c6   : > { %v1508_v57 = vrot.slane %v1507_v16, 2 }
 0x1c8   : > { %v1509_v52 = vadd.f32 %v1508_v57, %v1507_v16  ;;  %v3579_v57 = vpop.f32.mrf.mxu2 }
 0x1c9   : > { %v1538_v40 = vpop.xlane.xlu2 %1537 }
 0x1ca   : > { %v1539_v17 = vrot.slane %v1538_v40, 4  ;;  %v1510_v54 = vrot.slane %v1509_v52, 1 }
 0x1cc   : > { %v1540_v63 = vadd.f32 %v1539_v17, %v1538_v40  ;;  %v1511_v56 = vadd.f32 %v1510_v54, %v1509_v52 }
 0x1ce   : > { %v1541_v19 = vrot.slane %v1540_v63, 2  ;;  %2826 = vpush %v1511_v56  ;;  %v1634_v56 = vld [vmem:[%s3593_s26 + $0x30] sm:$0xff] }
 0x1cf   : > { %2828 = vpush %v1519_v0  ;;  %v1627_v0 = vld [vmem:[%s3585_s22 + $0x38] sm:$0xff] }
 0x1d0   : > { %v1542_v37 = vadd.f32 %v1541_v19, %v1540_v63  ;;  %v1465_v17 = vpop.f32.mrf.mxu2  ;;  %v1626_v63 = vld [vmem:[%s3585_s22 + $0x30] sm:$0xff]  ;;  %v1635_v19 = vld [vmem:[%s3593_s26 + $0x38] sm:$0xff] }
 0x1d1   : > { %v727_v52 = vpop.permute.xlu2 %726 }
 0x1d2   : > { %v1543_v21 = vrot.slane %v1542_v37, 1  ;;  %v1232_v59 = vadd.f32 %v3415_v22, %v727_v52  ;;  %v1377_v40 = vadd.f32 %v3445_v32, %v727_v52  ;;  %v3602_v22 = vadd.f32 %v1465_v17, %v3462_v12  ;;  %v3616_v12 = vpop.f32.mrf.mxu3  ;;  %v1608_v52 = vld [vmem:[%s3932_s5 + $0x20] sm:$0xff] }
 0x1d4   : > { %v1544_v24 = vadd.f32 %v1543_v21, %v1542_v37  ;;  %v1261_v32 = vadd.f32 %v3417_v34, %v1232_v59  ;;  %v1406_v37 = vadd.f32 %v3449_v43, %v1377_v40  ;;  %v1624_v21 = vld [vmem:[%s3585_s22 + $0x20] sm:$0xff]  ;;  %v1623_v59 = vld [vmem:[%s3585_s22 + $0x18] sm:$0xff] }
 0x1d5   : > { %v1631_v40 = vld [vmem:[%s3593_s26 + $0x18] sm:$0xff] }
 0x1d6   : > { %2830 = vpush %v1544_v24  ;;  %v1632_v24 = vld [vmem:[%s3593_s26 + $0x20] sm:$0xff] }
 0x1ff   : > { %s2827_s27 = spop %2826 }
 0x200   : > { %s2829_s28 = spop %2828 }
 0x201   : > { %s3522_s29 = smul.f32 %s2829_s28, %s2827_s27 }
 0x203   : > { %s1555_s30 = smul.f32 %s3522_s29, %s3522_s29  ;;  %v1557_v54 = vstv %s3522_s29 }
 0x204   : > { %v1558_v28 = vsub.f32 %v3471_v60, %v1557_v54  ;;  %v1560_v29 = vsub.f32 %v3478_v51, %v1557_v54  ;;  %v1561_v61 = vsub.f32 %v3480_v47, %v1557_v54  ;;  %v1562_v34 = vsub.f32 %v3427_v62, %v1557_v54  ;;  %v1591_v51 = vld [vmem:[%s3931_s4 + $0x18] sm:$0xff]  ;;  %v1592_v62 = vld [vmem:[%s3931_s4 + $0x20] sm:$0xff] }
 0x205   : > { %v1563_v43 = vsub.f32 %v3491_v2, %v1557_v54  ;;  %v1564_v39 = vsub.f32 %v3429_v3, %v1557_v54  ;;  %v1593_v3 = vld [vmem:[%s3931_s4 + $0x28] sm:$0xff]  ;;  %v1642_v47 = vadd.f32 %v1634_v56, %v1626_v63  ;;  %v1643_v2 = vadd.f32 %v1635_v19, %v1627_v0 }
 0x206   : > { %v1609_v19 = vld [vmem:[%s3932_s5 + $0x28] sm:$0xff] }
 0x207   : > { %s2831_s16 = spop %2830 }
 0x208   : > { %s1554_s17 = smul.f32 %s2831_s16, %s2829_s28  ;;  %s3799_s16 = scalar_lea.vmem %s3942_s15, %s3516_s23 }
 0x20a   : > { %s1556_s21 = ssub.f32 %s1554_s17, %s1555_s30  ;;  %s573_s30 = scalar_lea.vmem %s3935_s8, %s3516_s23 }
 0x20b   : > { %v3550_v35 = vld [vmem:[%s573_s30 + $0x30] sm:$0xff]  ;;  %v3552_v33 = vld [vmem:[%s573_s30 + $0x38] sm:$0xff]  ;;  %v3556_v13 = vld [vmem:[%s573_s30 + $0x20] sm:$0xff] }
 0x20c   : > { %s1566_s18 = sadd.f32 1e-05, %s1556_s21  ;;  %1939 = vmatpush.msra.mxu2 %v3550_v35  ;;  %1968 = vmatpush.msra.mxu3 %v3552_v33  ;;  %v3558_v48 = vld [vmem:[%s573_s30 + $0x28] sm:$0xff]  ;;  %v3562_v50 = vld [vmem:[%s573_s30 + $0x10] sm:$0xff]  ;;  %v3564_v42 = vld [vmem:[%s573_s30 + $0x18] sm:$0xff] }
 0x20d   : > { %v3568_v55 = vld [vmem:[%s573_s30] sm:$0xff]  ;;  %v3570_v16 = vld [vmem:[%s573_s30 + $0x8] sm:$0xff]  ;;  %s3908_s30 = scalar_lea.vmem %s3941_s14, %s3516_s23 }
 0x20e   : > { %v1567_v11 = vstv %s1566_s18  ;;  %1940 = vmatpush.msra.mxu2 %v3556_v13  ;;  %1969 = vmatpush.msra.mxu3 %v3558_v48 }
 0x20f   : > { %2849 = vrsqrt.f32 %v1567_v11  ;;  %vm1574_vm4 = vweird.f32 %v1567_v11 }
 0x210   : > { %1941 = vmatpush.msra.mxu2 %v3562_v50  ;;  %1970 = vmatpush.msra.mxu3 %v3564_v42  ;;  %2851 = vtanh.f32 %v3439_v14  ;;  %v1622_v14 = vld [vmem:[%s3585_s22 + $0x10] sm:$0xff] }
 0x211   : > { %2853 = vtanh.f32 %v3453_v38 }
 0x212   : > { %1942 = vmatpush.msra.mxu2 %v3568_v55  ;;  %1971 = vmatpush.msra.mxu3 %v3570_v16 }
 0x213   : > { %2697 = vmatmul.msk.f32.vlgmr.msra.gmra.mxu2 %vm3943_vm2, %v1820_v49  ;;  %2701 = vmatmul.msk.f32.vlgmr.msra.gmra.mxu3 %vm3943_vm2, %v1820_v49  ;;  %v1588_v49 = vld [vmem:[%s3931_s4] sm:$0xff] }
 0x215   : > { %v2850_v5 = vpop.eup %2849 }
 0x216   : > { %v1569_v58 = vmul.f32 %v2850_v5, %v1567_v11  ;;  %vm1575_vm3 = vweird.f32 %v2850_v5  ;;  %v1559_v11 = vsub.f32 %v3468_v15, %v1557_v54  ;;  %v1590_v15 = vld [vmem:[%s3931_s4 + $0x10] sm:$0xff]  ;;  %v3651_v17 = vpop.eup %2851 }
 0x217   : > { %vm1576_vm5 = vmor %vm1574_vm4, %vm1575_vm3 }
 0x218   : > { %v1570_v6 = vmul.f32 %v2850_v5, %v1569_v58  ;;  %v1565_v58 = vsub.f32 %v3504_v7, %v1557_v54  ;;  %v1640_v7 = vadd.f32 %v1632_v24, %v1624_v21  ;;  %v1610_v21 = vld [vmem:[%s3932_s5 + $0x30] sm:$0xff]  ;;  %v1611_v24 = vld [vmem:[%s3932_s5 + $0x38] sm:$0xff] }
 0x21a   : > { %v1571_v30 = vmul.f32 0.5, %v1570_v6  ;;  %v1594_v6 = vld [vmem:[%s3931_s4 + $0x30] sm:$0xff] }
 0x21c   : > { %v1572_v36 = vsub.f32 1.5, %v1571_v30  ;;  %v1606_v30 = vld [vmem:[%s3932_s5 + $0x10] sm:$0xff] }
 0x21e   : > { %v1573_v10 = vmul.f32 %v2850_v5, %v1572_v36 }
 0x220   : > { %v1577_v4 = vsel %vm1576_vm5, %v2850_v5, %v1573_v10  ;;  %v1633_v5 = vld [vmem:[%s3593_s26 + $0x28] sm:$0xff]  ;;  %v1638_v10 = vadd.f32 %v1630_v31, %v1622_v14  ;;  %v3671_v31 = vpop.f32.mrf.mxu0 }
 0x221   : > { %2832 = vpush %v1577_v4  ;;  %v1641_v36 = vadd.f32 %v1633_v5, %v1625_v27  ;;  %v1589_v27 = vld [vmem:[%s3931_s4 + $0x8] sm:$0xff]  ;;  %v1607_v5 = vld [vmem:[%s3932_s5 + $0x18] sm:$0xff] }
 0x222   : > { %v1821_v14 = vld [vmem:[%s3937_s10 + $0x8] sm:$0xff] }
 0x223   : > { %2698 = vmatmul.msk.f32.gmra.mxu2 %vm3943_vm2, %v1821_v14  ;;  %2702 = vmatmul.msk.f32.gmra.mxu3 %vm3943_vm2, %v1821_v14 }
 0x252   : > { %s2833_s29 = spop %2832 }
 0x253   : > { %v1579_v60 = vstv %s2833_s29 }
 0x254   : > { %v1582_v44 = vmul.f32 %v1579_v60, %v1560_v29  ;;  %v1583_v1 = vmul.f32 %v1579_v60, %v1561_v61  ;;  %v1584_v4 = vmul.f32 %v1579_v60, %v1562_v34  ;;  %v1585_v41 = vmul.f32 %v1579_v60, %v1563_v43 }
 0x255   : > { %v1586_v46 = vmul.f32 %v1579_v60, %v1564_v39  ;;  %v1587_v53 = vmul.f32 %v1579_v60, %v1565_v58  ;;  %v1580_v54 = vmul.f32 %v1579_v60, %v1558_v28  ;;  %v1581_v63 = vmul.f32 %v1579_v60, %v1559_v11 }
 0x256   : > { %v1598_v56 = vmul.f32 %v1590_v15, %v1582_v44  ;;  %v1599_v0 = vmul.f32 %v1591_v51, %v1583_v1  ;;  %v1600_v28 = vmul.f32 %v1592_v62, %v1584_v4  ;;  %v1601_v11 = vmul.f32 %v1593_v3, %v1585_v41  ;;  %v1494_v41 = vpop.f32.mrf.mxu3 }
 0x257   : > { %v1602_v29 = vmul.f32 %v1594_v6, %v1586_v46  ;;  %v1603_v61 = vmul.f32 %v1595_v8, %v1587_v53  ;;  %v1290_v34 = vadd.f32 %v3419_v23, %v1261_v32  ;;  %v1435_v43 = vadd.f32 %v3451_v26, %v1406_v37  ;;  %v1620_v8 = vld [vmem:[%s3585_s22] sm:$0xff]  ;;  %v3683_v46 = vpop.f32.mrf.mxu1 }
 0x258   : > { %v1614_v39 = vadd.f32 %v1606_v30, %v1598_v56  ;;  %v1639_v58 = vadd.f32 %v1631_v40, %v1623_v59  ;;  %v1616_v15 = vadd.f32 %v1608_v52, %v1600_v28  ;;  %v1617_v60 = vadd.f32 %v1609_v19, %v1601_v11  ;;  %v1628_v23 = vld [vmem:[%s3593_s26] sm:$0xff]  ;;  %v1621_v59 = vld [vmem:[%s3585_s22 + $0x8] sm:$0xff]  ;;  %s2117_s22 = ssub.f32 1.0, %s3692_s24 }
 0x259   : > { %v1618_v51 = vadd.f32 %v1610_v21, %v1602_v29  ;;  %v1619_v62 = vadd.f32 %v1611_v24, %v1603_v61  ;;  %v1596_v3 = vmul.f32 %v1588_v49, %v1580_v54  ;;  %v1597_v44 = vmul.f32 %v1589_v27, %v1581_v63  ;;  %v1604_v26 = vld [vmem:[%s3932_s5] sm:$0xff]  ;;  %v1605_v49 = vld [vmem:[%s3932_s5 + $0x8] sm:$0xff]  ;;  %v3702_v24 = vpop.eup %2853 }
 0x25a   : > { %v1615_v1 = vadd.f32 %v1607_v5, %v1599_v0  ;;  %v1646_v6 = vadd.f32 %v1638_v10, %v1614_v39  ;;  %v1648_v30 = vadd.f32 %v1640_v7, %v1616_v15  ;;  %v1649_v4 = vadd.f32 %v1641_v36, %v1617_v60  ;;  %v1629_v40 = vld [vmem:[%s3593_s26 + $0x8] sm:$0xff]  ;;  %v1822_v0 = vld [vmem:[%s3937_s10 + $0x10] sm:$0xff] }
 0x25b   : > { %v1650_v32 = vadd.f32 %v1642_v47, %v1618_v51  ;;  %v1651_v37 = vadd.f32 %v1643_v2, %v1619_v62  ;;  %v1319_v53 = vadd.f32 %v3421_v25, %v1290_v34  ;;  %v1464_v10 = vadd.f32 %v3579_v57, %v1435_v43  ;;  %2699 = vmatmul.msk.f32.gmra.mxu2 %vm3943_vm2, %v1822_v0 }
 0x25c   : > { %v2683_v52 = vmul.f32 -1.442695, %v1646_v6  ;;  %v2685_v7 = vmul.f32 -1.442695, %v1648_v30  ;;  %v1636_v36 = vadd.f32 %v1628_v23, %v1620_v8  ;;  %v1612_v54 = vadd.f32 %v1604_v26, %v1596_v3  ;;  %2703 = vmatmul.msk.f32.gmra.mxu3 %vm3943_vm2, %v1822_v0 }
 0x25d   : > { %v2687_v47 = vmul.f32 -1.442695, %v1650_v32  ;;  %v2688_v2 = vmul.f32 -1.442695, %v1651_v37  ;;  %v2686_v38 = vmul.f32 -1.442695, %v1649_v4  ;;  %v1647_v63 = vadd.f32 %v1639_v58, %v1615_v1 }
 0x25e   : > { %2855 = vpow2.f32 %v2683_v52  ;;  %v1495_v25 = vadd.f32 %v1494_v41, %v3602_v22  ;;  %v1613_v57 = vadd.f32 %v1605_v49, %v1597_v44  ;;  %v1637_v56 = vadd.f32 %v1629_v40, %v1621_v59  ;;  %v1460_v22 = vpop.f32.mrf.mxu0 }
 0x25f   : > { %2857 = vpow2.f32 %v2687_v47  ;;  %v1348_v19 = vadd.f32 %v3443_v20, %v1319_v53  ;;  %v1493_v21 = vadd.f32 %v3616_v12, %v1464_v10  ;;  %v2684_v27 = vmul.f32 -1.442695, %v1647_v63  ;;  %v1489_v14 = vpop.f32.mrf.mxu1 }
 0x260   : > { %2859 = vpow2.f32 %v2688_v2  ;;  %v1644_v28 = vadd.f32 %v1636_v36, %v1612_v54  ;;  %v1645_v11 = vadd.f32 %v1637_v56, %v1613_v57  ;;  %v1461_v61 = vadd.f32 %v1460_v22, %v3447_v18  ;;  %v1823_v18 = vld [vmem:[%s3937_s10 + $0x18] sm:$0xff] }
 0x261   : > { %2861 = vpow2.f32 %v2685_v7  ;;  %v3708_v34 = vstv %s3692_s24 }
 0x262   : > { %2863 = vpow2.f32 %v2686_v38  ;;  %v2681_v39 = vmul.f32 -1.442695, %v1644_v28  ;;  %v2682_v60 = vmul.f32 -1.442695, %v1645_v11  ;;  %v3722_v3 = vadd.f32 %v1489_v14, %v1461_v61 }
 0x263   : > { %2865 = vtanh.f32 %v1495_v25  ;;  %2700 = vmatmul.msk.f32.gmra.mxu2 %vm3943_vm2, %v1823_v18  ;;  %v3726_v44 = vmul.f32 %v3708_v34, %v3550_v35  ;;  %v3734_v6 = vmul.f32 %v3708_v34, %v3552_v33  ;;  %v3747_v4 = vmul.f32 %v3708_v34, %v3556_v13 }
 0x264   : > { %v2856_v29 = vpop.eup %2855  ;;  %2867 = vtanh.f32 %v1348_v19  ;;  %2704 = vmatmul.msk.f32.gmra.mxu3 %vm3943_vm2, %v1823_v18  ;;  %v3754_v10 = vmul.f32 %v3708_v34, %v3558_v48  ;;  %v3758_v49 = vmul.f32 %v3708_v34, %v3562_v50 }
 0x265   : > { %v2858_v20 = vpop.eup %2857  ;;  %2869 = vtanh.f32 %v1493_v21  ;;  %v3705_v5 = vadd.f32 1.0, %v2856_v29 }
 0x266   : > { %v2860_v12 = vpop.eup %2859  ;;  %v3710_v43 = vadd.f32 1.0, %v2858_v20  ;;  %2871 = vpow2.f32 %v2684_v27 }
 0x267   : > { %v2862_v58 = vpop.eup %2861  ;;  %v3712_v15 = vadd.f32 1.0, %v2860_v12  ;;  %2873 = vrcp.f32 %v3705_v5  ;;  %v1723_v41 = vand.u32 2147483647, %v3705_v5  ;;  %vm1719_vm6 = vweird.f32 %v3705_v5 }
 0x268   : > { %v2864_v51 = vpop.eup %2863  ;;  %2875 = vrcp.f32 %v3710_v43  ;;  %v3736_v8 = vadd.f32 1.0, %v2862_v58  ;;  %v1783_v35 = vand.u32 2147483647, %v3710_v43  ;;  %v1785_v32 = vand.u32 2147483648, %v3710_v43 }
 0x269   : > { %v3720_v62 = vpop.eup %2865  ;;  %2877 = vrcp.f32 %v3712_v15  ;;  %v3738_v23 = vadd.f32 1.0, %v2864_v51  ;;  %v1800_v37 = vand.u32 2147483648, %v3712_v15  ;;  %v1798_v33 = vand.u32 2147483647, %v3712_v15 }
 0x26a   : > { %v3730_v1 = vpop.eup %2867  ;;  %2879 = vpow2.f32 %v2681_v39  ;;  %vm1779_vm7 = vweird.f32 %v3710_v43  ;;  %vm1794_vm8 = vweird.f32 %v3712_v15  ;;  %v1755_v52 = vand.u32 2147483648, %v3736_v8 }
 0x26b   : > { %v3740_v26 = vpop.eup %2869  ;;  %2881 = vpow2.f32 %v2682_v60  ;;  %vm3767_vm9 = vcmp.eq.f32.partialorder %v1783_v35, 8.507059e+37  ;;  %v1786_v50 = vor.u32 1.1754944e-38, %v1785_v32  ;;  %v1801_v2 = vor.u32 1.1754944e-38, %v1800_v37 }
 0x26c   : > { %v2872_v30 = vpop.eup %2871  ;;  %2883 = vrcp.f32 %v3736_v8  ;;  %v1753_v7 = vand.u32 2147483647, %v3736_v8  ;;  %vm3773_vm10 = vcmp.eq.f32.partialorder %v1798_v33, 8.507059e+37  ;;  %vm3777_vm11 = vcmp.eq.f32.partialorder %v1723_v41, 8.507059e+37 }
 0x26d   : > { %v2874_v53 = vpop.eup %2873  ;;  %2885 = vrcp.f32 %v3738_v23  ;;  %v1725_v57 = vand.u32 2147483648, %v3705_v5  ;;  %vm1749_vm12 = vweird.f32 %v3736_v8  ;;  %v1768_v19 = vand.u32 2147483647, %v3738_v23 }
 0x26e   : > { %v2876_v13 = vpop.eup %2875  ;;  %v1715_v59 = vmul.f32 %v2874_v53, %v3705_v5  ;;  %v1770_v21 = vand.u32 2147483648, %v3738_v23  ;;  %v3785_v22 = vadd.f32 1.0, %v2872_v30  ;;  %v1756_v11 = vor.u32 1.1754944e-38, %v1755_v52 }
 0x26f   : > { %v2878_v40 = vpop.eup %2877  ;;  %v1775_v48 = vmul.f32 %v2876_v13, %v3710_v43  ;;  %vm1720_vm14 = vweird.f32 %v2874_v53  ;;  %vm1780_vm15 = vweird.f32 %v2876_v13  ;;  %vm3789_vm0 = vcmp.eq.f32.partialorder %v1753_v7, 8.507059e+37 }
 0x270   : > { %v2880_v36 = vpop.eup %2879  ;;  %v1790_v54 = vmul.f32 %v2878_v40, %v3712_v15  ;;  %v1716_v63 = vsub.f32 1.0, %v1715_v59  ;;  %2887 = vrcp.f32 %v3785_v22  ;;  %vm1795_vm1 = vweird.f32 %v2878_v40  ;;  %vm1721_vm3 = vmor %vm1719_vm6, %vm1720_vm14 }
 0x271   : > { %v2882_v56 = vpop.eup %2881  ;;  %v1776_v0 = vsub.f32 1.0, %v1775_v48  ;;  %v1726_v35 = vor.u32 1.1754944e-38, %v1725_v57  ;;  %v3803_v32 = vadd.f32 1.0, %v2880_v36  ;;  %vm1781_vm4 = vmor %vm1779_vm7, %vm1780_vm15  ;;  %vm3952_vm6 = vweird.f32 %v3738_v23 }
 0x272   : > { %v2884_v27 = vpop.eup %2883  ;;  %v1791_v28 = vsub.f32 1.0, %v1790_v54  ;;  %v1717_v29 = vmul.f32 %v2874_v53, %v1716_v63  ;;  %vm1796_vm2 = vmor %vm1794_vm8, %vm1795_vm1  ;;  %v1771_v54 = vor.u32 1.1754944e-38, %v1770_v21  ;;  %vm1769_vm8 = vcmp.eq.f32.partialorder %v1768_v19, 8.507059e+37 }
 0x273   : > { %v2886_v20 = vpop.eup %2885  ;;  %v1777_v61 = vmul.f32 %v2876_v13, %v1776_v0  ;;  %v1745_v12 = vmul.f32 %v2884_v27, %v3736_v8  ;;  %vm1750_vm5 = vweird.f32 %v2884_v27  ;;  %2889 = vrcp.f32 %v3803_v32 }
 0x274   : > { %v1792_v39 = vmul.f32 %v2878_v40, %v1791_v28  ;;  %v1760_v58 = vmul.f32 %v2886_v20, %v3738_v23  ;;  %v1718_v60 = vadd.f32 %v2874_v53, %v1717_v29  ;;  %vm1765_vm13 = vweird.f32 %v2886_v20 }
 0x275   : > { %v1778_v18 = vadd.f32 %v2876_v13, %v1777_v61  ;;  %v1746_v51 = vsub.f32 1.0, %v1745_v12  ;;  %vm1766_vm7 = vmor %vm3952_vm6, %vm1765_vm13  ;;  %2891 = vtanh.f32 %v3722_v3  ;;  %v1738_v3 = vand.u32 2147483647, %v3785_v22 }
 0x276   : > { %v1793_v37 = vadd.f32 %v2878_v40, %v1792_v39  ;;  %v1761_v30 = vsub.f32 1.0, %v1760_v58  ;;  %v1722_v33 = vsel %vm1721_vm3, %v2874_v53, %v1718_v60  ;;  %v2888_v53 = vpop.eup %2887  ;;  %v2104_v28 = vmul.f32 %v3708_v34, %v3564_v42 }
 0x277   : > { %v1782_v41 = vsel %vm1781_vm4, %v2876_v13, %v1778_v18  ;;  %v1747_v52 = vmul.f32 %v2884_v27, %v1746_v51  ;;  %v1727_v5 = vsel %vm3777_vm11, %v1726_v35, %v1722_v33  ;;  %v1693_v42 = vand.u32 2147483647, %v3803_v32 }
 0x278   : > { %v1787_v43 = vsel %vm3767_vm9, %v1786_v50, %v1782_v41  ;;  %v1797_v59 = vsel %vm1796_vm2, %v2878_v40, %v1793_v37  ;;  %v1762_v48 = vmul.f32 %v2886_v20, %v1761_v30  ;;  %v1814_v7 = vmul.f32 %v3651_v17, %v1727_v5  ;;  %2145 = vst [vmem:[%s3799_s16 + $0x10] sm:$0xff] %v1727_v5  ;;  %vm1751_vm2 = vmor %vm1749_vm12, %vm1750_vm5  ;;  %v1985_v37 = vld [vmem:[%s3939_s12] sm:$0xff] }
 0x279   : > { %v1818_v13 = vmul.f32 %v3702_v24, %v1787_v43  ;;  %2013 = vmatpush.msrb.mxu0 %v1787_v43  ;;  %2149 = vst [vmem:[%s3799_s16 + $0x30] sm:$0xff] %v1787_v43  ;;  %v1802_v15 = vsel %vm3773_vm10, %v1801_v2, %v1797_v59  ;;  %v1748_v36 = vadd.f32 %v2884_v27, %v1747_v52  ;;  %v3828_v24 = vadd.f32 1.0, %v2882_v56 }
 0x27a   : > { %v1819_v63 = vmul.f32 %v3720_v62, %v1802_v15  ;;  %2042 = vmatpush.msrb.mxu1 %v1802_v15  ;;  %2150 = vst [vmem:[%s3799_s16 + $0x38] sm:$0xff] %v1802_v15  ;;  %v1763_v17 = vadd.f32 %v2886_v20, %v1762_v48  ;;  %v3826_v40 = vadd.f32 %v3758_v49, %v1814_v7  ;;  %vm1735_vm9 = vweird.f32 %v2888_v53  ;;  %v1874_v15 = vpop.f32.mrf.mxu2 }
 0x27b   : > { %v3831_v47 = vadd.f32 %v3726_v44, %v1818_v13  ;;  %v1752_v50 = vsel %vm1751_vm2, %v2884_v27, %v1748_v36  ;;  %v1730_v62 = vmul.f32 %v2888_v53, %v3785_v22  ;;  %2893 = vrcp.f32 %v3828_v24  ;;  %v1986_v13 = vld [vmem:[%s3939_s12 + $0x8] sm:$0xff]  ;;  %v1903_v36 = vpop.f32.mrf.mxu3 }
 0x27c   : > { %v3839_v8 = vadd.f32 %v3734_v6, %v1819_v63  ;;  %v1757_v49 = vsel %vm3789_vm0, %v1756_v11, %v1752_v50  ;;  %v1767_v2 = vsel %vm1766_vm7, %v2886_v20, %v1763_v17  ;;  %v1740_v6 = vand.u32 2147483648, %v3785_v22 }
 0x27d   : > { %v1816_v44 = vmul.f32 %v3730_v1, %v1757_v49  ;;  %2014 = vmatpush.msrb.mxu0 %v1757_v49  ;;  %2147 = vst [vmem:[%s3799_s16 + $0x20] sm:$0xff] %v1757_v49  ;;  %v1772_v38 = vsel %vm1769_vm8, %v1771_v54, %v1767_v2  ;;  %v1731_v25 = vsub.f32 1.0, %v1730_v62  ;;  %v1459_v1 = vadd.f32 %v3671_v31, %v3441_v9 }
 0x27e   : > { %v1817_v57 = vmul.f32 %v3740_v26, %v1772_v38  ;;  %2043 = vmatpush.msrb.mxu1 %v1772_v38  ;;  %2148 = vst [vmem:[%s3799_s16 + $0x28] sm:$0xff] %v1772_v38  ;;  %v2890_v26 = vpop.eup %2889  ;;  %vm1734_vm10 = vweird.f32 %v3785_v22  ;;  %v1741_v21 = vor.u32 1.1754944e-38, %v1740_v6  ;;  %vm1739_vm12 = vcmp.eq.f32.partialorder %v1738_v3, 8.507059e+37  ;;  %v2074_v6 = vpop.permute.xlu1 %2073 }
 0x27f   : > { %v3853_v56 = vadd.f32 %v3747_v4, %v1816_v44  ;;  %2015 = vmatpush.msrb.mxu0 %v1727_v5  ;;  %v1732_v23 = vmul.f32 %v2888_v53, %v1731_v25  ;;  %vm1736_vm11 = vmor %vm1734_vm10, %vm1735_vm9  ;;  %v1685_v4 = vmul.f32 %v2890_v26, %v3803_v32  ;;  %v2892_v27 = vpop.eup %2891  ;;  %v1488_v9 = vadd.f32 %v3683_v46, %v1459_v1 }
 0x280   : > { %v3859_v0 = vadd.f32 %v3754_v10, %v1817_v57  ;;  %2895 = vtanh.f32 %v3437_v45  ;;  %v1695_v22 = vand.u32 2147483648, %v3803_v32  ;;  %vm1690_vm13 = vweird.f32 %v2890_v26 }
 0x281   : > { %v1733_v19 = vadd.f32 %v2888_v53, %v1732_v23  ;;  %v2894_v29 = vpop.eup %2893  ;;  %v1686_v10 = vsub.f32 1.0, %v1685_v4  ;;  %2897 = vtanh.f32 %v1488_v9  ;;  %vm1689_vm14 = vweird.f32 %v3803_v32 }
 0x282   : > { %v1700_v61 = vmul.f32 %v2894_v29, %v3828_v24  ;;  %v1710_v45 = vand.u32 2147483648, %v3828_v24  ;;  %vm1691_vm15 = vmor %vm1689_vm14, %vm1690_vm13  ;;  %v1696_v58 = vor.u32 1.1754944e-38, %v1695_v22  ;;  %vm1705_vm0 = vweird.f32 %v2894_v29  ;;  %v1877_v54 = vpop.f32.mrf.mxu2 }
 0x283   : > { %v1737_v11 = vsel %vm1736_vm11, %v2888_v53, %v1733_v19  ;;  %v1687_v12 = vmul.f32 %v2890_v26, %v1686_v10  ;;  %v1708_v18 = vand.u32 2147483647, %v3828_v24  ;;  %v2101_v51 = vmul.f32 %v3708_v34, %v3568_v55  ;;  %v1906_v63 = vpop.f32.mrf.mxu3  ;;  %v2079_v10 = vpop.permute.xlu0 %2078 }
 0x284   : > { %v1742_v31 = vsel %vm1739_vm12, %v1741_v21, %v1737_v11  ;;  %v1701_v39 = vsub.f32 1.0, %v1700_v61  ;;  %vm1694_vm1 = vcmp.eq.f32.partialorder %v1693_v42, 8.507059e+37  ;;  %vm1704_vm3 = vweird.f32 %v3828_v24 }
 0x285   : > { %v1815_v20 = vmul.f32 %v2892_v27, %v1742_v31  ;;  %2044 = vmatpush.msrb.mxu1 %v1742_v31  ;;  %2146 = vst [vmem:[%s3799_s16 + $0x18] sm:$0xff] %v1742_v31  ;;  %v1688_v46 = vadd.f32 %v2890_v26, %v1687_v12  ;;  %vm1706_vm4 = vmor %vm1704_vm3, %vm1705_vm0  ;;  %v1711_v52 = vor.u32 1.1754944e-38, %v1710_v45  ;;  %v2102_v55 = vmul.f32 %v3708_v34, %v3570_v16  ;;  %v1987_v16 = vld [vmem:[%s3939_s12 + $0x10] sm:$0xff]  ;;  %v1988_v34 = vld [vmem:[%s3939_s12 + $0x18] sm:$0xff] }
 0x286   : > { %v1702_v60 = vmul.f32 %v2894_v29, %v1701_v39  ;;  %v2896_v30 = vpop.eup %2895  ;;  %vm1709_vm5 = vcmp.eq.f32.partialorder %v1708_v18, 8.507059e+37  ;;  %vm3953_vm2 = vcmask 261120   ;;  %v2118_v3 = vstv %s2117_s22 }
 0x287   : > { %v3871_v14 = vadd.f32 %v2104_v28, %v1815_v20  ;;  %v1692_v35 = vsel %vm1691_vm15, %v2890_v26, %v1688_v46  ;;  %v2898_v43 = vpop.eup %2897  ;;  %vm3954_vm6 = vmmov %vm3953_vm2 }
 0x288   : > { %v1697_v32 = vsel %vm1694_vm1, %v1696_v58, %v1692_v35  ;;  %v1703_v33 = vadd.f32 %v2894_v29, %v1702_v60  ;;  %vm3955_vm7 = vmmov %vm3953_vm2 }
 0x289   : > { %v1812_v41 = vmul.f32 %v2896_v30, %v1697_v32  ;;  %2016 = vmatpush.msrb.mxu0 %v1697_v32  ;;  %2143 = vst [vmem:[%s3799_s16] sm:$0xff] %v1697_v32  ;;  %vm3956_vm8 = vmmov %vm3953_vm2  ;;  %v2084_v30 = vpop.permute.xlu1 %2083 }
 0x28a   : > { %v1707_v5 = vsel %vm1706_vm4, %v2894_v29, %v1703_v33  ;;  %2705 = vmatmul.msk.f32.vlgmr.msrb.gmra.mxu0 %vm3953_vm2, %v1985_v37  ;;  %vm3957_vm9 = vmmov %vm3953_vm2  ;;  %v1880_v17 = vpop.f32.mrf.mxu2 }
 0x28b   : > { %v2109_v59 = vadd.f32 %v2101_v51, %v1812_v41  ;;  %v1712_v48 = vsel %vm1709_vm5, %v1711_v52, %v1707_v5  ;;  %vm3958_vm10 = vmmov %vm3953_vm2  ;;  %v1909_v24 = vpop.f32.mrf.mxu3 }
 0x28c   : > { %v1813_v7 = vmul.f32 %v2898_v43, %v1712_v48  ;;  %2045 = vmatpush.msrb.mxu1 %v1712_v48  ;;  %2144 = vst [vmem:[%s3799_s16 + $0x8] sm:$0xff] %v1712_v48  ;;  %vm3959_vm11 = vmmov %vm3953_vm2 }
 0x28d   : > { %2709 = vmatmul.msk.f32.vlgmr.msrb.gmra.mxu1 %vm3954_vm6, %v1985_v37  ;;  %vm3960_vm12 = vmmov %vm3953_vm2 }
 0x28e   : > { %v2110_v53 = vadd.f32 %v2102_v55, %v1813_v7 }
 0x292   : > { %2706 = vmatmul.msk.f32.gmra.mxu0 %vm3955_vm7, %v1986_v13  ;;  %v1883_v50 = vpop.f32.mrf.mxu2 }
 0x293   : > { %v1912_v62 = vpop.f32.mrf.mxu3 }
 0x295   : > { %2710 = vmatmul.msk.f32.gmra.mxu1 %vm3956_vm8, %v1986_v13 }
 0x29a   : > { %2707 = vmatmul.msk.f32.gmra.mxu0 %vm3957_vm9, %v1987_v16  ;;  %v1944_v49 = vpop.f32.mrf.mxu2 }
 0x29b   : > { %v1973_v2 = vpop.f32.mrf.mxu3  ;;  %v1945_v44 = vadd.f32 %v1944_v49, %v1874_v15 }
 0x29c   : > { %v1974_v23 = vadd.f32 %v1973_v2, %v1903_v36 }
 0x29d   : > { %2711 = vmatmul.msk.f32.gmra.mxu1 %vm3958_vm10, %v1987_v16 }
 0x2a2   : > { %2708 = vmatmul.msk.f32.gmra.mxu0 %vm3959_vm11, %v1988_v34 }
 0x2a5   : > { %2712 = vmatmul.msk.f32.gmra.mxu1 %vm3960_vm12, %v1988_v34 }
 0x2a6   : > { %v1947_v25 = vpop.f32.mrf.mxu2  ;;  %v1976_v19 = vpop.f32.mrf.mxu3 }
 0x2a7   : > { %v1948_v11 = vadd.f32 %v1947_v25, %v1877_v54  ;;  %v1977_v22 = vadd.f32 %v1976_v19, %v1906_v63 }
 0x2de   : > { %v1950_v61 = vpop.f32.mrf.mxu2 }
 0x2df   : > { %v1979_v45 = vpop.f32.mrf.mxu3  ;;  %v1951_v18 = vadd.f32 %v1950_v61, %v1880_v17 }
 0x2e0   : > { %v1980_v33 = vadd.f32 %v1979_v45, %v1909_v24 }
 0x2e6   : > { %v1953_v5 = vpop.f32.mrf.mxu2 }
 0x2e7   : > { %v1954_v48 = vadd.f32 %v1953_v5, %v1883_v50  ;;  %v1982_v7 = vpop.f32.mrf.mxu3 }
 0x2e8   : > { %v1983_v15 = vadd.f32 %v1982_v7, %v1912_v62 }
 0x307   : > { %v2018_v38 = vpop.f32.mrf.mxu0 }
 0x308   : > { %v2059_v57 = vadd.f32 %v2018_v38, %v1945_v44 }
 0x30a   : > { %v2091_v1 = vadd.f32 %v2074_v6, %v2059_v57  ;;  %v2047_v26 = vpop.f32.mrf.mxu1 }
 0x30b   : > { %v2060_v21 = vadd.f32 %v2047_v26, %v1974_v23 }
 0x30c   : > { %v2119_v4 = vmul.f32 %v2118_v3, %v2091_v1 }
 0x30d   : > { %v2092_v27 = vadd.f32 %v2074_v6, %v2060_v21 }
 0x30e   : > { %v2127_v28 = vadd.f32 %v2119_v4, %v2109_v59 }
 0x30f   : > { %v2120_v29 = vmul.f32 %v2118_v3, %v2092_v27  ;;  %v2021_v9 = vpop.f32.mrf.mxu0 }
 0x310   : > { %2135 = vst [vmem:[%s3908_s30] sm:$0xff] %v2127_v28  ;;  %v2061_v31 = vadd.f32 %v2021_v9, %v1948_v11 }
 0x311   : > { %v2128_v20 = vadd.f32 %v2120_v29, %v2110_v53 }
 0x312   : > { %v2093_v12 = vadd.f32 %v2079_v10, %v2061_v31  ;;  %v2050_v42 = vpop.f32.mrf.mxu1 }
 0x313   : > { %2136 = vst [vmem:[%s3908_s30 + $0x8] sm:$0xff] %v2128_v20  ;;  %v2062_v39 = vadd.f32 %v2050_v42, %v1977_v22 }
 0x314   : > { %v2121_v46 = vmul.f32 %v2118_v3, %v2093_v12 }
 0x315   : > { %v2094_v58 = vadd.f32 %v2079_v10, %v2062_v39 }
 0x316   : > { %v2129_v60 = vadd.f32 %v2121_v46, %v3826_v40 }
 0x317   : > { %v2122_v51 = vmul.f32 %v2118_v3, %v2094_v58  ;;  %v2024_v35 = vpop.f32.mrf.mxu0 }
 0x318   : > { %2137 = vst [vmem:[%s3908_s30 + $0x10] sm:$0xff] %v2129_v60  ;;  %v2063_v37 = vadd.f32 %v2024_v35, %v1951_v18 }
 0x319   : > { %v2130_v32 = vadd.f32 %v2122_v51, %v3871_v14  ;;  %v2089_v14 = vpop.permute.xlu0 %2088 }
 0x31a   : > { %v2095_v41 = vadd.f32 %v2084_v30, %v2063_v37  ;;  %v2053_v52 = vpop.f32.mrf.mxu1 }
 0x31b   : > { %2138 = vst [vmem:[%s3908_s30 + $0x18] sm:$0xff] %v2130_v32  ;;  %v2064_v55 = vadd.f32 %v2053_v52, %v1980_v33 }
 0x31c   : > { %v2123_v43 = vmul.f32 %v2118_v3, %v2095_v41 }
 0x31d   : > { %v2096_v59 = vadd.f32 %v2084_v30, %v2064_v55 }
 0x31e   : > { %v2131_v40 = vadd.f32 %v2123_v43, %v3853_v56 }
 0x31f   : > { %v2124_v53 = vmul.f32 %v2118_v3, %v2096_v59  ;;  %v2027_v13 = vpop.f32.mrf.mxu0 }
 0x320   : > { %2139 = vst [vmem:[%s3908_s30 + $0x20] sm:$0xff] %v2131_v40  ;;  %v2065_v16 = vadd.f32 %v2027_v13, %v1954_v48 }
 0x321   : > { %v2132_v34 = vadd.f32 %v2124_v53, %v3859_v0 }
 0x322   : > { %v2097_v36 = vadd.f32 %v2089_v14, %v2065_v16  ;;  %v2056_v54 = vpop.f32.mrf.mxu1 }
 0x323   : > { %2140 = vst [vmem:[%s3908_s30 + $0x28] sm:$0xff] %v2132_v34  ;;  %v2066_v63 = vadd.f32 %v2056_v54, %v1983_v15 }
 0x324   : > { %v2125_v17 = vmul.f32 %v2118_v3, %v2097_v36 }
 0x325   : > { %v2098_v24 = vadd.f32 %v2089_v14, %v2066_v63 }
 0x326   : > { %v2133_v56 = vadd.f32 %v2125_v17, %v3831_v47 }
 0x327   : > { %v2126_v50 = vmul.f32 %v2118_v3, %v2098_v24 }
 0x328   : > { %2141 = vst [vmem:[%s3908_s30 + $0x30] sm:$0xff] %v2133_v56 }
 0x329   : > { %v2134_v49 = vadd.f32 %v2126_v50, %v3839_v8 }
 0x32b   : > { %2142 = vst [vmem:[%s3908_s30 + $0x38] sm:$0xff] %v2134_v49 }
 0x32c PF: > { %s27_s20 = sadd.s32 1, %s2905_s20  }
 0x32d   : > { %p24_p4 = scmp.ge.s32.totalorder %s27_s20, 4  }
 0x32f   :  { %26 = sbr.rel (!%p24_p4) target bundleno = 2 (0x2), region = 130 }

</bundles_post_ra>
